<compile_context>
chip_gen: v7x
topology: tpu7x:2x2x1
jax: 0.10.0
libtpu: 0.0.40
codegen_flags: <defaults>
</compile_context>

<pallas_src>
import functools

import jax
import jax.numpy as jnp
import numpy as np
from jax import lax
from jax.experimental import pallas as pl
from jax.experimental.pallas import tpu as pltpu


def _lstm_kernel(gx1_ref, wf_ref, b2_ref, wfc_ref, bfc_ref,
                 out_ref,
                 hcat, r1_s, c1_s, c2_s,
                 *, unroll):
    """One (batch_block, time_block) grid step of the staircase-fused LSTM."""
    ti = pl.program_id(1)                      # time-block index (sequential axis)

    B = c1_s.shape[0]
    H = c1_s.shape[-1]
    Tb = gx1_ref.shape[0]

    @pl.when(ti == 0)
    def _():
        # Fresh state for this batch block: h1=h2=0, c1=c2=0, r1 = h1_{-1}@Whh1 = 0.
        hcat[...] = jnp.zeros_like(hcat)
        r1_s[...] = jnp.zeros_like(r1_s)
        c1_s[...] = jnp.zeros_like(c1_s)
        c2_s[...] = jnp.zeros_like(c2_s)

    # Hoist weight loads and the bias broadcast out of the timestep loop.
    wf = wf_ref[...]                                        # (2H, 8H) bf16 fused weight
    b2b = jnp.broadcast_to(b2_ref[...], (B, 4 * H))         # (B, 4H) f32, hoisted

    def gates_to_hc(gates, c):
        # PyTorch gate order [i, f, g, o]; every slice is 128-lane aligned (H = 128).
        i = jax.nn.sigmoid(gates[:, 0 * H:1 * H])
        f = jax.nn.sigmoid(gates[:, 1 * H:2 * H])
        g = jnp.tanh(gates[:, 2 * H:3 * H])
        o = jax.nn.sigmoid(gates[:, 3 * H:4 * H])
        c_new = f * c + i * g
        h_new = o * jnp.tanh(c_new)
        return h_new, c_new

    def step(j, carry):
        r1, c1, c2 = carry
        # ---- layer 1, step s: input projection precomputed (gx1), recurrent part r1
        #      produced by the PREVIOUS step's fused matmul (staircase). ----
        g1 = gx1_ref[j].astype(jnp.float32) + r1
        h1, c1 = gates_to_hc(g1, c1)
        hcat[:, 0:H] = h1.astype(hcat.dtype)                # bf16 dot operand, no concat
        # ---- single fused MXU dot: [h1_s | h2_{s-1}] @ [[Whh1, Wih2],[0, Whh2]] ----
        fused = jnp.dot(hcat[...], wf, preferred_element_type=jnp.float32)  # (B, 8H)
        r1_next = fused[:, 0:4 * H]                         # = h1_s @ Whh1 (for s+1)
        g2 = fused[:, 4 * H:8 * H] + b2b                    # layer-2 gates at step s
        h2, c2 = gates_to_hc(g2, c2)
        hcat[:, H:2 * H] = h2.astype(hcat.dtype)            # off the critical path
        return r1_next, c1, c2

    carry = (r1_s[...], c1_s[...], c2_s[...])
    carry = lax.fori_loop(0, Tb, step, carry, unroll=unroll)
    r1f, c1f, c2f = carry

    # Persist state across time blocks (hcat already holds the latest h1/h2).
    r1_s[...] = r1f
    c1_s[...] = c1f
    c2_s[...] = c2f

    @pl.when(ti == pl.num_programs(1) - 1)
    def _():
        # Lane-dense (B, O_pad) store; wrapper slices back to O.
        h2_last = hcat[:, H:2 * H]                          # bf16 fc input
        out_ref[...] = (jnp.dot(h2_last, wfc_ref[...],
                                preferred_element_type=jnp.float32)
                        + bfc_ref[...]).astype(out_ref.dtype)


def lstm_forward(x_btd, params, *, time_block=None, batch_block=None,
                 matmul_dtype=jnp.bfloat16):
    """x_btd: (B, T, D_in) float32 (batch_first).  Returns (B, output_dim) float32."""
    (wih1, whh1, b1, wih2, whh2, b2, wfc, bfc) = params
    B, T, D = x_btd.shape
    H = whh1.shape[0]
    O = wfc.shape[1]
    G = 4 * H
    md = matmul_dtype

    # (1) Hoist the layer-1 input projection out of the recurrence: one big f32 MXU
    #     matmul; 'tbg' folds batch_first -> time-major into the matmul.  The slab is
    #     stored in bf16 to halve the HBM stream / DMA / VMEM footprint.
    gx1 = (jnp.einsum('btd,dg->tbg', x_btd, wih1) + b1).astype(md)      # (T, B, 4H)

    # (2) Staircase-fused recurrent weight [[Whh1, Wih2], [0, Whh2]] : (2H, 8H) bf16.
    w_fused = jnp.concatenate(
        [jnp.concatenate([whh1, wih2], axis=1),
         jnp.concatenate([jnp.zeros_like(whh2), whh2], axis=1)], axis=0).astype(md)

    # (3) Lane-dense output path: pad fc to a multiple of 128 columns; bf16 weight.
    O_pad = ((O + 127) // 128) * 128
    wfc_p = jnp.zeros((H, O_pad), md).at[:, :O].set(wfc.astype(md))
    bfc_p = jnp.zeros((1, O_pad), jnp.float32).at[:, :O].set(bfc)

    # (4) Grid: (batch blocks [parallel], time blocks [sequential recurrence]).
    Tb = T if time_block is None else time_block
    Bb = B if batch_block is None else batch_block
    assert T % Tb == 0, "time_block must divide T"
    assert B % Bb == 0, "batch_block must divide B"
    unroll = int(min(Tb, 8))                       # bounded unroll (compile-time safety)
    grid = (B // Bb, T // Tb)

    full = lambda a: pl.BlockSpec(a.shape, lambda bi, ti: (0,) * a.ndim)

    # VMEM budget: double-buffered gx1 slab + double-buffered weights + scratch + out.
    isz = lambda a: int(a.size) * a.dtype.itemsize
    need = (2 * Tb * Bb * G * gx1.dtype.itemsize
            + 2 * (isz(w_fused) + isz(wfc_p) + isz(b2) + isz(bfc_p))
            + Bb * (2 * H * 2 + G * 4 + 2 * H * 4)
            + 2 * Bb * O_pad * 4)
    vmem_limit = int(min(max(2 * need, 32 * 2 ** 20), 64 * 2 ** 20))

    cost = pl.CostEstimate(
        flops=int(2 * T * B * (2 * H) * (8 * H) + 2 * B * H * O_pad),
        transcendentals=int(T * B * 10 * H),
        bytes_accessed=int(isz(gx1) + isz(w_fused) + isz(wfc_p) + isz(b2)
                           + isz(bfc_p) + B * O_pad * 4),
    )

    out_p = pl.pallas_call(
        functools.partial(_lstm_kernel, unroll=unroll),
        out_shape=jax.ShapeDtypeStruct((B, O_pad), jnp.float32),
        grid_spec=pltpu.PrefetchScalarGridSpec(
            num_scalar_prefetch=0,
            grid=grid,
            in_specs=[
                pl.BlockSpec((Tb, Bb, G), lambda bi, ti: (ti, bi, 0)),   # gx1 slab
                full(w_fused), full(b2), full(wfc_p), full(bfc_p),
            ],
            out_specs=pl.BlockSpec((Bb, O_pad), lambda bi, ti: (bi, 0)),
            scratch_shapes=[
                pltpu.VMEM((Bb, 2 * H), md),           # hcat = [h1 | h2] (dot LHS)
                pltpu.VMEM((Bb, G), jnp.float32),      # r1 = h1 @ Whh1 carry
                pltpu.VMEM((Bb, H), jnp.float32),      # c1
                pltpu.VMEM((Bb, H), jnp.float32),      # c2
            ],
        ),
        compiler_params=pltpu.CompilerParams(
            dimension_semantics=("parallel", "arbitrary"),   # batch || , time sequential
            vmem_limit_bytes=vmem_limit),
        cost_estimate=cost,
    )(gx1, w_fused, b2, wfc_p, bfc_p)

    return out_p[:, :O]


def lstm_ref(x_btd, params, *, matmul_dtype=jnp.float32):
    """Pure-JAX reference.  matmul_dtype=f32 reproduces the PyTorch module exactly;
    matmul_dtype=bf16 mirrors the kernel's quantization choices (dot operands bf16,
    f32 accumulation / gates / cell state)."""
    (wih1, whh1, b1, wih2, whh2, b2, wfc, bfc) = params
    B, T, D = x_btd.shape
    H = whh1.shape[0]
    md = matmul_dtype
    f32 = jnp.float32

    gx1 = (jnp.einsum('btd,dg->tbg', x_btd, wih1) + b1).astype(md).astype(f32)
    whh1_q, wih2_q, whh2_q, wfc_q = (w.astype(md) for w in (whh1, wih2, whh2, wfc))

    def act(gates, c):
        i = jax.nn.sigmoid(gates[:, 0 * H:1 * H])
        f = jax.nn.sigmoid(gates[:, 1 * H:2 * H])
        g = jnp.tanh(gates[:, 2 * H:3 * H])
        o = jax.nn.sigmoid(gates[:, 3 * H:4 * H])
        c_new = f * c + i * g
        return o * jnp.tanh(c_new), c_new

    def step(carry, gx_t):
        h1, c1, h2, c2 = carry
        g1 = gx_t + jnp.dot(h1.astype(md), whh1_q, preferred_element_type=f32)
        h1, c1 = act(g1, c1)
        g2 = (jnp.dot(h1.astype(md), wih2_q, preferred_element_type=f32)
              + jnp.dot(h2.astype(md), whh2_q, preferred_element_type=f32) + b2)
        h2, c2 = act(g2, c2)
        return (h1, c1, h2, c2), None

    z = jnp.zeros((B, H), f32)
    (h1, c1, h2, c2), _ = lax.scan(step, (z, z, z, z), gx1)
    return jnp.dot(h2.astype(md), wfc_q, preferred_element_type=f32) + bfc


def init_params(key, input_dim, hidden_dim, output_dim):
    """Deterministic init, PyTorch-style uniform(-1/sqrt(H), 1/sqrt(H)).
    Weights stored pre-transposed: (in, 4H) / (H, 4H); b = b_ih + b_hh."""
    H = hidden_dim
    k = 1.0 / np.sqrt(H)
    keys = jax.random.split(key, 10)
    u = lambda kk, shape: jax.random.uniform(kk, shape, jnp.float32, -k, k)

    wih1 = u(keys[0], (input_dim, 4 * H))
    whh1 = u(keys[1], (H, 4 * H))
    b1 = u(keys[2], (1, 4 * H)) + u(keys[3], (1, 4 * H))
    wih2 = u(keys[4], (H, 4 * H))
    whh2 = u(keys[5], (H, 4 * H))
    b2 = u(keys[6], (1, 4 * H)) + u(keys[7], (1, 4 * H))
    wfc = u(keys[8], (H, output_dim))
    bfc = u(keys[9], (1, output_dim))
    return (wih1, whh1, b1, wih2, whh2, b2, wfc, bfc)


if __name__ == "__main__":
    # Small shapes consistent with the module (input_dim=2, output_dim=2, 2 layers).
    # H = 128 keeps every gate slice 128-lane aligned.
    B, T, D_IN, H, O = 8, 8, 2, 128, 2

    key = jax.random.PRNGKey(0)
    kx, kp = jax.random.split(key)
    x = jax.random.normal(kx, (B, T, D_IN), jnp.float32)      # (B, T, D_in), batch_first
    params = init_params(kp, D_IN, H, O)

    out = jax.block_until_ready(lstm_forward(x, params))
    assert out.shape == (B, O), out.shape

    # Tight check against a reference with matching bf16-matmul quantization.
    ref_bf16 = jax.block_until_ready(lstm_ref(x, params, matmul_dtype=jnp.bfloat16))
    np.testing.assert_allclose(np.asarray(out), np.asarray(ref_bf16),
                               rtol=1e-2, atol=2e-3)

    # Loose check against the full-f32 (PyTorch-semantics) reference.
    ref_f32 = jax.block_until_ready(lstm_ref(x, params, matmul_dtype=jnp.float32))
    np.testing.assert_allclose(np.asarray(out), np.asarray(ref_f32),
                               rtol=5e-2, atol=3e-2)

    print("KERNEL_OK")
</pallas_src>

<mosaic_0001>
module attributes {stable_mosaic.version = 11 : i64} {
  func.func @_lstm_kernel(%arg0: i32, %arg1: i32, %arg2: memref<8x8x512xbf16, #tpu.memory_space<vmem>>, %arg3: memref<256x1024xbf16, #tpu.memory_space<vmem>>, %arg4: memref<1x512xf32, #tpu.memory_space<vmem>>, %arg5: memref<128x128xbf16, #tpu.memory_space<vmem>>, %arg6: memref<1x128xf32, #tpu.memory_space<vmem>>, %arg7: memref<8x128xf32, #tpu.memory_space<vmem>>, %arg8: memref<8x256xbf16, #tpu.memory_space<vmem>>, %arg9: memref<8x512xf32, #tpu.memory_space<vmem>>, %arg10: memref<8x128xf32, #tpu.memory_space<vmem>>, %arg11: memref<8x128xf32, #tpu.memory_space<vmem>>) attributes {dimension_semantics = [#tpu.dimension_semantics<parallel>, #tpu.dimension_semantics<arbitrary>], iteration_bounds = array<i64: 1, 1>, scalar_prefetch = 0 : i64, scratch_operands = 4 : i64, tpu.core_type = #tpu.core_type<tc>, window_params = [{transform_indices = @transform_0, window_bounds = array<i64: 8, 8, 512>}, {pipeline_mode = #tpu.pipeline_mode<synchronous>, transform_indices = @transform_1, window_bounds = array<i64: 256, 1024>}, {pipeline_mode = #tpu.pipeline_mode<synchronous>, transform_indices = @transform_2, window_bounds = array<i64: 1, 512>}, {pipeline_mode = #tpu.pipeline_mode<synchronous>, transform_indices = @transform_3, window_bounds = array<i64: 128, 128>}, {pipeline_mode = #tpu.pipeline_mode<synchronous>, transform_indices = @transform_4, window_bounds = array<i64: 1, 128>}, {transform_indices = @transform_5, window_bounds = array<i64: 8, 128>}]} {
    %c0_i32 = arith.constant 0 : i32
    %0 = arith.cmpi eq, %arg1, %c0_i32 : i32
    %1 = arith.extui %0 : i1 to i32
    %c0_i32_0 = arith.constant 0 : i32
    %2 = arith.cmpi ne, %1, %c0_i32_0 : i32
    scf.if %2 {
      %cst_137 = arith.constant 0.000000e+00 : bf16
      %528 = vector.broadcast %cst_137 : bf16 to vector<8x256xbf16>
      %c0_138 = arith.constant 0 : index
      %c0_139 = arith.constant 0 : index
      %529 = vector.load %arg8[%c0_138, %c0_139] : memref<8x256xbf16, #tpu.memory_space<vmem>>, vector<8x256xbf16>
      tpu.vector_store %arg8[%c0_138, %c0_139], %528 {strides = array<i32>} : memref<8x256xbf16, #tpu.memory_space<vmem>>, vector<8x256xbf16>,
      %cst_140 = arith.constant 0.000000e+00 : f32
      %530 = vector.broadcast %cst_140 : f32 to vector<8x512xf32>
      %c0_141 = arith.constant 0 : index
      %c0_142 = arith.constant 0 : index
      %531 = vector.load %arg9[%c0_141, %c0_142] : memref<8x512xf32, #tpu.memory_space<vmem>>, vector<8x512xf32>
      tpu.vector_store %arg9[%c0_141, %c0_142], %530 {strides = array<i32>} : memref<8x512xf32, #tpu.memory_space<vmem>>, vector<8x512xf32>,
      %cst_143 = arith.constant 0.000000e+00 : f32
      %532 = vector.broadcast %cst_143 : f32 to vector<8x128xf32>
      %c0_144 = arith.constant 0 : index
      %c0_145 = arith.constant 0 : index
      %533 = vector.load %arg10[%c0_144, %c0_145] : memref<8x128xf32, #tpu.memory_space<vmem>>, vector<8x128xf32>
      tpu.vector_store %arg10[%c0_144, %c0_145], %532 {strides = array<i32>} : memref<8x128xf32, #tpu.memory_space<vmem>>, vector<8x128xf32>,
      %cst_146 = arith.constant 0.000000e+00 : f32
      %534 = vector.broadcast %cst_146 : f32 to vector<8x128xf32>
      %c0_147 = arith.constant 0 : index
      %c0_148 = arith.constant 0 : index
      %535 = vector.load %arg11[%c0_147, %c0_148] : memref<8x128xf32, #tpu.memory_space<vmem>>, vector<8x128xf32>
      tpu.vector_store %arg11[%c0_147, %c0_148], %534 {strides = array<i32>} : memref<8x128xf32, #tpu.memory_space<vmem>>, vector<8x128xf32>,
    } else {
    }
    %c0 = arith.constant 0 : index
    %c0_1 = arith.constant 0 : index
    %3 = vector.load %arg3[%c0, %c0_1] : memref<256x1024xbf16, #tpu.memory_space<vmem>>, vector<256x1024xbf16>
    %c0_2 = arith.constant 0 : index
    %c0_3 = arith.constant 0 : index
    %4 = vector.load %arg4[%c0_2, %c0_3] : memref<1x512xf32, #tpu.memory_space<vmem>>, vector<1x512xf32>
    %5 = vector.shape_cast %4 : vector<1x512xf32> to vector<1x512xf32>
    %6 = vector.broadcast %5 : vector<1x512xf32> to vector<8x512xf32>
    %c0_4 = arith.constant 0 : index
    %c0_5 = arith.constant 0 : index
    %7 = vector.load %arg9[%c0_4, %c0_5] : memref<8x512xf32, #tpu.memory_space<vmem>>, vector<8x512xf32>
    %c0_6 = arith.constant 0 : index
    %c0_7 = arith.constant 0 : index
    %8 = vector.load %arg10[%c0_6, %c0_7] : memref<8x128xf32, #tpu.memory_space<vmem>>, vector<8x128xf32>
    %c0_8 = arith.constant 0 : index
    %c0_9 = arith.constant 0 : index
    %9 = vector.load %arg11[%c0_8, %c0_9] : memref<8x128xf32, #tpu.memory_space<vmem>>, vector<8x128xf32>
    %c0_i32_10 = arith.constant 0 : i32
    %10 = arith.index_cast %c0_i32_10 : i32 to index
    %c0_11 = arith.constant 0 : index
    %c0_12 = arith.constant 0 : index
    %11 = vector.load %arg2[%10, %c0_11, %c0_12] : memref<8x8x512xbf16, #tpu.memory_space<vmem>>, vector<1x8x512xbf16>
    %12 = vector.shape_cast %11 : vector<1x8x512xbf16> to vector<8x512xbf16>
    %13 = arith.extf %12 : vector<8x512xbf16> to vector<8x512xf32>
    %14 = arith.addf %13, %7 : vector<8x512xf32>
    %15 = vector.extract_strided_slice %14 {offsets = [0, 0], sizes = [8, 128], strides = [1, 1]} : vector<8x512xf32> to vector<8x128xf32>
    %16 = arith.negf %15 : vector<8x128xf32>
    %17 = math.exp %16 : vector<8x128xf32>
    %cst = arith.constant 1.000000e+00 : f32
    %18 = vector.broadcast %cst : f32 to vector<8x128xf32>
    %19 = arith.addf %18, %17 : vector<8x128xf32>
    %20 = arith.divf %18, %19 : vector<8x128xf32>
    %21 = vector.extract_strided_slice %14 {offsets = [0, 128], sizes = [8, 128], strides = [1, 1]} : vector<8x512xf32> to vector<8x128xf32>
    %22 = arith.negf %21 : vector<8x128xf32>
    %23 = math.exp %22 : vector<8x128xf32>
    %cst_13 = arith.constant 1.000000e+00 : f32
    %24 = vector.broadcast %cst_13 : f32 to vector<8x128xf32>
    %25 = arith.addf %24, %23 : vector<8x128xf32>
    %26 = arith.divf %24, %25 : vector<8x128xf32>
    %27 = vector.extract_strided_slice %14 {offsets = [0, 256], sizes = [8, 128], strides = [1, 1]} : vector<8x512xf32> to vector<8x128xf32>
    %28 = math.tanh %27 : vector<8x128xf32>
    %29 = vector.extract_strided_slice %14 {offsets = [0, 384], sizes = [8, 128], strides = [1, 1]} : vector<8x512xf32> to vector<8x128xf32>
    %30 = arith.negf %29 : vector<8x128xf32>
    %31 = math.exp %30 : vector<8x128xf32>
    %cst_14 = arith.constant 1.000000e+00 : f32
    %32 = vector.broadcast %cst_14 : f32 to vector<8x128xf32>
    %33 = arith.addf %32, %31 : vector<8x128xf32>
    %34 = arith.divf %32, %33 : vector<8x128xf32>
    %35 = arith.mulf %26, %8 : vector<8x128xf32>
    %36 = arith.mulf %20, %28 : vector<8x128xf32>
    %37 = arith.addf %35, %36 : vector<8x128xf32>
    %38 = math.tanh %37 : vector<8x128xf32>
    %39 = arith.mulf %34, %38 : vector<8x128xf32>
    %40 = arith.truncf %39 : vector<8x128xf32> to vector<8x128xbf16>
    %c0_15 = arith.constant 0 : index
    %c0_16 = arith.constant 0 : index
    %41 = vector.load %arg8[%c0_15, %c0_16] : memref<8x256xbf16, #tpu.memory_space<vmem>>, vector<8x128xbf16>
    tpu.vector_store %arg8[%c0_15, %c0_16], %40 {strides = array<i32>} : memref<8x256xbf16, #tpu.memory_space<vmem>>, vector<8x128xbf16>,
    %c0_17 = arith.constant 0 : index
    %c0_18 = arith.constant 0 : index
    %42 = vector.load %arg8[%c0_17, %c0_18] : memref<8x256xbf16, #tpu.memory_space<vmem>>, vector<8x256xbf16>
    %cst_19 = arith.constant dense<0.000000e+00> : vector<8x1024xf32>
    %43 = tpu.matmul %42, %3, %cst_19 {dimension_numbers = #tpu.dot_dimension_numbers<[1], [0], [0], [1], [0, 0, 1, 1], [], []>} : vector<8x256xbf16>, vector<256x1024xbf16>, vector<8x1024xf32> -> vector<8x1024xf32>
    %44 = vector.extract_strided_slice %43 {offsets = [0, 0], sizes = [8, 512], strides = [1, 1]} : vector<8x1024xf32> to vector<8x512xf32>
    %45 = vector.extract_strided_slice %43 {offsets = [0, 512], sizes = [8, 512], strides = [1, 1]} : vector<8x1024xf32> to vector<8x512xf32>
    %46 = arith.addf %45, %6 : vector<8x512xf32>
    %47 = vector.extract_strided_slice %46 {offsets = [0, 0], sizes = [8, 128], strides = [1, 1]} : vector<8x512xf32> to vector<8x128xf32>
    %48 = arith.negf %47 : vector<8x128xf32>
    %49 = math.exp %48 : vector<8x128xf32>
    %cst_20 = arith.constant 1.000000e+00 : f32
    %50 = vector.broadcast %cst_20 : f32 to vector<8x128xf32>
    %51 = arith.addf %50, %49 : vector<8x128xf32>
    %52 = arith.divf %50, %51 : vector<8x128xf32>
    %53 = vector.extract_strided_slice %46 {offsets = [0, 128], sizes = [8, 128], strides = [1, 1]} : vector<8x512xf32> to vector<8x128xf32>
    %54 = arith.negf %53 : vector<8x128xf32>
    %55 = math.exp %54 : vector<8x128xf32>
    %cst_21 = arith.constant 1.000000e+00 : f32
    %56 = vector.broadcast %cst_21 : f32 to vector<8x128xf32>
    %57 = arith.addf %56, %55 : vector<8x128xf32>
    %58 = arith.divf %56, %57 : vector<8x128xf32>
    %59 = vector.extract_strided_slice %46 {offsets = [0, 256], sizes = [8, 128], strides = [1, 1]} : vector<8x512xf32> to vector<8x128xf32>
    %60 = math.tanh %59 : vector<8x128xf32>
    %61 = vector.extract_strided_slice %46 {offsets = [0, 384], sizes = [8, 128], strides = [1, 1]} : vector<8x512xf32> to vector<8x128xf32>
    %62 = arith.negf %61 : vector<8x128xf32>
    %63 = math.exp %62 : vector<8x128xf32>
    %cst_22 = arith.constant 1.000000e+00 : f32
    %64 = vector.broadcast %cst_22 : f32 to vector<8x128xf32>
    %65 = arith.addf %64, %63 : vector<8x128xf32>
    %66 = arith.divf %64, %65 : vector<8x128xf32>
    %67 = arith.mulf %58, %9 : vector<8x128xf32>
    %68 = arith.mulf %52, %60 : vector<8x128xf32>
    %69 = arith.addf %67, %68 : vector<8x128xf32>
    %70 = math.tanh %69 : vector<8x128xf32>
    %71 = arith.mulf %66, %70 : vector<8x128xf32>
    %72 = arith.truncf %71 : vector<8x128xf32> to vector<8x128xbf16>
    %c0_23 = arith.constant 0 : index
    %c128 = arith.constant 128 : index
    %73 = vector.load %arg8[%c0_23, %c128] : memref<8x256xbf16, #tpu.memory_space<vmem>>, vector<8x128xbf16>
    tpu.vector_store %arg8[%c0_23, %c128], %72 {strides = array<i32>} : memref<8x256xbf16, #tpu.memory_space<vmem>>, vector<8x128xbf16>,
    %c1_i32 = arith.constant 1 : i32
    %74 = arith.index_cast %c1_i32 : i32 to index
    %c0_24 = arith.constant 0 : index
    %c0_25 = arith.constant 0 : index
    %75 = vector.load %arg2[%74, %c0_24, %c0_25] : memref<8x8x512xbf16, #tpu.memory_space<vmem>>, vector<1x8x512xbf16>
    %76 = vector.shape_cast %75 : vector<1x8x512xbf16> to vector<8x512xbf16>
    %77 = arith.extf %76 : vector<8x512xbf16> to vector<8x512xf32>
    %78 = arith.addf %77, %44 : vector<8x512xf32>
    %79 = vector.extract_strided_slice %78 {offsets = [0, 0], sizes = [8, 128], strides = [1, 1]} : vector<8x512xf32> to vector<8x128xf32>
    %80 = arith.negf %79 : vector<8x128xf32>
    %81 = math.exp %80 : vector<8x128xf32>
    %cst_26 = arith.constant 1.000000e+00 : f32
    %82 = vector.broadcast %cst_26 : f32 to vector<8x128xf32>
    %83 = arith.addf %82, %81 : vector<8x128xf32>
    %84 = arith.divf %82, %83 : vector<8x128xf32>
    %85 = vector.extract_strided_slice %78 {offsets = [0, 128], sizes = [8, 128], strides = [1, 1]} : vector<8x512xf32> to vector<8x128xf32>
    %86 = arith.negf %85 : vector<8x128xf32>
    %87 = math.exp %86 : vector<8x128xf32>
    %cst_27 = arith.constant 1.000000e+00 : f32
    %88 = vector.broadcast %cst_27 : f32 to vector<8x128xf32>
    %89 = arith.addf %88, %87 : vector<8x128xf32>
    %90 = arith.divf %88, %89 : vector<8x128xf32>
    %91 = vector.extract_strided_slice %78 {offsets = [0, 256], sizes = [8, 128], strides = [1, 1]} : vector<8x512xf32> to vector<8x128xf32>
    %92 = math.tanh %91 : vector<8x128xf32>
    %93 = vector.extract_strided_slice %78 {offsets = [0, 384], sizes = [8, 128], strides = [1, 1]} : vector<8x512xf32> to vector<8x128xf32>
    %94 = arith.negf %93 : vector<8x128xf32>
    %95 = math.exp %94 : vector<8x128xf32>
    %cst_28 = arith.constant 1.000000e+00 : f32
    %96 = vector.broadcast %cst_28 : f32 to vector<8x128xf32>
    %97 = arith.addf %96, %95 : vector<8x128xf32>
    %98 = arith.divf %96, %97 : vector<8x128xf32>
    %99 = arith.mulf %90, %37 : vector<8x128xf32>
    %100 = arith.mulf %84, %92 : vector<8x128xf32>
    %101 = arith.addf %99, %100 : vector<8x128xf32>
    %102 = math.tanh %101 : vector<8x128xf32>
    %103 = arith.mulf %98, %102 : vector<8x128xf32>
    %104 = arith.truncf %103 : vector<8x128xf32> to vector<8x128xbf16>
    %c0_29 = arith.constant 0 : index
    %c0_30 = arith.constant 0 : index
    %105 = vector.load %arg8[%c0_29, %c0_30] : memref<8x256xbf16, #tpu.memory_space<vmem>>, vector<8x128xbf16>
    tpu.vector_store %arg8[%c0_29, %c0_30], %104 {strides = array<i32>} : memref<8x256xbf16, #tpu.memory_space<vmem>>, vector<8x128xbf16>,
    %c0_31 = arith.constant 0 : index
    %c0_32 = arith.constant 0 : index
    %106 = vector.load %arg8[%c0_31, %c0_32] : memref<8x256xbf16, #tpu.memory_space<vmem>>, vector<8x256xbf16>
    %cst_33 = arith.constant dense<0.000000e+00> : vector<8x1024xf32>
    %107 = tpu.matmul %106, %3, %cst_33 {dimension_numbers = #tpu.dot_dimension_numbers<[1], [0], [0], [1], [0, 0, 1, 1], [], []>} : vector<8x256xbf16>, vector<256x1024xbf16>, vector<8x1024xf32> -> vector<8x1024xf32>
    %108 = vector.extract_strided_slice %107 {offsets = [0, 0], sizes = [8, 512], strides = [1, 1]} : vector<8x1024xf32> to vector<8x512xf32>
    %109 = vector.extract_strided_slice %107 {offsets = [0, 512], sizes = [8, 512], strides = [1, 1]} : vector<8x1024xf32> to vector<8x512xf32>
    %110 = arith.addf %109, %6 : vector<8x512xf32>
    %111 = vector.extract_strided_slice %110 {offsets = [0, 0], sizes = [8, 128], strides = [1, 1]} : vector<8x512xf32> to vector<8x128xf32>
    %112 = arith.negf %111 : vector<8x128xf32>
    %113 = math.exp %112 : vector<8x128xf32>
    %cst_34 = arith.constant 1.000000e+00 : f32
    %114 = vector.broadcast %cst_34 : f32 to vector<8x128xf32>
    %115 = arith.addf %114, %113 : vector<8x128xf32>
    %116 = arith.divf %114, %115 : vector<8x128xf32>
    %117 = vector.extract_strided_slice %110 {offsets = [0, 128], sizes = [8, 128], strides = [1, 1]} : vector<8x512xf32> to vector<8x128xf32>
    %118 = arith.negf %117 : vector<8x128xf32>
    %119 = math.exp %118 : vector<8x128xf32>
    %cst_35 = arith.constant 1.000000e+00 : f32
    %120 = vector.broadcast %cst_35 : f32 to vector<8x128xf32>
    %121 = arith.addf %120, %119 : vector<8x128xf32>
    %122 = arith.divf %120, %121 : vector<8x128xf32>
    %123 = vector.extract_strided_slice %110 {offsets = [0, 256], sizes = [8, 128], strides = [1, 1]} : vector<8x512xf32> to vector<8x128xf32>
    %124 = math.tanh %123 : vector<8x128xf32>
    %125 = vector.extract_strided_slice %110 {offsets = [0, 384], sizes = [8, 128], strides = [1, 1]} : vector<8x512xf32> to vector<8x128xf32>
    %126 = arith.negf %125 : vector<8x128xf32>
    %127 = math.exp %126 : vector<8x128xf32>
    %cst_36 = arith.constant 1.000000e+00 : f32
    %128 = vector.broadcast %cst_36 : f32 to vector<8x128xf32>
    %129 = arith.addf %128, %127 : vector<8x128xf32>
    %130 = arith.divf %128, %129 : vector<8x128xf32>
    %131 = arith.mulf %122, %69 : vector<8x128xf32>
    %132 = arith.mulf %116, %124 : vector<8x128xf32>
    %133 = arith.addf %131, %132 : vector<8x128xf32>
    %134 = math.tanh %133 : vector<8x128xf32>
    %135 = arith.mulf %130, %134 : vector<8x128xf32>
    %136 = arith.truncf %135 : vector<8x128xf32> to vector<8x128xbf16>
    %c0_37 = arith.constant 0 : index
    %c128_38 = arith.constant 128 : index
    %137 = vector.load %arg8[%c0_37, %c128_38] : memref<8x256xbf16, #tpu.memory_space<vmem>>, vector<8x128xbf16>
    tpu.vector_store %arg8[%c0_37, %c128_38], %136 {strides = array<i32>} : memref<8x256xbf16, #tpu.memory_space<vmem>>, vector<8x128xbf16>,
    %c2_i32 = arith.constant 2 : i32
    %138 = arith.index_cast %c2_i32 : i32 to index
    %c0_39 = arith.constant 0 : index
    %c0_40 = arith.constant 0 : index
    %139 = vector.load %arg2[%138, %c0_39, %c0_40] : memref<8x8x512xbf16, #tpu.memory_space<vmem>>, vector<1x8x512xbf16>
    %140 = vector.shape_cast %139 : vector<1x8x512xbf16> to vector<8x512xbf16>
    %141 = arith.extf %140 : vector<8x512xbf16> to vector<8x512xf32>
    %142 = arith.addf %141, %108 : vector<8x512xf32>
    %143 = vector.extract_strided_slice %142 {offsets = [0, 0], sizes = [8, 128], strides = [1, 1]} : vector<8x512xf32> to vector<8x128xf32>
    %144 = arith.negf %143 : vector<8x128xf32>
    %145 = math.exp %144 : vector<8x128xf32>
    %cst_41 = arith.constant 1.000000e+00 : f32
    %146 = vector.broadcast %cst_41 : f32 to vector<8x128xf32>
    %147 = arith.addf %146, %145 : vector<8x128xf32>
    %148 = arith.divf %146, %147 : vector<8x128xf32>
    %149 = vector.extract_strided_slice %142 {offsets = [0, 128], sizes = [8, 128], strides = [1, 1]} : vector<8x512xf32> to vector<8x128xf32>
    %150 = arith.negf %149 : vector<8x128xf32>
    %151 = math.exp %150 : vector<8x128xf32>
    %cst_42 = arith.constant 1.000000e+00 : f32
    %152 = vector.broadcast %cst_42 : f32 to vector<8x128xf32>
    %153 = arith.addf %152, %151 : vector<8x128xf32>
    %154 = arith.divf %152, %153 : vector<8x128xf32>
    %155 = vector.extract_strided_slice %142 {offsets = [0, 256], sizes = [8, 128], strides = [1, 1]} : vector<8x512xf32> to vector<8x128xf32>
    %156 = math.tanh %155 : vector<8x128xf32>
    %157 = vector.extract_strided_slice %142 {offsets = [0, 384], sizes = [8, 128], strides = [1, 1]} : vector<8x512xf32> to vector<8x128xf32>
    %158 = arith.negf %157 : vector<8x128xf32>
    %159 = math.exp %158 : vector<8x128xf32>
    %cst_43 = arith.constant 1.000000e+00 : f32
    %160 = vector.broadcast %cst_43 : f32 to vector<8x128xf32>
    %161 = arith.addf %160, %159 : vector<8x128xf32>
    %162 = arith.divf %160, %161 : vector<8x128xf32>
    %163 = arith.mulf %154, %101 : vector<8x128xf32>
    %164 = arith.mulf %148, %156 : vector<8x128xf32>
    %165 = arith.addf %163, %164 : vector<8x128xf32>
    %166 = math.tanh %165 : vector<8x128xf32>
    %167 = arith.mulf %162, %166 : vector<8x128xf32>
    %168 = arith.truncf %167 : vector<8x128xf32> to vector<8x128xbf16>
    %c0_44 = arith.constant 0 : index
    %c0_45 = arith.constant 0 : index
    %169 = vector.load %arg8[%c0_44, %c0_45] : memref<8x256xbf16, #tpu.memory_space<vmem>>, vector<8x128xbf16>
    tpu.vector_store %arg8[%c0_44, %c0_45], %168 {strides = array<i32>} : memref<8x256xbf16, #tpu.memory_space<vmem>>, vector<8x128xbf16>,
    %c0_46 = arith.constant 0 : index
    %c0_47 = arith.constant 0 : index
    %170 = vector.load %arg8[%c0_46, %c0_47] : memref<8x256xbf16, #tpu.memory_space<vmem>>, vector<8x256xbf16>
    %cst_48 = arith.constant dense<0.000000e+00> : vector<8x1024xf32>
    %171 = tpu.matmul %170, %3, %cst_48 {dimension_numbers = #tpu.dot_dimension_numbers<[1], [0], [0], [1], [0, 0, 1, 1], [], []>} : vector<8x256xbf16>, vector<256x1024xbf16>, vector<8x1024xf32> -> vector<8x1024xf32>
    %172 = vector.extract_strided_slice %171 {offsets = [0, 0], sizes = [8, 512], strides = [1, 1]} : vector<8x1024xf32> to vector<8x512xf32>
    %173 = vector.extract_strided_slice %171 {offsets = [0, 512], sizes = [8, 512], strides = [1, 1]} : vector<8x1024xf32> to vector<8x512xf32>
    %174 = arith.addf %173, %6 : vector<8x512xf32>
    %175 = vector.extract_strided_slice %174 {offsets = [0, 0], sizes = [8, 128], strides = [1, 1]} : vector<8x512xf32> to vector<8x128xf32>
    %176 = arith.negf %175 : vector<8x128xf32>
    %177 = math.exp %176 : vector<8x128xf32>
    %cst_49 = arith.constant 1.000000e+00 : f32
    %178 = vector.broadcast %cst_49 : f32 to vector<8x128xf32>
    %179 = arith.addf %178, %177 : vector<8x128xf32>
    %180 = arith.divf %178, %179 : vector<8x128xf32>
    %181 = vector.extract_strided_slice %174 {offsets = [0, 128], sizes = [8, 128], strides = [1, 1]} : vector<8x512xf32> to vector<8x128xf32>
    %182 = arith.negf %181 : vector<8x128xf32>
    %183 = math.exp %182 : vector<8x128xf32>
    %cst_50 = arith.constant 1.000000e+00 : f32
    %184 = vector.broadcast %cst_50 : f32 to vector<8x128xf32>
    %185 = arith.addf %184, %183 : vector<8x128xf32>
    %186 = arith.divf %184, %185 : vector<8x128xf32>
    %187 = vector.extract_strided_slice %174 {offsets = [0, 256], sizes = [8, 128], strides = [1, 1]} : vector<8x512xf32> to vector<8x128xf32>
    %188 = math.tanh %187 : vector<8x128xf32>
    %189 = vector.extract_strided_slice %174 {offsets = [0, 384], sizes = [8, 128], strides = [1, 1]} : vector<8x512xf32> to vector<8x128xf32>
    %190 = arith.negf %189 : vector<8x128xf32>
    %191 = math.exp %190 : vector<8x128xf32>
    %cst_51 = arith.constant 1.000000e+00 : f32
    %192 = vector.broadcast %cst_51 : f32 to vector<8x128xf32>
    %193 = arith.addf %192, %191 : vector<8x128xf32>
    %194 = arith.divf %192, %193 : vector<8x128xf32>
    %195 = arith.mulf %186, %133 : vector<8x128xf32>
    %196 = arith.mulf %180, %188 : vector<8x128xf32>
    %197 = arith.addf %195, %196 : vector<8x128xf32>
    %198 = math.tanh %197 : vector<8x128xf32>
    %199 = arith.mulf %194, %198 : vector<8x128xf32>
    %200 = arith.truncf %199 : vector<8x128xf32> to vector<8x128xbf16>
    %c0_52 = arith.constant 0 : index
    %c128_53 = arith.constant 128 : index
    %201 = vector.load %arg8[%c0_52, %c128_53] : memref<8x256xbf16, #tpu.memory_space<vmem>>, vector<8x128xbf16>
    tpu.vector_store %arg8[%c0_52, %c128_53], %200 {strides = array<i32>} : memref<8x256xbf16, #tpu.memory_space<vmem>>, vector<8x128xbf16>,
    %c3_i32 = arith.constant 3 : i32
    %202 = arith.index_cast %c3_i32 : i32 to index
    %c0_54 = arith.constant 0 : index
    %c0_55 = arith.constant 0 : index
    %203 = vector.load %arg2[%202, %c0_54, %c0_55] : memref<8x8x512xbf16, #tpu.memory_space<vmem>>, vector<1x8x512xbf16>
    %204 = vector.shape_cast %203 : vector<1x8x512xbf16> to vector<8x512xbf16>
    %205 = arith.extf %204 : vector<8x512xbf16> to vector<8x512xf32>
    %206 = arith.addf %205, %172 : vector<8x512xf32>
    %207 = vector.extract_strided_slice %206 {offsets = [0, 0], sizes = [8, 128], strides = [1, 1]} : vector<8x512xf32> to vector<8x128xf32>
    %208 = arith.negf %207 : vector<8x128xf32>
    %209 = math.exp %208 : vector<8x128xf32>
    %cst_56 = arith.constant 1.000000e+00 : f32
    %210 = vector.broadcast %cst_56 : f32 to vector<8x128xf32>
    %211 = arith.addf %210, %209 : vector<8x128xf32>
    %212 = arith.divf %210, %211 : vector<8x128xf32>
    %213 = vector.extract_strided_slice %206 {offsets = [0, 128], sizes = [8, 128], strides = [1, 1]} : vector<8x512xf32> to vector<8x128xf32>
    %214 = arith.negf %213 : vector<8x128xf32>
    %215 = math.exp %214 : vector<8x128xf32>
    %cst_57 = arith.constant 1.000000e+00 : f32
    %216 = vector.broadcast %cst_57 : f32 to vector<8x128xf32>
    %217 = arith.addf %216, %215 : vector<8x128xf32>
    %218 = arith.divf %216, %217 : vector<8x128xf32>
    %219 = vector.extract_strided_slice %206 {offsets = [0, 256], sizes = [8, 128], strides = [1, 1]} : vector<8x512xf32> to vector<8x128xf32>
    %220 = math.tanh %219 : vector<8x128xf32>
    %221 = vector.extract_strided_slice %206 {offsets = [0, 384], sizes = [8, 128], strides = [1, 1]} : vector<8x512xf32> to vector<8x128xf32>
    %222 = arith.negf %221 : vector<8x128xf32>
    %223 = math.exp %222 : vector<8x128xf32>
    %cst_58 = arith.constant 1.000000e+00 : f32
    %224 = vector.broadcast %cst_58 : f32 to vector<8x128xf32>
    %225 = arith.addf %224, %223 : vector<8x128xf32>
    %226 = arith.divf %224, %225 : vector<8x128xf32>
    %227 = arith.mulf %218, %165 : vector<8x128xf32>
    %228 = arith.mulf %212, %220 : vector<8x128xf32>
    %229 = arith.addf %227, %228 : vector<8x128xf32>
    %230 = math.tanh %229 : vector<8x128xf32>
    %231 = arith.mulf %226, %230 : vector<8x128xf32>
    %232 = arith.truncf %231 : vector<8x128xf32> to vector<8x128xbf16>
    %c0_59 = arith.constant 0 : index
    %c0_60 = arith.constant 0 : index
    %233 = vector.load %arg8[%c0_59, %c0_60] : memref<8x256xbf16, #tpu.memory_space<vmem>>, vector<8x128xbf16>
    tpu.vector_store %arg8[%c0_59, %c0_60], %232 {strides = array<i32>} : memref<8x256xbf16, #tpu.memory_space<vmem>>, vector<8x128xbf16>,
    %c0_61 = arith.constant 0 : index
    %c0_62 = arith.constant 0 : index
    %234 = vector.load %arg8[%c0_61, %c0_62] : memref<8x256xbf16, #tpu.memory_space<vmem>>, vector<8x256xbf16>
    %cst_63 = arith.constant dense<0.000000e+00> : vector<8x1024xf32>
    %235 = tpu.matmul %234, %3, %cst_63 {dimension_numbers = #tpu.dot_dimension_numbers<[1], [0], [0], [1], [0, 0, 1, 1], [], []>} : vector<8x256xbf16>, vector<256x1024xbf16>, vector<8x1024xf32> -> vector<8x1024xf32>
    %236 = vector.extract_strided_slice %235 {offsets = [0, 0], sizes = [8, 512], strides = [1, 1]} : vector<8x1024xf32> to vector<8x512xf32>
    %237 = vector.extract_strided_slice %235 {offsets = [0, 512], sizes = [8, 512], strides = [1, 1]} : vector<8x1024xf32> to vector<8x512xf32>
    %238 = arith.addf %237, %6 : vector<8x512xf32>
    %239 = vector.extract_strided_slice %238 {offsets = [0, 0], sizes = [8, 128], strides = [1, 1]} : vector<8x512xf32> to vector<8x128xf32>
    %240 = arith.negf %239 : vector<8x128xf32>
    %241 = math.exp %240 : vector<8x128xf32>
    %cst_64 = arith.constant 1.000000e+00 : f32
    %242 = vector.broadcast %cst_64 : f32 to vector<8x128xf32>
    %243 = arith.addf %242, %241 : vector<8x128xf32>
    %244 = arith.divf %242, %243 : vector<8x128xf32>
    %245 = vector.extract_strided_slice %238 {offsets = [0, 128], sizes = [8, 128], strides = [1, 1]} : vector<8x512xf32> to vector<8x128xf32>
    %246 = arith.negf %245 : vector<8x128xf32>
    %247 = math.exp %246 : vector<8x128xf32>
    %cst_65 = arith.constant 1.000000e+00 : f32
    %248 = vector.broadcast %cst_65 : f32 to vector<8x128xf32>
    %249 = arith.addf %248, %247 : vector<8x128xf32>
    %250 = arith.divf %248, %249 : vector<8x128xf32>
    %251 = vector.extract_strided_slice %238 {offsets = [0, 256], sizes = [8, 128], strides = [1, 1]} : vector<8x512xf32> to vector<8x128xf32>
    %252 = math.tanh %251 : vector<8x128xf32>
    %253 = vector.extract_strided_slice %238 {offsets = [0, 384], sizes = [8, 128], strides = [1, 1]} : vector<8x512xf32> to vector<8x128xf32>
    %254 = arith.negf %253 : vector<8x128xf32>
    %255 = math.exp %254 : vector<8x128xf32>
    %cst_66 = arith.constant 1.000000e+00 : f32
    %256 = vector.broadcast %cst_66 : f32 to vector<8x128xf32>
    %257 = arith.addf %256, %255 : vector<8x128xf32>
    %258 = arith.divf %256, %257 : vector<8x128xf32>
    %259 = arith.mulf %250, %197 : vector<8x128xf32>
    %260 = arith.mulf %244, %252 : vector<8x128xf32>
    %261 = arith.addf %259, %260 : vector<8x128xf32>
    %262 = math.tanh %261 : vector<8x128xf32>
    %263 = arith.mulf %258, %262 : vector<8x128xf32>
    %264 = arith.truncf %263 : vector<8x128xf32> to vector<8x128xbf16>
    %c0_67 = arith.constant 0 : index
    %c128_68 = arith.constant 128 : index
    %265 = vector.load %arg8[%c0_67, %c128_68] : memref<8x256xbf16, #tpu.memory_space<vmem>>, vector<8x128xbf16>
    tpu.vector_store %arg8[%c0_67, %c128_68], %264 {strides = array<i32>} : memref<8x256xbf16, #tpu.memory_space<vmem>>, vector<8x128xbf16>,
    %c4_i32 = arith.constant 4 : i32
    %266 = arith.index_cast %c4_i32 : i32 to index
    %c0_69 = arith.constant 0 : index
    %c0_70 = arith.constant 0 : index
    %267 = vector.load %arg2[%266, %c0_69, %c0_70] : memref<8x8x512xbf16, #tpu.memory_space<vmem>>, vector<1x8x512xbf16>
    %268 = vector.shape_cast %267 : vector<1x8x512xbf16> to vector<8x512xbf16>
    %269 = arith.extf %268 : vector<8x512xbf16> to vector<8x512xf32>
    %270 = arith.addf %269, %236 : vector<8x512xf32>
    %271 = vector.extract_strided_slice %270 {offsets = [0, 0], sizes = [8, 128], strides = [1, 1]} : vector<8x512xf32> to vector<8x128xf32>
    %272 = arith.negf %271 : vector<8x128xf32>
    %273 = math.exp %272 : vector<8x128xf32>
    %cst_71 = arith.constant 1.000000e+00 : f32
    %274 = vector.broadcast %cst_71 : f32 to vector<8x128xf32>
    %275 = arith.addf %274, %273 : vector<8x128xf32>
    %276 = arith.divf %274, %275 : vector<8x128xf32>
    %277 = vector.extract_strided_slice %270 {offsets = [0, 128], sizes = [8, 128], strides = [1, 1]} : vector<8x512xf32> to vector<8x128xf32>
    %278 = arith.negf %277 : vector<8x128xf32>
    %279 = math.exp %278 : vector<8x128xf32>
    %cst_72 = arith.constant 1.000000e+00 : f32
    %280 = vector.broadcast %cst_72 : f32 to vector<8x128xf32>
    %281 = arith.addf %280, %279 : vector<8x128xf32>
    %282 = arith.divf %280, %281 : vector<8x128xf32>
    %283 = vector.extract_strided_slice %270 {offsets = [0, 256], sizes = [8, 128], strides = [1, 1]} : vector<8x512xf32> to vector<8x128xf32>
    %284 = math.tanh %283 : vector<8x128xf32>
    %285 = vector.extract_strided_slice %270 {offsets = [0, 384], sizes = [8, 128], strides = [1, 1]} : vector<8x512xf32> to vector<8x128xf32>
    %286 = arith.negf %285 : vector<8x128xf32>
    %287 = math.exp %286 : vector<8x128xf32>
    %cst_73 = arith.constant 1.000000e+00 : f32
    %288 = vector.broadcast %cst_73 : f32 to vector<8x128xf32>
    %289 = arith.addf %288, %287 : vector<8x128xf32>
    %290 = arith.divf %288, %289 : vector<8x128xf32>
    %291 = arith.mulf %282, %229 : vector<8x128xf32>
    %292 = arith.mulf %276, %284 : vector<8x128xf32>
    %293 = arith.addf %291, %292 : vector<8x128xf32>
    %294 = math.tanh %293 : vector<8x128xf32>
    %295 = arith.mulf %290, %294 : vector<8x128xf32>
    %296 = arith.truncf %295 : vector<8x128xf32> to vector<8x128xbf16>
    %c0_74 = arith.constant 0 : index
    %c0_75 = arith.constant 0 : index
    %297 = vector.load %arg8[%c0_74, %c0_75] : memref<8x256xbf16, #tpu.memory_space<vmem>>, vector<8x128xbf16>
    tpu.vector_store %arg8[%c0_74, %c0_75], %296 {strides = array<i32>} : memref<8x256xbf16, #tpu.memory_space<vmem>>, vector<8x128xbf16>,
    %c0_76 = arith.constant 0 : index
    %c0_77 = arith.constant 0 : index
    %298 = vector.load %arg8[%c0_76, %c0_77] : memref<8x256xbf16, #tpu.memory_space<vmem>>, vector<8x256xbf16>
    %cst_78 = arith.constant dense<0.000000e+00> : vector<8x1024xf32>
    %299 = tpu.matmul %298, %3, %cst_78 {dimension_numbers = #tpu.dot_dimension_numbers<[1], [0], [0], [1], [0, 0, 1, 1], [], []>} : vector<8x256xbf16>, vector<256x1024xbf16>, vector<8x1024xf32> -> vector<8x1024xf32>
    %300 = vector.extract_strided_slice %299 {offsets = [0, 0], sizes = [8, 512], strides = [1, 1]} : vector<8x1024xf32> to vector<8x512xf32>
    %301 = vector.extract_strided_slice %299 {offsets = [0, 512], sizes = [8, 512], strides = [1, 1]} : vector<8x1024xf32> to vector<8x512xf32>
    %302 = arith.addf %301, %6 : vector<8x512xf32>
    %303 = vector.extract_strided_slice %302 {offsets = [0, 0], sizes = [8, 128], strides = [1, 1]} : vector<8x512xf32> to vector<8x128xf32>
    %304 = arith.negf %303 : vector<8x128xf32>
    %305 = math.exp %304 : vector<8x128xf32>
    %cst_79 = arith.constant 1.000000e+00 : f32
    %306 = vector.broadcast %cst_79 : f32 to vector<8x128xf32>
    %307 = arith.addf %306, %305 : vector<8x128xf32>
    %308 = arith.divf %306, %307 : vector<8x128xf32>
    %309 = vector.extract_strided_slice %302 {offsets = [0, 128], sizes = [8, 128], strides = [1, 1]} : vector<8x512xf32> to vector<8x128xf32>
    %310 = arith.negf %309 : vector<8x128xf32>
    %311 = math.exp %310 : vector<8x128xf32>
    %cst_80 = arith.constant 1.000000e+00 : f32
    %312 = vector.broadcast %cst_80 : f32 to vector<8x128xf32>
    %313 = arith.addf %312, %311 : vector<8x128xf32>
    %314 = arith.divf %312, %313 : vector<8x128xf32>
    %315 = vector.extract_strided_slice %302 {offsets = [0, 256], sizes = [8, 128], strides = [1, 1]} : vector<8x512xf32> to vector<8x128xf32>
    %316 = math.tanh %315 : vector<8x128xf32>
    %317 = vector.extract_strided_slice %302 {offsets = [0, 384], sizes = [8, 128], strides = [1, 1]} : vector<8x512xf32> to vector<8x128xf32>
    %318 = arith.negf %317 : vector<8x128xf32>
    %319 = math.exp %318 : vector<8x128xf32>
    %cst_81 = arith.constant 1.000000e+00 : f32
    %320 = vector.broadcast %cst_81 : f32 to vector<8x128xf32>
    %321 = arith.addf %320, %319 : vector<8x128xf32>
    %322 = arith.divf %320, %321 : vector<8x128xf32>
    %323 = arith.mulf %314, %261 : vector<8x128xf32>
    %324 = arith.mulf %308, %316 : vector<8x128xf32>
    %325 = arith.addf %323, %324 : vector<8x128xf32>
    %326 = math.tanh %325 : vector<8x128xf32>
    %327 = arith.mulf %322, %326 : vector<8x128xf32>
    %328 = arith.truncf %327 : vector<8x128xf32> to vector<8x128xbf16>
    %c0_82 = arith.constant 0 : index
    %c128_83 = arith.constant 128 : index
    %329 = vector.load %arg8[%c0_82, %c128_83] : memref<8x256xbf16, #tpu.memory_space<vmem>>, vector<8x128xbf16>
    tpu.vector_store %arg8[%c0_82, %c128_83], %328 {strides = array<i32>} : memref<8x256xbf16, #tpu.memory_space<vmem>>, vector<8x128xbf16>,
    %c5_i32 = arith.constant 5 : i32
    %330 = arith.index_cast %c5_i32 : i32 to index
    %c0_84 = arith.constant 0 : index
    %c0_85 = arith.constant 0 : index
    %331 = vector.load %arg2[%330, %c0_84, %c0_85] : memref<8x8x512xbf16, #tpu.memory_space<vmem>>, vector<1x8x512xbf16>
    %332 = vector.shape_cast %331 : vector<1x8x512xbf16> to vector<8x512xbf16>
    %333 = arith.extf %332 : vector<8x512xbf16> to vector<8x512xf32>
    %334 = arith.addf %333, %300 : vector<8x512xf32>
    %335 = vector.extract_strided_slice %334 {offsets = [0, 0], sizes = [8, 128], strides = [1, 1]} : vector<8x512xf32> to vector<8x128xf32>
    %336 = arith.negf %335 : vector<8x128xf32>
    %337 = math.exp %336 : vector<8x128xf32>
    %cst_86 = arith.constant 1.000000e+00 : f32
    %338 = vector.broadcast %cst_86 : f32 to vector<8x128xf32>
    %339 = arith.addf %338, %337 : vector<8x128xf32>
    %340 = arith.divf %338, %339 : vector<8x128xf32>
    %341 = vector.extract_strided_slice %334 {offsets = [0, 128], sizes = [8, 128], strides = [1, 1]} : vector<8x512xf32> to vector<8x128xf32>
    %342 = arith.negf %341 : vector<8x128xf32>
    %343 = math.exp %342 : vector<8x128xf32>
    %cst_87 = arith.constant 1.000000e+00 : f32
    %344 = vector.broadcast %cst_87 : f32 to vector<8x128xf32>
    %345 = arith.addf %344, %343 : vector<8x128xf32>
    %346 = arith.divf %344, %345 : vector<8x128xf32>
    %347 = vector.extract_strided_slice %334 {offsets = [0, 256], sizes = [8, 128], strides = [1, 1]} : vector<8x512xf32> to vector<8x128xf32>
    %348 = math.tanh %347 : vector<8x128xf32>
    %349 = vector.extract_strided_slice %334 {offsets = [0, 384], sizes = [8, 128], strides = [1, 1]} : vector<8x512xf32> to vector<8x128xf32>
    %350 = arith.negf %349 : vector<8x128xf32>
    %351 = math.exp %350 : vector<8x128xf32>
    %cst_88 = arith.constant 1.000000e+00 : f32
    %352 = vector.broadcast %cst_88 : f32 to vector<8x128xf32>
    %353 = arith.addf %352, %351 : vector<8x128xf32>
    %354 = arith.divf %352, %353 : vector<8x128xf32>
    %355 = arith.mulf %346, %293 : vector<8x128xf32>
    %356 = arith.mulf %340, %348 : vector<8x128xf32>
    %357 = arith.addf %355, %356 : vector<8x128xf32>
    %358 = math.tanh %357 : vector<8x128xf32>
    %359 = arith.mulf %354, %358 : vector<8x128xf32>
    %360 = arith.truncf %359 : vector<8x128xf32> to vector<8x128xbf16>
    %c0_89 = arith.constant 0 : index
    %c0_90 = arith.constant 0 : index
    %361 = vector.load %arg8[%c0_89, %c0_90] : memref<8x256xbf16, #tpu.memory_space<vmem>>, vector<8x128xbf16>
    tpu.vector_store %arg8[%c0_89, %c0_90], %360 {strides = array<i32>} : memref<8x256xbf16, #tpu.memory_space<vmem>>, vector<8x128xbf16>,
    %c0_91 = arith.constant 0 : index
    %c0_92 = arith.constant 0 : index
    %362 = vector.load %arg8[%c0_91, %c0_92] : memref<8x256xbf16, #tpu.memory_space<vmem>>, vector<8x256xbf16>
    %cst_93 = arith.constant dense<0.000000e+00> : vector<8x1024xf32>
    %363 = tpu.matmul %362, %3, %cst_93 {dimension_numbers = #tpu.dot_dimension_numbers<[1], [0], [0], [1], [0, 0, 1, 1], [], []>} : vector<8x256xbf16>, vector<256x1024xbf16>, vector<8x1024xf32> -> vector<8x1024xf32>
    %364 = vector.extract_strided_slice %363 {offsets = [0, 0], sizes = [8, 512], strides = [1, 1]} : vector<8x1024xf32> to vector<8x512xf32>
    %365 = vector.extract_strided_slice %363 {offsets = [0, 512], sizes = [8, 512], strides = [1, 1]} : vector<8x1024xf32> to vector<8x512xf32>
    %366 = arith.addf %365, %6 : vector<8x512xf32>
    %367 = vector.extract_strided_slice %366 {offsets = [0, 0], sizes = [8, 128], strides = [1, 1]} : vector<8x512xf32> to vector<8x128xf32>
    %368 = arith.negf %367 : vector<8x128xf32>
    %369 = math.exp %368 : vector<8x128xf32>
    %cst_94 = arith.constant 1.000000e+00 : f32
    %370 = vector.broadcast %cst_94 : f32 to vector<8x128xf32>
    %371 = arith.addf %370, %369 : vector<8x128xf32>
    %372 = arith.divf %370, %371 : vector<8x128xf32>
    %373 = vector.extract_strided_slice %366 {offsets = [0, 128], sizes = [8, 128], strides = [1, 1]} : vector<8x512xf32> to vector<8x128xf32>
    %374 = arith.negf %373 : vector<8x128xf32>
    %375 = math.exp %374 : vector<8x128xf32>
    %cst_95 = arith.constant 1.000000e+00 : f32
    %376 = vector.broadcast %cst_95 : f32 to vector<8x128xf32>
    %377 = arith.addf %376, %375 : vector<8x128xf32>
    %378 = arith.divf %376, %377 : vector<8x128xf32>
    %379 = vector.extract_strided_slice %366 {offsets = [0, 256], sizes = [8, 128], strides = [1, 1]} : vector<8x512xf32> to vector<8x128xf32>
    %380 = math.tanh %379 : vector<8x128xf32>
    %381 = vector.extract_strided_slice %366 {offsets = [0, 384], sizes = [8, 128], strides = [1, 1]} : vector<8x512xf32> to vector<8x128xf32>
    %382 = arith.negf %381 : vector<8x128xf32>
    %383 = math.exp %382 : vector<8x128xf32>
    %cst_96 = arith.constant 1.000000e+00 : f32
    %384 = vector.broadcast %cst_96 : f32 to vector<8x128xf32>
    %385 = arith.addf %384, %383 : vector<8x128xf32>
    %386 = arith.divf %384, %385 : vector<8x128xf32>
    %387 = arith.mulf %378, %325 : vector<8x128xf32>
    %388 = arith.mulf %372, %380 : vector<8x128xf32>
    %389 = arith.addf %387, %388 : vector<8x128xf32>
    %390 = math.tanh %389 : vector<8x128xf32>
    %391 = arith.mulf %386, %390 : vector<8x128xf32>
    %392 = arith.truncf %391 : vector<8x128xf32> to vector<8x128xbf16>
    %c0_97 = arith.constant 0 : index
    %c128_98 = arith.constant 128 : index
    %393 = vector.load %arg8[%c0_97, %c128_98] : memref<8x256xbf16, #tpu.memory_space<vmem>>, vector<8x128xbf16>
    tpu.vector_store %arg8[%c0_97, %c128_98], %392 {strides = array<i32>} : memref<8x256xbf16, #tpu.memory_space<vmem>>, vector<8x128xbf16>,
    %c6_i32 = arith.constant 6 : i32
    %394 = arith.index_cast %c6_i32 : i32 to index
    %c0_99 = arith.constant 0 : index
    %c0_100 = arith.constant 0 : index
    %395 = vector.load %arg2[%394, %c0_99, %c0_100] : memref<8x8x512xbf16, #tpu.memory_space<vmem>>, vector<1x8x512xbf16>
    %396 = vector.shape_cast %395 : vector<1x8x512xbf16> to vector<8x512xbf16>
    %397 = arith.extf %396 : vector<8x512xbf16> to vector<8x512xf32>
    %398 = arith.addf %397, %364 : vector<8x512xf32>
    %399 = vector.extract_strided_slice %398 {offsets = [0, 0], sizes = [8, 128], strides = [1, 1]} : vector<8x512xf32> to vector<8x128xf32>
    %400 = arith.negf %399 : vector<8x128xf32>
    %401 = math.exp %400 : vector<8x128xf32>
    %cst_101 = arith.constant 1.000000e+00 : f32
    %402 = vector.broadcast %cst_101 : f32 to vector<8x128xf32>
    %403 = arith.addf %402, %401 : vector<8x128xf32>
    %404 = arith.divf %402, %403 : vector<8x128xf32>
    %405 = vector.extract_strided_slice %398 {offsets = [0, 128], sizes = [8, 128], strides = [1, 1]} : vector<8x512xf32> to vector<8x128xf32>
    %406 = arith.negf %405 : vector<8x128xf32>
    %407 = math.exp %406 : vector<8x128xf32>
    %cst_102 = arith.constant 1.000000e+00 : f32
    %408 = vector.broadcast %cst_102 : f32 to vector<8x128xf32>
    %409 = arith.addf %408, %407 : vector<8x128xf32>
    %410 = arith.divf %408, %409 : vector<8x128xf32>
    %411 = vector.extract_strided_slice %398 {offsets = [0, 256], sizes = [8, 128], strides = [1, 1]} : vector<8x512xf32> to vector<8x128xf32>
    %412 = math.tanh %411 : vector<8x128xf32>
    %413 = vector.extract_strided_slice %398 {offsets = [0, 384], sizes = [8, 128], strides = [1, 1]} : vector<8x512xf32> to vector<8x128xf32>
    %414 = arith.negf %413 : vector<8x128xf32>
    %415 = math.exp %414 : vector<8x128xf32>
    %cst_103 = arith.constant 1.000000e+00 : f32
    %416 = vector.broadcast %cst_103 : f32 to vector<8x128xf32>
    %417 = arith.addf %416, %415 : vector<8x128xf32>
    %418 = arith.divf %416, %417 : vector<8x128xf32>
    %419 = arith.mulf %410, %357 : vector<8x128xf32>
    %420 = arith.mulf %404, %412 : vector<8x128xf32>
    %421 = arith.addf %419, %420 : vector<8x128xf32>
    %422 = math.tanh %421 : vector<8x128xf32>
    %423 = arith.mulf %418, %422 : vector<8x128xf32>
    %424 = arith.truncf %423 : vector<8x128xf32> to vector<8x128xbf16>
    %c0_104 = arith.constant 0 : index
    %c0_105 = arith.constant 0 : index
    %425 = vector.load %arg8[%c0_104, %c0_105] : memref<8x256xbf16, #tpu.memory_space<vmem>>, vector<8x128xbf16>
    tpu.vector_store %arg8[%c0_104, %c0_105], %424 {strides = array<i32>} : memref<8x256xbf16, #tpu.memory_space<vmem>>, vector<8x128xbf16>,
    %c0_106 = arith.constant 0 : index
    %c0_107 = arith.constant 0 : index
    %426 = vector.load %arg8[%c0_106, %c0_107] : memref<8x256xbf16, #tpu.memory_space<vmem>>, vector<8x256xbf16>
    %cst_108 = arith.constant dense<0.000000e+00> : vector<8x1024xf32>
    %427 = tpu.matmul %426, %3, %cst_108 {dimension_numbers = #tpu.dot_dimension_numbers<[1], [0], [0], [1], [0, 0, 1, 1], [], []>} : vector<8x256xbf16>, vector<256x1024xbf16>, vector<8x1024xf32> -> vector<8x1024xf32>
    %428 = vector.extract_strided_slice %427 {offsets = [0, 0], sizes = [8, 512], strides = [1, 1]} : vector<8x1024xf32> to vector<8x512xf32>
    %429 = vector.extract_strided_slice %427 {offsets = [0, 512], sizes = [8, 512], strides = [1, 1]} : vector<8x1024xf32> to vector<8x512xf32>
    %430 = arith.addf %429, %6 : vector<8x512xf32>
    %431 = vector.extract_strided_slice %430 {offsets = [0, 0], sizes = [8, 128], strides = [1, 1]} : vector<8x512xf32> to vector<8x128xf32>
    %432 = arith.negf %431 : vector<8x128xf32>
    %433 = math.exp %432 : vector<8x128xf32>
    %cst_109 = arith.constant 1.000000e+00 : f32
    %434 = vector.broadcast %cst_109 : f32 to vector<8x128xf32>
    %435 = arith.addf %434, %433 : vector<8x128xf32>
    %436 = arith.divf %434, %435 : vector<8x128xf32>
    %437 = vector.extract_strided_slice %430 {offsets = [0, 128], sizes = [8, 128], strides = [1, 1]} : vector<8x512xf32> to vector<8x128xf32>
    %438 = arith.negf %437 : vector<8x128xf32>
    %439 = math.exp %438 : vector<8x128xf32>
    %cst_110 = arith.constant 1.000000e+00 : f32
    %440 = vector.broadcast %cst_110 : f32 to vector<8x128xf32>
    %441 = arith.addf %440, %439 : vector<8x128xf32>
    %442 = arith.divf %440, %441 : vector<8x128xf32>
    %443 = vector.extract_strided_slice %430 {offsets = [0, 256], sizes = [8, 128], strides = [1, 1]} : vector<8x512xf32> to vector<8x128xf32>
    %444 = math.tanh %443 : vector<8x128xf32>
    %445 = vector.extract_strided_slice %430 {offsets = [0, 384], sizes = [8, 128], strides = [1, 1]} : vector<8x512xf32> to vector<8x128xf32>
    %446 = arith.negf %445 : vector<8x128xf32>
    %447 = math.exp %446 : vector<8x128xf32>
    %cst_111 = arith.constant 1.000000e+00 : f32
    %448 = vector.broadcast %cst_111 : f32 to vector<8x128xf32>
    %449 = arith.addf %448, %447 : vector<8x128xf32>
    %450 = arith.divf %448, %449 : vector<8x128xf32>
    %451 = arith.mulf %442, %389 : vector<8x128xf32>
    %452 = arith.mulf %436, %444 : vector<8x128xf32>
    %453 = arith.addf %451, %452 : vector<8x128xf32>
    %454 = math.tanh %453 : vector<8x128xf32>
    %455 = arith.mulf %450, %454 : vector<8x128xf32>
    %456 = arith.truncf %455 : vector<8x128xf32> to vector<8x128xbf16>
    %c0_112 = arith.constant 0 : index
    %c128_113 = arith.constant 128 : index
    %457 = vector.load %arg8[%c0_112, %c128_113] : memref<8x256xbf16, #tpu.memory_space<vmem>>, vector<8x128xbf16>
    tpu.vector_store %arg8[%c0_112, %c128_113], %456 {strides = array<i32>} : memref<8x256xbf16, #tpu.memory_space<vmem>>, vector<8x128xbf16>,
    %c7_i32 = arith.constant 7 : i32
    %458 = arith.index_cast %c7_i32 : i32 to index
    %c0_114 = arith.constant 0 : index
    %c0_115 = arith.constant 0 : index
    %459 = vector.load %arg2[%458, %c0_114, %c0_115] : memref<8x8x512xbf16, #tpu.memory_space<vmem>>, vector<1x8x512xbf16>
    %460 = vector.shape_cast %459 : vector<1x8x512xbf16> to vector<8x512xbf16>
    %461 = arith.extf %460 : vector<8x512xbf16> to vector<8x512xf32>
    %462 = arith.addf %461, %428 : vector<8x512xf32>
    %463 = vector.extract_strided_slice %462 {offsets = [0, 0], sizes = [8, 128], strides = [1, 1]} : vector<8x512xf32> to vector<8x128xf32>
    %464 = arith.negf %463 : vector<8x128xf32>
    %465 = math.exp %464 : vector<8x128xf32>
    %cst_116 = arith.constant 1.000000e+00 : f32
    %466 = vector.broadcast %cst_116 : f32 to vector<8x128xf32>
    %467 = arith.addf %466, %465 : vector<8x128xf32>
    %468 = arith.divf %466, %467 : vector<8x128xf32>
    %469 = vector.extract_strided_slice %462 {offsets = [0, 128], sizes = [8, 128], strides = [1, 1]} : vector<8x512xf32> to vector<8x128xf32>
    %470 = arith.negf %469 : vector<8x128xf32>
    %471 = math.exp %470 : vector<8x128xf32>
    %cst_117 = arith.constant 1.000000e+00 : f32
    %472 = vector.broadcast %cst_117 : f32 to vector<8x128xf32>
    %473 = arith.addf %472, %471 : vector<8x128xf32>
    %474 = arith.divf %472, %473 : vector<8x128xf32>
    %475 = vector.extract_strided_slice %462 {offsets = [0, 256], sizes = [8, 128], strides = [1, 1]} : vector<8x512xf32> to vector<8x128xf32>
    %476 = math.tanh %475 : vector<8x128xf32>
    %477 = vector.extract_strided_slice %462 {offsets = [0, 384], sizes = [8, 128], strides = [1, 1]} : vector<8x512xf32> to vector<8x128xf32>
    %478 = arith.negf %477 : vector<8x128xf32>
    %479 = math.exp %478 : vector<8x128xf32>
    %cst_118 = arith.constant 1.000000e+00 : f32
    %480 = vector.broadcast %cst_118 : f32 to vector<8x128xf32>
    %481 = arith.addf %480, %479 : vector<8x128xf32>
    %482 = arith.divf %480, %481 : vector<8x128xf32>
    %483 = arith.mulf %474, %421 : vector<8x128xf32>
    %484 = arith.mulf %468, %476 : vector<8x128xf32>
    %485 = arith.addf %483, %484 : vector<8x128xf32>
    %486 = math.tanh %485 : vector<8x128xf32>
    %487 = arith.mulf %482, %486 : vector<8x128xf32>
    %488 = arith.truncf %487 : vector<8x128xf32> to vector<8x128xbf16>
    %c0_119 = arith.constant 0 : index
    %c0_120 = arith.constant 0 : index
    %489 = vector.load %arg8[%c0_119, %c0_120] : memref<8x256xbf16, #tpu.memory_space<vmem>>, vector<8x128xbf16>
    tpu.vector_store %arg8[%c0_119, %c0_120], %488 {strides = array<i32>} : memref<8x256xbf16, #tpu.memory_space<vmem>>, vector<8x128xbf16>,
    %c0_121 = arith.constant 0 : index
    %c0_122 = arith.constant 0 : index
    %490 = vector.load %arg8[%c0_121, %c0_122] : memref<8x256xbf16, #tpu.memory_space<vmem>>, vector<8x256xbf16>
    %cst_123 = arith.constant dense<0.000000e+00> : vector<8x1024xf32>
    %491 = tpu.matmul %490, %3, %cst_123 {dimension_numbers = #tpu.dot_dimension_numbers<[1], [0], [0], [1], [0, 0, 1, 1], [], []>} : vector<8x256xbf16>, vector<256x1024xbf16>, vector<8x1024xf32> -> vector<8x1024xf32>
    %492 = vector.extract_strided_slice %491 {offsets = [0, 0], sizes = [8, 512], strides = [1, 1]} : vector<8x1024xf32> to vector<8x512xf32>
    %493 = vector.extract_strided_slice %491 {offsets = [0, 512], sizes = [8, 512], strides = [1, 1]} : vector<8x1024xf32> to vector<8x512xf32>
    %494 = arith.addf %493, %6 : vector<8x512xf32>
    %495 = vector.extract_strided_slice %494 {offsets = [0, 0], sizes = [8, 128], strides = [1, 1]} : vector<8x512xf32> to vector<8x128xf32>
    %496 = arith.negf %495 : vector<8x128xf32>
    %497 = math.exp %496 : vector<8x128xf32>
    %cst_124 = arith.constant 1.000000e+00 : f32
    %498 = vector.broadcast %cst_124 : f32 to vector<8x128xf32>
    %499 = arith.addf %498, %497 : vector<8x128xf32>
    %500 = arith.divf %498, %499 : vector<8x128xf32>
    %501 = vector.extract_strided_slice %494 {offsets = [0, 128], sizes = [8, 128], strides = [1, 1]} : vector<8x512xf32> to vector<8x128xf32>
    %502 = arith.negf %501 : vector<8x128xf32>
    %503 = math.exp %502 : vector<8x128xf32>
    %cst_125 = arith.constant 1.000000e+00 : f32
    %504 = vector.broadcast %cst_125 : f32 to vector<8x128xf32>
    %505 = arith.addf %504, %503 : vector<8x128xf32>
    %506 = arith.divf %504, %505 : vector<8x128xf32>
    %507 = vector.extract_strided_slice %494 {offsets = [0, 256], sizes = [8, 128], strides = [1, 1]} : vector<8x512xf32> to vector<8x128xf32>
    %508 = math.tanh %507 : vector<8x128xf32>
    %509 = vector.extract_strided_slice %494 {offsets = [0, 384], sizes = [8, 128], strides = [1, 1]} : vector<8x512xf32> to vector<8x128xf32>
    %510 = arith.negf %509 : vector<8x128xf32>
    %511 = math.exp %510 : vector<8x128xf32>
    %cst_126 = arith.constant 1.000000e+00 : f32
    %512 = vector.broadcast %cst_126 : f32 to vector<8x128xf32>
    %513 = arith.addf %512, %511 : vector<8x128xf32>
    %514 = arith.divf %512, %513 : vector<8x128xf32>
    %515 = arith.mulf %506, %453 : vector<8x128xf32>
    %516 = arith.mulf %500, %508 : vector<8x128xf32>
    %517 = arith.addf %515, %516 : vector<8x128xf32>
    %518 = math.tanh %517 : vector<8x128xf32>
    %519 = arith.mulf %514, %518 : vector<8x128xf32>
    %520 = arith.truncf %519 : vector<8x128xf32> to vector<8x128xbf16>
    %c0_127 = arith.constant 0 : index
    %c128_128 = arith.constant 128 : index
    %521 = vector.load %arg8[%c0_127, %c128_128] : memref<8x256xbf16, #tpu.memory_space<vmem>>, vector<8x128xbf16>
    tpu.vector_store %arg8[%c0_127, %c128_128], %520 {strides = array<i32>} : memref<8x256xbf16, #tpu.memory_space<vmem>>, vector<8x128xbf16>,
    %c8_i32 = arith.constant 8 : i32
    %c0_129 = arith.constant 0 : index
    %c0_130 = arith.constant 0 : index
    %522 = vector.load %arg9[%c0_129, %c0_130] : memref<8x512xf32, #tpu.memory_space<vmem>>, vector<8x512xf32>
    tpu.vector_store %arg9[%c0_129, %c0_130], %492 {strides = array<i32>} : memref<8x512xf32, #tpu.memory_space<vmem>>, vector<8x512xf32>,
    %c0_131 = arith.constant 0 : index
    %c0_132 = arith.constant 0 : index
    %523 = vector.load %arg10[%c0_131, %c0_132] : memref<8x128xf32, #tpu.memory_space<vmem>>, vector<8x128xf32>
    tpu.vector_store %arg10[%c0_131, %c0_132], %485 {strides = array<i32>} : memref<8x128xf32, #tpu.memory_space<vmem>>, vector<8x128xf32>,
    %c0_133 = arith.constant 0 : index
    %c0_134 = arith.constant 0 : index
    %524 = vector.load %arg11[%c0_133, %c0_134] : memref<8x128xf32, #tpu.memory_space<vmem>>, vector<8x128xf32>
    tpu.vector_store %arg11[%c0_133, %c0_134], %517 {strides = array<i32>} : memref<8x128xf32, #tpu.memory_space<vmem>>, vector<8x128xf32>,
    %c0_i32_135 = arith.constant 0 : i32
    %525 = arith.cmpi eq, %arg1, %c0_i32_135 : i32
    %526 = arith.extui %525 : i1 to i32
    %c0_i32_136 = arith.constant 0 : i32
    %527 = arith.cmpi ne, %526, %c0_i32_136 : i32
    scf.if %527 {
      %c0_137 = arith.constant 0 : index
      %c128_138 = arith.constant 128 : index
      %528 = vector.load %arg8[%c0_137, %c128_138] : memref<8x256xbf16, #tpu.memory_space<vmem>>, vector<8x128xbf16>
      %c0_139 = arith.constant 0 : index
      %c0_140 = arith.constant 0 : index
      %529 = vector.load %arg5[%c0_139, %c0_140] : memref<128x128xbf16, #tpu.memory_space<vmem>>, vector<128x128xbf16>
      %cst_141 = arith.constant dense<0.000000e+00> : vector<8x128xf32>
      %530 = tpu.matmul %528, %529, %cst_141 {dimension_numbers = #tpu.dot_dimension_numbers<[1], [0], [0], [1], [0, 0, 1, 1], [], []>} : vector<8x128xbf16>, vector<128x128xbf16>, vector<8x128xf32> -> vector<8x128xf32>
      %c0_142 = arith.constant 0 : index
      %c0_143 = arith.constant 0 : index
      %531 = vector.load %arg6[%c0_142, %c0_143] : memref<1x128xf32, #tpu.memory_space<vmem>>, vector<1x128xf32>
      %532 = vector.broadcast %531 : vector<1x128xf32> to vector<8x128xf32>
      %533 = arith.addf %530, %532 : vector<8x128xf32>
      %c0_144 = arith.constant 0 : index
      %c0_145 = arith.constant 0 : index
      %534 = vector.load %arg7[%c0_144, %c0_145] : memref<8x128xf32, #tpu.memory_space<vmem>>, vector<8x128xf32>
      tpu.vector_store %arg7[%c0_144, %c0_145], %533 {strides = array<i32>} : memref<8x128xf32, #tpu.memory_space<vmem>>, vector<8x128xf32>,
    } else {
    }
    return
  }
  func.func @transform_0(%arg0: i32, %arg1: i32) -> (i32, i32, i32) {
    %c0_i32 = arith.constant 0 : i32
    %c0_i32_0 = arith.constant 0 : i32
    return %arg1, %arg0, %c0_i32 : i32, i32, i32
  }
  func.func @transform_1(%arg0: i32, %arg1: i32) -> (i32, i32) {
    %c0_i32 = arith.constant 0 : i32
    %c0_i32_0 = arith.constant 0 : i32
    %c0_i32_1 = arith.constant 0 : i32
    return %c0_i32, %c0_i32_0 : i32, i32
  }
  func.func @transform_2(%arg0: i32, %arg1: i32) -> (i32, i32) {
    %c0_i32 = arith.constant 0 : i32
    %c0_i32_0 = arith.constant 0 : i32
    %c0_i32_1 = arith.constant 0 : i32
    return %c0_i32, %c0_i32_0 : i32, i32
  }
  func.func @transform_3(%arg0: i32, %arg1: i32) -> (i32, i32) {
    %c0_i32 = arith.constant 0 : i32
    %c0_i32_0 = arith.constant 0 : i32
    %c0_i32_1 = arith.constant 0 : i32
    return %c0_i32, %c0_i32_0 : i32, i32
  }
  func.func @transform_4(%arg0: i32, %arg1: i32) -> (i32, i32) {
    %c0_i32 = arith.constant 0 : i32
    %c0_i32_0 = arith.constant 0 : i32
    %c0_i32_1 = arith.constant 0 : i32
    return %c0_i32, %c0_i32_0 : i32, i32
  }
  func.func @transform_5(%arg0: i32, %arg1: i32) -> (i32, i32) {
    %c0_i32 = arith.constant 0 : i32
    %c0_i32_0 = arith.constant 0 : i32
    return %arg0, %c0_i32 : i32, i32
  }
}

</mosaic_0001>

<bundles_post_ra>
// kernel: tpu_custom_call.1
= control target key start
LH: loop header
LB: loop body
LE: loop exit
PB: predicated region body
PF: predicated region fallthrough
CT: control target
= control target key end

     0   :  { %10 = vsyncpa [#allocation7], 0  ;;  %s5057_s0 = inlined_call_operand.hbm [shape: bf16[8,8,512], index: 0, kind: input, shape index: {}]   ;;  %s5058_s1 = inlined_call_operand.hbm [shape: bf16[256,1024], index: 1, kind: input, shape index: {}]   ;;  %s5059_s2 = inlined_call_operand.vmem [shape: f32[1,512], index: 2, kind: input, shape index: {}]   ;;  %s5060_s3 = inlined_call_operand.hbm [shape: bf16[128,128], index: 3, kind: input, shape index: {}]   ;;  %s5061_s4 = inlined_call_operand.vmem [shape: f32[1,128], index: 4, kind: input, shape index: {}]   ;;  %s5062_s5 = inlined_call_operand.hbm [shape: f32[8,128], index: 5, kind: output, shape index: {}]  }
   0x1   :  { %11 = vsyncpa [#allocation10], 0 }
   0x2   :  { %12 = vsyncpa [#allocation8], 0  ;;  %s3536_s18 = smov [#allocation9]   ;;  %s3442_s22 = scalar_lea.hbm %s5058_s1, 16384 }
   0x3   :  { %s30_s19 = sshll.u32 %s3536_s18, 4  ;;  %p3443_p0 = scmp.ne.s32.totalorder %s5058_s1, %s3442_s22  ;;  %s31_s19 = int_to_ptr.vmem [resolvable:$true] %s30_s19 }
   0x4   :  { %p3446_p1 = scmp.lt.u32.totalorder %s3442_s22, %s5058_s1 }
   0x6   :  { %p3448_p2 = pnand %p3446_p1, %p3443_p0 }
   0x8   :  { %3451 = shalt.err (!%p3448_p2)
}
   0x9   :  { %s3452_s27 = scalar_lea.vmem %s31_s19, 16384  ;;  %p3457_p4 = scmp.lt.s32.totalorder %s31_s19, %s31_s19 }
   0xa   :  { %p3453_p3 = scmp.ne.s32.totalorder %s31_s19, %s3452_s27  ;;  %p3458_p5 = scmp.lt.s32.totalorder %s3452_s27, %s3452_s27 }
   0xc   :  { %p3459_p6 = por %p3458_p5, %p3457_p4 }
   0xe   :  { %p3460_p7 = pnand %p3459_p6, %p3453_p3 }
  0x10   :  { %3463 = shalt.err (!%p3460_p7)
}
  0x11   :  { %s3537_s28 = smov 512   ;;  %s3538_s29 = smov 32  }
  0x12   :  { %36 = dma.hbm_to_vmem [thread:$0]  %s5058_s1, 16384, %s31_s19, [#allocation10], %s3537_s28, %s3537_s28, %s3538_s29  }
  0x13   :  { %s3539_s7 = smov [#allocation6]   ;;  %s3464_s11 = scalar_lea.hbm %s5057_s0, 2048 }
  0x14   :  { %s18_s8 = sshll.u32 %s3539_s7, 4  ;;  %p3465_p8 = scmp.ne.s32.totalorder %s5057_s0, %s3464_s11  ;;  %s19_s8 = int_to_ptr.vmem [resolvable:$true] %s18_s8 }
  0x15   :  { %p3468_p9 = scmp.lt.u32.totalorder %s3464_s11, %s5057_s0 }
  0x17   :  { %p3470_p10 = pnand %p3468_p9, %p3465_p8 }
  0x19   :  { %3473 = shalt.err (!%p3470_p10)
}
  0x1a   :  { %s3474_s16 = scalar_lea.vmem %s19_s8, 2048  ;;  %p3479_p12 = scmp.lt.s32.totalorder %s19_s8, %s19_s8 }
  0x1b   :  { %p3475_p11 = scmp.ne.s32.totalorder %s19_s8, %s3474_s16  ;;  %p3480_p13 = scmp.lt.s32.totalorder %s3474_s16, %s3474_s16 }
  0x1d   :  { %p3481_p0 = por %p3480_p13, %p3479_p12 }
  0x1f   :  { %p3482_p1 = pnand %p3481_p0, %p3475_p11 }
  0x21   :  { %3485 = shalt.err (!%p3482_p1)
}
  0x22   :  { %s3540_s1 = smov 256   ;;  %s3541_s17 = smov 16  }
  0x23   :  { %24 = dma.hbm_to_vmem [thread:$0]  %s5057_s0, 2048, %s19_s8, [#allocation7], %s3540_s1, %s3540_s1, %s3541_s17  }
  0x24   :  { %s3542_s20 = smov [#allocation11]   ;;  %s3486_s24 = scalar_lea.hbm %s5060_s3, 1024 }
  0x25   :  { %s44_s21 = sshll.u32 %s3542_s20, 4  ;;  %p3487_p2 = scmp.ne.s32.totalorder %s5060_s3, %s3486_s24  ;;  %s45_s21 = int_to_ptr.vmem [resolvable:$true] %s44_s21 }
  0x26   :  { %p3490_p3 = scmp.lt.u32.totalorder %s3486_s24, %s5060_s3 }
  0x28   :  { %p3492_p4 = pnand %p3490_p3, %p3487_p2 }
  0x2a   :  { %3495 = shalt.err (!%p3492_p4)
}
  0x2b   :  { %s3496_s29 = scalar_lea.vmem %s45_s21, 1024  ;;  %p3501_p6 = scmp.lt.s32.totalorder %s45_s21, %s45_s21 }
  0x2c   :  { %p3497_p5 = scmp.ne.s32.totalorder %s45_s21, %s3496_s29  ;;  %p3502_p7 = scmp.lt.s32.totalorder %s3496_s29, %s3496_s29 }
  0x2e   :  { %p3503_p8 = por %p3502_p7, %p3501_p6 }
  0x30   :  { %p3504_p9 = pnand %p3503_p8, %p3497_p5 }
  0x32   :  { %3507 = shalt.err (!%p3504_p9)
}
  0x33   :  { %s3543_s0 = smov 64   ;;  %s3544_s30 = smov 4  }
  0x34   :  { %50 = dma.hbm_to_vmem [thread:$0]  %s5060_s3, 1024, %s45_s21, [#allocation10], %s3543_s0, %s3543_s0, %s3544_s30  }
  0x35   :  { %3530 = dma.done.wait [#allocation7], 2048  }
  0x36   :  { %3531 = vsyncadd [#allocation7], 4294965248 }
  0x37   :  { %3532 = dma.done.wait [#allocation10], 17408  }
  0x38   :  { %3533 = vsyncadd [#allocation10], 4294949888  ;;  %v3545_v0 = vmov 0   ;;  %v74_v1 = vld [vmem:[#allocation9] sm:$0xff]  ;;  %v75_v10 = vld [vmem:[#allocation9 + $0x8] sm:$0xff]  ;;  %vm3547_vm0 = vmmov 0  }
  0x39   :  { %67 = vst [vmem:[#allocation2] sm:$0xff] %v3545_v0  ;;  %v78_v2 = vld [vmem:[#allocation9 + $0x20] sm:$0xff]  ;;  %v79_v11 = vld [vmem:[#allocation9 + $0x28] sm:$0xff]  ;;  %s3548_s10 = smov [#allocation12]  }
  0x3a   :  { %v82_v3 = vld [vmem:[#allocation9 + $0x40] sm:$0xff]  ;;  %v3615_v4 = vcombine.high %v74_v1, %v78_v2  ;;  %v3617_v5 = vcombine.low %v74_v1, %v78_v2  ;;  %v3625_v13 = vcombine.high %v75_v10, %v79_v11  ;;  %v3627_v14 = vcombine.low %v75_v10, %v79_v11  ;;  %v83_v15 = vld [vmem:[#allocation9 + $0x48] sm:$0xff]  ;;  %s2909_s11 = sshll.u32 %s3548_s10, 4  ;;  %s2910_s11 = int_to_ptr.vmem [resolvable:$true] %s2909_s11 }
  0x3b   :  { %v86_v6 = vld [vmem:[#allocation9 + $0x60] sm:$0xff]  ;;  %v87_v16 = vld [vmem:[#allocation9 + $0x68] sm:$0xff]  ;;  %s3508_s12 = scalar_lea.vmem %s2910_s11, 128  ;;  %p3513_p11 = scmp.lt.s32.totalorder %s2910_s11, %s2910_s11 }
  0x3c   :  { %5334 = vst [vmem:[#allocation16_spill] sm:$0xff] %v3615_v4  ;;  %5335 = vst [vmem:[#allocation17_spill] sm:$0xff] %v3617_v5  ;;  %v3619_v7 = vcombine.high %v82_v3, %v86_v6  ;;  %v90_v8 = vld [vmem:[#allocation9 + $0x80] sm:$0xff]  ;;  %914 = vmatprep.subr.bf16.mxu0 %v3615_v4  ;;  %v3623_v12 = vcombine.low %v82_v3, %v86_v6  ;;  %v3632_v18 = vcombine.high %v83_v15, %v87_v16  ;;  %v91_v19 = vld [vmem:[#allocation9 + $0x88] sm:$0xff]  ;;  %p3509_p10 = scmp.ne.s32.totalorder %s2910_s11, %s3508_s12  ;;  %p3514_p12 = scmp.lt.s32.totalorder %s3508_s12, %s3508_s12 }
  0x3d   :  { %v94_v9 = vld [vmem:[#allocation9 + $0xa0] sm:$0xff]  ;;  %915 = vmatpush1.bf16.msra.mxu0 %v3617_v5  ;;  %5338 = vst [vmem:[#allocation20_spill] sm:$0xff] %v3625_v13  ;;  %5339 = vst [vmem:[#allocation21_spill] sm:$0xff] %v3627_v14  ;;  %v95_v20 = vld [vmem:[#allocation9 + $0xa8] sm:$0xff]  ;;  %955 = vmatprep.subr.bf16.mxu1 %v3625_v13  ;;  %v3636_v23 = vcombine.low %v83_v15, %v87_v16 }
  0x3e   :  { %5336 = vst [vmem:[#allocation18_spill] sm:$0xff] %v3619_v7  ;;  %5337 = vst [vmem:[#allocation19_spill] sm:$0xff] %v3623_v12  ;;  %916 = vmatprep.subr.bf16.mxu0 %v3619_v7  ;;  %v3630_v17 = vcombine.high %v90_v8, %v94_v9  ;;  %v98_v21 = vld [vmem:[#allocation9 + $0xc0] sm:$0xff]  ;;  %956 = vmatpush1.bf16.msra.mxu1 %v3627_v14  ;;  %v3639_v24 = vcombine.low %v90_v8, %v94_v9  ;;  %v99_v27 = vld [vmem:[#allocation9 + $0xc8] sm:$0xff]  ;;  %p3515_p13 = por %p3514_p12, %p3513_p11 }
  0x3f   :  { %5341 = vst [vmem:[#allocation23_spill] sm:$0xff] %v3632_v18  ;;  %v102_v22 = vld [vmem:[#allocation9 + $0xe0] sm:$0xff]  ;;  %5342 = vst [vmem:[#allocation24_spill] sm:$0xff] %v3636_v23  ;;  %957 = vmatprep.subr.bf16.mxu1 %v3632_v18  ;;  %v3642_v25 = vcombine.high %v91_v19, %v95_v20  ;;  %v103_v28 = vld [vmem:[#allocation9 + $0xe8] sm:$0xff]  ;;  %v3648_v31 = vcombine.low %v91_v19, %v95_v20 }
  0x40   :  { %5340 = vst [vmem:[#allocation22_spill] sm:$0xff] %v3630_v17  ;;  %5343 = vst [vmem:[#allocation25_spill] sm:$0xff] %v3639_v24  ;;  %v3645_v26 = vcombine.high %v98_v21, %v102_v22  ;;  %v106_v29 = vld [vmem:[#allocation9 + $0x100] sm:$0xff]  ;;  %v3651_v32 = vcombine.low %v98_v21, %v102_v22  ;;  %v3654_v33 = vcombine.high %v99_v27, %v103_v28  ;;  %v107_v35 = vld [vmem:[#allocation9 + $0x108] sm:$0xff]  ;;  %p3516_p0 = pnand %p3515_p13, %p3509_p10 }
  0x41   :  { %917 = vmatpush1.bf16.msra.mxu0 %v3623_v12  ;;  %5344 = vst [vmem:[#allocation26_spill] sm:$0xff] %v3642_v25  ;;  %v110_v30 = vld [vmem:[#allocation9 + $0x120] sm:$0xff]  ;;  %5346 = vst [vmem:[#allocation28_spill] sm:$0xff] %v3648_v31  ;;  %v111_v36 = vld [vmem:[#allocation9 + $0x128] sm:$0xff]  ;;  %v3660_v39 = vcombine.low %v99_v27, %v103_v28 }
  0x42   :  { %918 = vmatprep.subr.bf16.mxu0 %v3630_v17  ;;  %5345 = vst [vmem:[#allocation27_spill] sm:$0xff] %v3645_v26  ;;  %958 = vmatpush1.bf16.msra.mxu1 %v3636_v23  ;;  %5347 = vst [vmem:[#allocation29_spill] sm:$0xff] %v3651_v32  ;;  %v3657_v34 = vcombine.high %v106_v29, %v110_v30  ;;  %v114_v37 = vld [vmem:[#allocation9 + $0x140] sm:$0xff]  ;;  %v3663_v40 = vcombine.low %v106_v29, %v110_v30  ;;  %v115_v43 = vld [vmem:[#allocation9 + $0x148] sm:$0xff] }
  0x43   :  { %959 = vmatprep.subr.bf16.mxu1 %v3642_v25  ;;  %5348 = vst [vmem:[#allocation30_spill] sm:$0xff] %v3654_v33  ;;  %v118_v38 = vld [vmem:[#allocation9 + $0x160] sm:$0xff]  ;;  %5350 = vst [vmem:[#allocation32_spill] sm:$0xff] %v3660_v39  ;;  %v3666_v41 = vcombine.high %v107_v35, %v111_v36  ;;  %v119_v44 = vld [vmem:[#allocation9 + $0x168] sm:$0xff]  ;;  %v3672_v47 = vcombine.low %v107_v35, %v111_v36 }
  0x44   :  { %5349 = vst [vmem:[#allocation31_spill] sm:$0xff] %v3657_v34  ;;  %5351 = vst [vmem:[#allocation33_spill] sm:$0xff] %v3663_v40  ;;  %v3669_v42 = vcombine.high %v114_v37, %v118_v38  ;;  %v122_v45 = vld [vmem:[#allocation9 + $0x180] sm:$0xff]  ;;  %v231_v49 = vld [vmem:[#allocation6 + $0x8] sm:$0xff]  ;;  %v3675_v50 = vcombine.low %v114_v37, %v118_v38  ;;  %v3678_v51 = vcombine.high %v115_v43, %v119_v44 }
  0x45   :  { %919 = vmatpush1.bf16.msra.mxu0 %v3639_v24  ;;  %5352 = vst [vmem:[#allocation34_spill] sm:$0xff] %v3666_v41  ;;  %v126_v46 = vld [vmem:[#allocation9 + $0x1a0] sm:$0xff]  ;;  %5354 = vst [vmem:[#allocation36_spill] sm:$0xff] %v3672_v47  ;;  %v123_v55 = vld [vmem:[#allocation9 + $0x188] sm:$0xff]  ;;  %v235_v59 = vunpack.c.h.bf16 %v231_v49  ;;  %v3684_v62 = vcombine.low %v115_v43, %v119_v44  ;;  %v234_v28 = vunpack.c.l.bf16 %v231_v49 }
  0x46   :  { %920 = vmatprep.subr.bf16.mxu0 %v3645_v26  ;;  %960 = vmatpush1.bf16.msra.mxu1 %v3648_v31  ;;  %5353 = vst [vmem:[#allocation35_spill] sm:$0xff] %v3669_v42  ;;  %v230_v48 = vld [vmem:[#allocation6] sm:$0xff]  ;;  %5355 = vst [vmem:[#allocation37_spill] sm:$0xff] %v3675_v50  ;;  %v3681_v54 = vcombine.high %v122_v45, %v126_v46  ;;  %v127_v56 = vld [vmem:[#allocation9 + $0x1a8] sm:$0xff]  ;;  %v3687_v63 = vcombine.low %v122_v45, %v126_v46 }
  0x47   :  { %961 = vmatprep.subr.bf16.mxu1 %v3654_v33  ;;  %5356 = vst [vmem:[#allocation38_spill] sm:$0xff] %v3678_v51  ;;  %v232_v52 = vunpack.c.l.bf16 %v230_v48  ;;  %v233_v53 = vunpack.c.h.bf16 %v230_v48  ;;  %v130_v57 = vld [vmem:[#allocation9 + $0x1c0] sm:$0xff]  ;;  %5358 = vst [vmem:[#allocation40_spill] sm:$0xff] %v3684_v62  ;;  %v3690_v0 = vcombine.high %v123_v55, %v127_v56  ;;  %v131_v2 = vld [vmem:[#allocation9 + $0x1c8] sm:$0xff]  ;;  %v2921_v9 = vmul.f32 -1.442695, %v235_v59 }
  0x48   :  { %5357 = vst [vmem:[#allocation39_spill] sm:$0xff] %v3681_v54  ;;  %v134_v58 = vld [vmem:[#allocation9 + $0x1e0] sm:$0xff]  ;;  %5359 = vst [vmem:[#allocation41_spill] sm:$0xff] %v3687_v63  ;;  %v135_v3 = vld [vmem:[#allocation9 + $0x1e8] sm:$0xff]  ;;  %v3696_v10 = vcombine.low %v123_v55, %v127_v56 }
  0x49   :  { %921 = vmatpush1.bf16.msra.mxu0 %v3651_v32  ;;  %v2919_v60 = vmul.f32 -1.442695, %v232_v52  ;;  %v2920_v61 = vmul.f32 -1.442695, %v233_v53  ;;  %5360 = vst [vmem:[#allocation42_spill] sm:$0xff] %v3690_v0  ;;  %v3693_v1 = vcombine.high %v130_v57, %v134_v58  ;;  %v138_v6 = vld [vmem:[#allocation9 + $0x200] sm:$0xff]  ;;  %v3699_v11 = vcombine.low %v130_v57, %v134_v58 }
  0x4a   :  { %922 = vmatprep.subr.bf16.mxu0 %v3657_v34  ;;  %962 = vmatpush1.bf16.msra.mxu1 %v3660_v39  ;;  %v142_v8 = vld [vmem:[#allocation9 + $0x220] sm:$0xff]  ;;  %5362 = vst [vmem:[#allocation44_spill] sm:$0xff] %v3696_v10  ;;  %v3702_v15 = vcombine.high %v131_v2, %v135_v3  ;;  %v139_v19 = vld [vmem:[#allocation9 + $0x208] sm:$0xff]  ;;  %v3708_v27 = vcombine.low %v131_v2, %v135_v3 }
  0x4b   :  { %963 = vmatprep.subr.bf16.mxu1 %v3666_v41  ;;  %3186 = vpow2.f32 %v2919_v60  ;;  %5361 = vst [vmem:[#allocation43_spill] sm:$0xff] %v3693_v1  ;;  %5363 = vst [vmem:[#allocation45_spill] sm:$0xff] %v3699_v11  ;;  %v3705_v16 = vcombine.high %v138_v6, %v142_v8  ;;  %v143_v20 = vld [vmem:[#allocation9 + $0x228] sm:$0xff]  ;;  %v146_v21 = vld [vmem:[#allocation9 + $0x240] sm:$0xff]  ;;  %v3711_v29 = vcombine.low %v138_v6, %v142_v8 }
  0x4c   :  { %3188 = vpow2.f32 %v2920_v61  ;;  %5364 = vst [vmem:[#allocation46_spill] sm:$0xff] %v3702_v15  ;;  %v150_v22 = vld [vmem:[#allocation9 + $0x260] sm:$0xff]  ;;  %5366 = vst [vmem:[#allocation48_spill] sm:$0xff] %v3708_v27  ;;  %v3714_v30 = vcombine.high %v139_v19, %v143_v20  ;;  %v147_v36 = vld [vmem:[#allocation9 + $0x248] sm:$0xff]  ;;  %v3720_v46 = vcombine.low %v139_v19, %v143_v20 }
  0x4d   :  { %923 = vmatpush1.bf16.msra.mxu0 %v3663_v40  ;;  %5365 = vst [vmem:[#allocation47_spill] sm:$0xff] %v3705_v16  ;;  %3190 = vpow2.f32 %v2921_v9  ;;  %5367 = vst [vmem:[#allocation49_spill] sm:$0xff] %v3711_v29  ;;  %v3717_v35 = vcombine.high %v146_v21, %v150_v22  ;;  %v151_v37 = vld [vmem:[#allocation9 + $0x268] sm:$0xff]  ;;  %v154_v43 = vld [vmem:[#allocation9 + $0x280] sm:$0xff]  ;;  %v3723_v49 = vcombine.low %v146_v21, %v150_v22 }
  0x4e   :  { %924 = vmatprep.subr.bf16.mxu0 %v3669_v42  ;;  %964 = vmatpush1.bf16.msra.mxu1 %v3672_v47  ;;  %5368 = vst [vmem:[#allocation50_spill] sm:$0xff] %v3714_v30  ;;  %v158_v44 = vld [vmem:[#allocation9 + $0x2a0] sm:$0xff]  ;;  %5370 = vst [vmem:[#allocation52_spill] sm:$0xff] %v3720_v46  ;;  %3192 = vtanh.f32 %v234_v28  ;;  %v3726_v52 = vcombine.high %v147_v36, %v151_v37  ;;  %v155_v56 = vld [vmem:[#allocation9 + $0x288] sm:$0xff]  ;;  %v3732_v60 = vcombine.low %v147_v36, %v151_v37 }
  0x4f   :  { %965 = vmatprep.subr.bf16.mxu1 %v3678_v51  ;;  %5369 = vst [vmem:[#allocation51_spill] sm:$0xff] %v3717_v35  ;;  %5371 = vst [vmem:[#allocation53_spill] sm:$0xff] %v3723_v49  ;;  %v3729_v55 = vcombine.high %v154_v43, %v158_v44  ;;  %v159_v57 = vld [vmem:[#allocation9 + $0x2a8] sm:$0xff]  ;;  %v162_v58 = vld [vmem:[#allocation9 + $0x2c0] sm:$0xff]  ;;  %v3735_v2 = vcombine.low %v154_v43, %v158_v44 }
  0x50   :  { %5372 = vst [vmem:[#allocation54_spill] sm:$0xff] %v3726_v52  ;;  %v166_v59 = vld [vmem:[#allocation9 + $0x2e0] sm:$0xff]  ;;  %5374 = vst [vmem:[#allocation56_spill] sm:$0xff] %v3732_v60  ;;  %v3738_v3 = vcombine.high %v155_v56, %v159_v57  ;;  %v163_v8 = vld [vmem:[#allocation9 + $0x2c8] sm:$0xff]  ;;  %v3744_v21 = vcombine.low %v155_v56, %v159_v57 }
  0x51   :  { %925 = vmatpush1.bf16.msra.mxu0 %v3675_v50  ;;  %5373 = vst [vmem:[#allocation55_spill] sm:$0xff] %v3729_v55  ;;  %5375 = vst [vmem:[#allocation57_spill] sm:$0xff] %v3735_v2  ;;  %v3741_v6 = vcombine.high %v162_v58, %v166_v59  ;;  %v167_v9 = vld [vmem:[#allocation9 + $0x2e8] sm:$0xff]  ;;  %v170_v19 = vld [vmem:[#allocation9 + $0x300] sm:$0xff]  ;;  %v3747_v37 = vcombine.low %v162_v58, %v166_v59 }
  0x52   :  { %926 = vmatprep.subr.bf16.mxu0 %v3681_v54  ;;  %966 = vmatpush1.bf16.msra.mxu1 %v3684_v62  ;;  %5376 = vst [vmem:[#allocation58_spill] sm:$0xff] %v3738_v3  ;;  %v174_v20 = vld [vmem:[#allocation9 + $0x320] sm:$0xff]  ;;  %5378 = vst [vmem:[#allocation60_spill] sm:$0xff] %v3744_v21  ;;  %v171_v22 = vld [vmem:[#allocation9 + $0x308] sm:$0xff]  ;;  %v3750_v44 = vcombine.high %v163_v8, %v167_v9  ;;  %v3756_v56 = vcombine.low %v163_v8, %v167_v9 }
  0x53   :  { %967 = vmatprep.subr.bf16.mxu1 %v3690_v0  ;;  %5377 = vst [vmem:[#allocation59_spill] sm:$0xff] %v3741_v6  ;;  %v175_v28 = vld [vmem:[#allocation9 + $0x328] sm:$0xff]  ;;  %5379 = vst [vmem:[#allocation61_spill] sm:$0xff] %v3747_v37  ;;  %v182_v43 = vld [vmem:[#allocation9 + $0x360] sm:$0xff]  ;;  %v3759_v58 = vcombine.low %v170_v19, %v174_v20 }
  0x54   :  { %5380 = vst [vmem:[#allocation62_spill] sm:$0xff] %v3750_v44  ;;  %5382 = vst [vmem:[#allocation64_spill] sm:$0xff] %v3756_v56  ;;  %v3762_v59 = vcombine.high %v171_v22, %v175_v28  ;;  %v190_v8 = vld [vmem:[#allocation9 + $0x3a0] sm:$0xff]  ;;  %v3768_v9 = vcombine.low %v171_v22, %v175_v28  ;;  %v191_v22 = vld [vmem:[#allocation9 + $0x3a8] sm:$0xff] }
  0x55   :  { %927 = vmatpush1.bf16.msra.mxu0 %v3687_v63  ;;  %v3187_v38 = vpop.eup %3186  ;;  %5383 = vst [vmem:[#allocation65_spill] sm:$0xff] %v3759_v58  ;;  %v194_v28 = vld [vmem:[#allocation9 + $0x3c0] sm:$0xff] }
  0x56   :  { %928 = vmatprep.subr.bf16.mxu0 %v3693_v1  ;;  %968 = vmatpush1.bf16.msra.mxu1 %v3696_v10  ;;  %v3189_v45 = vpop.eup %3188  ;;  %v243_v48 = vadd.f32 1.0, %v3187_v38  ;;  %v178_v38 = vld [vmem:[#allocation9 + $0x340] sm:$0xff]  ;;  %5384 = vst [vmem:[#allocation66_spill] sm:$0xff] %v3762_v59  ;;  %5386 = vst [vmem:[#allocation68_spill] sm:$0xff] %v3768_v9 }
  0x57   :  { %969 = vmatprep.subr.bf16.mxu1 %v3702_v15  ;;  %v249_v53 = vadd.f32 1.0, %v3189_v45  ;;  %v3191_v61 = vpop.eup %3190 }
  0x58   :  { %3194 = vrcp.f32 %v243_v48  ;;  %v256_v36 = vadd.f32 1.0, %v3191_v61  ;;  %v3193_v45 = vpop.eup %3192  ;;  %v3753_v48 = vcombine.high %v170_v19, %v174_v20  ;;  %v3773_v20 = vcombine.low %v178_v38, %v182_v43 }
  0x59   :  { %929 = vmatpush1.bf16.msra.mxu0 %v3699_v11  ;;  %3196 = vrcp.f32 %v249_v53 }
  0x5a   :  { %930 = vmatprep.subr.bf16.mxu0 %v3705_v16  ;;  %970 = vmatpush1.bf16.msra.mxu1 %v3708_v27  ;;  %5381 = vst [vmem:[#allocation63_spill] sm:$0xff] %v3753_v48  ;;  %3198 = vrcp.f32 %v256_v36  ;;  %5388 = vst [vmem:[#allocation70_spill] sm:$0xff] %v3773_v20  ;;  %v198_v36 = vld [vmem:[#allocation9 + $0x3e0] sm:$0xff] }
  0x5b   :  { %971 = vmatprep.subr.bf16.mxu1 %v3714_v30 }
  0x5d   :  { %931 = vmatpush1.bf16.msra.mxu0 %v3711_v29 }
  0x5e   :  { %932 = vmatprep.subr.bf16.mxu0 %v3717_v35  ;;  %972 = vmatpush1.bf16.msra.mxu1 %v3720_v46 }
  0x5f   :  { %973 = vmatprep.subr.bf16.mxu1 %v3726_v52 }
  0x61   :  { %933 = vmatpush1.bf16.msra.mxu0 %v3723_v49 }
  0x62   :  { %934 = vmatprep.subr.bf16.mxu0 %v3729_v55  ;;  %974 = vmatpush1.bf16.msra.mxu1 %v3732_v60  ;;  %v3195_v53 = vpop.eup %3194  ;;  %v183_v55 = vld [vmem:[#allocation9 + $0x368] sm:$0xff] }
  0x63   :  { %975 = vmatprep.subr.bf16.mxu1 %v3738_v3  ;;  %v3197_v57 = vpop.eup %3196  ;;  %v260_v61 = vmul.f32 %v3195_v53, %v3193_v45  ;;  %v179_v3 = vld [vmem:[#allocation9 + $0x348] sm:$0xff] }
  0x64   :  { %v3776_v45 = vcombine.high %v179_v3, %v183_v55 }
  0x65   :  { %935 = vmatpush1.bf16.msra.mxu0 %v3735_v2  ;;  %v259_v2 = vmul.f32 0.0, %v3197_v57  ;;  %v187_v57 = vld [vmem:[#allocation9 + $0x388] sm:$0xff] }
  0x66   :  { %936 = vmatprep.subr.bf16.mxu0 %v3741_v6  ;;  %976 = vmatpush1.bf16.msra.mxu1 %v3744_v21  ;;  %v3765_v6 = vcombine.high %v178_v38, %v182_v43  ;;  %v186_v21 = vld [vmem:[#allocation9 + $0x380] sm:$0xff]  ;;  %5389 = vst [vmem:[#allocation71_spill] sm:$0xff] %v3776_v45  ;;  %v3789_v43 = vcombine.high %v187_v57, %v191_v22 }
  0x67   :  { %977 = vmatprep.subr.bf16.mxu1 %v3750_v44  ;;  %v3770_v19 = vadd.f32 %v260_v61, %v259_v2  ;;  %v3779_v53 = vcombine.high %v186_v21, %v190_v8  ;;  %v3783_v2 = vcombine.low %v179_v3, %v183_v55  ;;  %v3786_v38 = vcombine.low %v186_v21, %v190_v8  ;;  %v3199_v8 = vpop.eup %3198 }
  0x68   :  { %5385 = vst [vmem:[#allocation67_spill] sm:$0xff] %v3765_v6  ;;  %5393 = vst [vmem:[#allocation75_spill] sm:$0xff] %v3789_v43  ;;  %v3792_v61 = vcombine.high %v194_v28, %v198_v36  ;;  %v3795_v55 = vcombine.low %v187_v57, %v191_v22  ;;  %v3798_v3 = vcombine.low %v194_v28, %v198_v36 }
  0x69   :  { %937 = vmatpush1.bf16.msra.mxu0 %v3747_v37  ;;  %5387 = vst [vmem:[#allocation69_spill] sm:$0xff] %v3770_v19  ;;  %5390 = vst [vmem:[#allocation72_spill] sm:$0xff] %v3779_v53  ;;  %3200 = vtanh.f32 %v3770_v19  ;;  %v195_v19 = vld [vmem:[#allocation9 + $0x3c8] sm:$0xff] }
  0x6a   :  { %938 = vmatprep.subr.bf16.mxu0 %v3753_v48  ;;  %978 = vmatpush1.bf16.msra.mxu1 %v3756_v56  ;;  %5391 = vst [vmem:[#allocation73_spill] sm:$0xff] %v3783_v2  ;;  %5392 = vst [vmem:[#allocation74_spill] sm:$0xff] %v3786_v38  ;;  %v101_v48 = vld [vmem:[#allocation9 + $0xd8] sm:$0xff] }
  0x6b   :  { %979 = vmatprep.subr.bf16.mxu1 %v3762_v59  ;;  %5394 = vst [vmem:[#allocation76_spill] sm:$0xff] %v3792_v61  ;;  %v80_v59 = vld [vmem:[#allocation9 + $0x30] sm:$0xff]  ;;  %5395 = vst [vmem:[#allocation77_spill] sm:$0xff] %v3795_v55  ;;  %v105_v56 = vld [vmem:[#allocation9 + $0xf8] sm:$0xff] }
  0x6c   :  { %5396 = vst [vmem:[#allocation78_spill] sm:$0xff] %v3798_v3 }
  0x6d   :  { %939 = vmatpush1.bf16.msra.mxu0 %v3759_v58  ;;  %v76_v58 = vld [vmem:[#allocation9 + $0x10] sm:$0xff] }
  0x6e   :  { %940 = vmatprep.subr.bf16.mxu0 %v3765_v6  ;;  %980 = vmatpush1.bf16.msra.mxu1 %v3768_v9  ;;  %v199_v6 = vld [vmem:[#allocation9 + $0x3e8] sm:$0xff] }
  0x6f   :  { %981 = vmatprep.subr.bf16.mxu1 %v3776_v45  ;;  %v3801_v21 = vcombine.high %v195_v19, %v199_v6  ;;  %v81_v45 = vld [vmem:[#allocation9 + $0x38] sm:$0xff]  ;;  %v3807_v57 = vcombine.low %v195_v19, %v199_v6 }
  0x70   :  { %v89_v6 = vld [vmem:[#allocation9 + $0x78] sm:$0xff] }
  0x71   :  { %941 = vmatpush1.bf16.msra.mxu0 %v3773_v20  ;;  %5397 = vst [vmem:[#allocation79_spill] sm:$0xff] %v3801_v21  ;;  %v77_v20 = vld [vmem:[#allocation9 + $0x18] sm:$0xff]  ;;  %5399 = vst [vmem:[#allocation81_spill] sm:$0xff] %v3807_v57 }
  0x72   :  { %942 = vmatprep.subr.bf16.mxu0 %v3779_v53  ;;  %982 = vmatpush1.bf16.msra.mxu1 %v3783_v2  ;;  %v3804_v53 = vcombine.high %v76_v58, %v80_v59  ;;  %v3811_v28 = vcombine.high %v77_v20, %v81_v45  ;;  %v104_v2 = vld [vmem:[#allocation9 + $0xf0] sm:$0xff] }
  0x73   :  { %983 = vmatprep.subr.bf16.mxu1 %v3789_v43  ;;  %v3201_v9 = vpop.eup %3200 }
  0x74   :  { %5398 = vst [vmem:[#allocation80_spill] sm:$0xff] %v3804_v53  ;;  %v263_v22 = vmul.f32 %v3201_v9, %v3199_v8  ;;  %5400 = vst [vmem:[#allocation82_spill] sm:$0xff] %v3811_v28  ;;  %v3818_v9 = vcombine.low %v76_v58, %v80_v59  ;;  %v3820_v8 = vcombine.low %v77_v20, %v81_v45  ;;  %v100_v45 = vld [vmem:[#allocation9 + $0xd0] sm:$0xff] }
  0x75   :  { %943 = vmatpush1.bf16.msra.mxu0 %v3786_v38  ;;  %v88_v38 = vld [vmem:[#allocation9 + $0x70] sm:$0xff] }
  0x76   :  { %944 = vmatprep.subr.bf16.mxu0 %v3792_v61  ;;  %984 = vmatpush1.bf16.msra.mxu1 %v3795_v55  ;;  %v264_v36 = vpack.c.bf16 %v263_v22, %v263_v22  ;;  %v84_v61 = vld [vmem:[#allocation9 + $0x50] sm:$0xff]  ;;  %v85_v55 = vld [vmem:[#allocation9 + $0x58] sm:$0xff]  ;;  %5401 = vst [vmem:[#allocation83_spill] sm:$0xff] %v3820_v8 }
  0x77   :  { %985 = vmatprep.subr.bf16.mxu1 %v3801_v21  ;;  %v3822_v21 = vcombine.high %v84_v61, %v88_v38  ;;  %v92_v22 = vld [vmem:[#allocation9 + $0x90] sm:$0xff]  ;;  %v3829_v58 = vcombine.low %v84_v61, %v88_v38  ;;  %v3832_v59 = vcombine.low %v85_v55, %v89_v6 }
  0x78   :  { %265 = vst [vmem:[#allocation2] sm:$0xf] %v264_v36  ;;  %v96_v36 = vld [vmem:[#allocation9 + $0xb0] sm:$0xff] }
  0x79   :  { %945 = vmatpush1.bf16.msra.mxu0 %v3798_v3  ;;  %5402 = vst [vmem:[#allocation84_spill] sm:$0xff] %v3822_v21  ;;  %5404 = vst [vmem:[#allocation86_spill] sm:$0xff] %v3829_v58  ;;  %v3835_v20 = vcombine.high %v92_v22, %v96_v36  ;;  %v3841_v38 = vcombine.low %v92_v22, %v96_v36  ;;  %v3853_v22 = vcombine.low %v100_v45, %v104_v2  ;;  %v116_v36 = vld [vmem:[#allocation9 + $0x150] sm:$0xff] }
  0x7a   :  { %996 = vmatprep.subr.bf16.mxu0 %v3804_v53  ;;  %986 = vmatpush1.bf16.msra.mxu1 %v3807_v57  ;;  %v3824_v53 = vcombine.high %v85_v55, %v89_v6  ;;  %v97_v57 = vld [vmem:[#allocation9 + $0xb8] sm:$0xff]  ;;  %5405 = vst [vmem:[#allocation87_spill] sm:$0xff] %v3832_v59  ;;  %v3847_v55 = vcombine.high %v100_v45, %v104_v2  ;;  %v108_v6 = vld [vmem:[#allocation9 + $0x110] sm:$0xff] }
  0x7b   :  { %1037 = vmatprep.subr.bf16.mxu1 %v3811_v28  ;;  %v93_v28 = vld [vmem:[#allocation9 + $0x98] sm:$0xff]  ;;  %5406 = vst [vmem:[#allocation88_spill] sm:$0xff] %v3835_v20  ;;  %5408 = vst [vmem:[#allocation90_spill] sm:$0xff] %v3841_v38  ;;  %v124_v45 = vld [vmem:[#allocation9 + $0x190] sm:$0xff] }
  0x7c   :  { %5403 = vst [vmem:[#allocation85_spill] sm:$0xff] %v3824_v53  ;;  %v3844_v61 = vcombine.low %v93_v28, %v97_v57  ;;  %5410 = vst [vmem:[#allocation92_spill] sm:$0xff] %v3847_v55 }
  0x7d   :  { %5412 = vst [vmem:[#allocation94_spill] sm:$0xff] %v3853_v22 }
  0x7e   :  { %5409 = vst [vmem:[#allocation91_spill] sm:$0xff] %v3844_v61 }
  0x7f   :  { %v266_v19 = vld [vmem:[#allocation2] sm:$0xff] }
  0x80   :  { %v2923_v43 = vcombine.high %v266_v19, %v266_v19  ;;  %v3816_v3 = vcombine.low %v266_v19, %v266_v19  ;;  %v3838_v19 = vcombine.high %v93_v28, %v97_v57  ;;  %v3856_v57 = vcombine.low %v101_v48, %v105_v56 }
  0x82   :  { %946 = vmatprep.mubr.bf16.mxu0 %v2923_v43  ;;  %987 = vmatprep.mubr.bf16.mxu1 %v2923_v43  ;;  %5407 = vst [vmem:[#allocation89_spill] sm:$0xff] %v3838_v19  ;;  %5413 = vst [vmem:[#allocation95_spill] sm:$0xff] %v3856_v57 }
  0x83   :  { %947 = vmatmul.mubr.bf16.vlgmr.msra.gmra.mrb[0].mxu0 %v3816_v3  ;;  %988 = vmatmul.mubr.bf16.vlgmr.msra.gmra.mrb[0].mxu1 %v3816_v3 }
  0x84   :  { %997 = vmatpush1.bf16.msra.mxu0 %v3818_v9  ;;  %1038 = vmatpush1.bf16.msra.mxu1 %v3820_v8  ;;  %v109_v8 = vld [vmem:[#allocation9 + $0x118] sm:$0xff] }
  0x85   :  { %998 = vmatprep.subr.bf16.mxu0 %v3822_v21  ;;  %1039 = vmatprep.subr.bf16.mxu1 %v3824_v53  ;;  %v3850_v53 = vcombine.high %v101_v48, %v105_v56  ;;  %v112_v21 = vld [vmem:[#allocation9 + $0x130] sm:$0xff] }
  0x86   :  { %1028 = vmatprep.mubr.bf16.mxu0 %v2923_v43  ;;  %1069 = vmatprep.mubr.bf16.mxu1 %v2923_v43  ;;  %v113_v43 = vld [vmem:[#allocation9 + $0x138] sm:$0xff]  ;;  %v3859_v28 = vcombine.high %v108_v6, %v112_v21  ;;  %v3865_v2 = vcombine.low %v108_v6, %v112_v21 }
  0x87   :  { %5411 = vst [vmem:[#allocation93_spill] sm:$0xff] %v3850_v53  ;;  %v3868_v48 = vcombine.low %v109_v8, %v113_v43 }
  0x88   :  { %999 = vmatpush1.bf16.msra.mxu0 %v3829_v58  ;;  %1040 = vmatpush1.bf16.msra.mxu1 %v3832_v59  ;;  %5414 = vst [vmem:[#allocation96_spill] sm:$0xff] %v3859_v28  ;;  %v117_v59 = vld [vmem:[#allocation9 + $0x158] sm:$0xff]  ;;  %5416 = vst [vmem:[#allocation98_spill] sm:$0xff] %v3865_v2 }
  0x89   :  { %1000 = vmatprep.subr.bf16.mxu0 %v3835_v20  ;;  %1041 = vmatprep.subr.bf16.mxu1 %v3838_v19  ;;  %v3862_v19 = vcombine.high %v109_v8, %v113_v43  ;;  %v120_v20 = vld [vmem:[#allocation9 + $0x170] sm:$0xff]  ;;  %v121_v58 = vld [vmem:[#allocation9 + $0x178] sm:$0xff]  ;;  %5417 = vst [vmem:[#allocation99_spill] sm:$0xff] %v3868_v48 }
  0x8a   :  { %v3871_v56 = vcombine.high %v116_v36, %v120_v20  ;;  %v3877_v21 = vcombine.low %v116_v36, %v120_v20  ;;  %v3880_v8 = vcombine.low %v117_v59, %v121_v58  ;;  %v132_v43 = vld [vmem:[#allocation9 + $0x1d0] sm:$0xff] }
  0x8b   :  { %5415 = vst [vmem:[#allocation97_spill] sm:$0xff] %v3862_v19  ;;  %v140_v36 = vld [vmem:[#allocation9 + $0x210] sm:$0xff] }
  0x8c   :  { %1001 = vmatpush1.bf16.msra.mxu0 %v3841_v38  ;;  %1042 = vmatpush1.bf16.msra.mxu1 %v3844_v61  ;;  %5418 = vst [vmem:[#allocation100_spill] sm:$0xff] %v3871_v56  ;;  %v125_v61 = vld [vmem:[#allocation9 + $0x198] sm:$0xff]  ;;  %5420 = vst [vmem:[#allocation102_spill] sm:$0xff] %v3877_v21 }
  0x8d   :  { %1002 = vmatprep.subr.bf16.mxu0 %v3847_v55  ;;  %1043 = vmatprep.subr.bf16.mxu1 %v3850_v53  ;;  %v3874_v53 = vcombine.high %v117_v59, %v121_v58  ;;  %v128_v55 = vld [vmem:[#allocation9 + $0x1b0] sm:$0xff]  ;;  %v129_v38 = vld [vmem:[#allocation9 + $0x1b8] sm:$0xff]  ;;  %5421 = vst [vmem:[#allocation103_spill] sm:$0xff] %v3880_v8 }
  0x8e   :  { %v3883_v6 = vcombine.high %v124_v45, %v128_v55  ;;  %v3889_v20 = vcombine.low %v124_v45, %v128_v55  ;;  %v3892_v58 = vcombine.low %v125_v61, %v129_v38  ;;  %v148_v45 = vld [vmem:[#allocation9 + $0x250] sm:$0xff] }
  0x8f   :  { %5419 = vst [vmem:[#allocation101_spill] sm:$0xff] %v3874_v53 }
  0x90   :  { %1003 = vmatpush1.bf16.msra.mxu0 %v3853_v22  ;;  %1044 = vmatpush1.bf16.msra.mxu1 %v3856_v57  ;;  %5422 = vst [vmem:[#allocation104_spill] sm:$0xff] %v3883_v6  ;;  %v133_v57 = vld [vmem:[#allocation9 + $0x1d8] sm:$0xff]  ;;  %5424 = vst [vmem:[#allocation106_spill] sm:$0xff] %v3889_v20 }
  0x91   :  { %1004 = vmatprep.subr.bf16.mxu0 %v3859_v28  ;;  %1045 = vmatprep.subr.bf16.mxu1 %v3862_v19  ;;  %v3886_v19 = vcombine.high %v125_v61, %v129_v38  ;;  %v136_v28 = vld [vmem:[#allocation9 + $0x1f0] sm:$0xff]  ;;  %v137_v22 = vld [vmem:[#allocation9 + $0x1f8] sm:$0xff]  ;;  %5425 = vst [vmem:[#allocation107_spill] sm:$0xff] %v3892_v58 }
  0x92   :  { %v3895_v59 = vcombine.high %v132_v43, %v136_v28  ;;  %v3901_v55 = vcombine.low %v132_v43, %v136_v28  ;;  %v3904_v38 = vcombine.low %v133_v57, %v137_v22  ;;  %v156_v43 = vld [vmem:[#allocation9 + $0x290] sm:$0xff] }
  0x93   :  { %5423 = vst [vmem:[#allocation105_spill] sm:$0xff] %v3886_v19 }
  0x94   :  { %1005 = vmatpush1.bf16.msra.mxu0 %v3865_v2  ;;  %1046 = vmatpush1.bf16.msra.mxu1 %v3868_v48  ;;  %5426 = vst [vmem:[#allocation108_spill] sm:$0xff] %v3895_v59  ;;  %v141_v48 = vld [vmem:[#allocation9 + $0x218] sm:$0xff]  ;;  %5428 = vst [vmem:[#allocation110_spill] sm:$0xff] %v3901_v55 }
  0x95   :  { %1006 = vmatprep.subr.bf16.mxu0 %v3871_v56  ;;  %1047 = vmatprep.subr.bf16.mxu1 %v3874_v53  ;;  %v3898_v53 = vcombine.high %v133_v57, %v137_v22  ;;  %v144_v56 = vld [vmem:[#allocation9 + $0x230] sm:$0xff]  ;;  %v145_v2 = vld [vmem:[#allocation9 + $0x238] sm:$0xff]  ;;  %5429 = vst [vmem:[#allocation111_spill] sm:$0xff] %v3904_v38 }
  0x96   :  { %v3907_v61 = vcombine.high %v140_v36, %v144_v56  ;;  %v3913_v28 = vcombine.low %v140_v36, %v144_v56  ;;  %v3916_v22 = vcombine.low %v141_v48, %v145_v2  ;;  %v164_v36 = vld [vmem:[#allocation9 + $0x2d0] sm:$0xff] }
  0x97   :  { %5427 = vst [vmem:[#allocation109_spill] sm:$0xff] %v3898_v53 }
  0x98   :  { %1007 = vmatpush1.bf16.msra.mxu0 %v3877_v21  ;;  %1048 = vmatpush1.bf16.msra.mxu1 %v3880_v8  ;;  %5430 = vst [vmem:[#allocation112_spill] sm:$0xff] %v3907_v61  ;;  %v149_v8 = vld [vmem:[#allocation9 + $0x258] sm:$0xff]  ;;  %5432 = vst [vmem:[#allocation114_spill] sm:$0xff] %v3913_v28 }
  0x99   :  { %1008 = vmatprep.subr.bf16.mxu0 %v3883_v6  ;;  %1049 = vmatprep.subr.bf16.mxu1 %v3886_v19  ;;  %v3910_v19 = vcombine.high %v141_v48, %v145_v2  ;;  %v152_v6 = vld [vmem:[#allocation9 + $0x270] sm:$0xff]  ;;  %v153_v21 = vld [vmem:[#allocation9 + $0x278] sm:$0xff]  ;;  %5433 = vst [vmem:[#allocation115_spill] sm:$0xff] %v3916_v22 }
  0x9a   :  { %v3919_v57 = vcombine.high %v148_v45, %v152_v6  ;;  %v3925_v56 = vcombine.low %v148_v45, %v152_v6  ;;  %v3928_v2 = vcombine.low %v149_v8, %v153_v21  ;;  %v172_v45 = vld [vmem:[#allocation9 + $0x310] sm:$0xff] }
  0x9b   :  { %5431 = vst [vmem:[#allocation113_spill] sm:$0xff] %v3910_v19 }
  0x9c   :  { %1009 = vmatpush1.bf16.msra.mxu0 %v3889_v20  ;;  %1050 = vmatpush1.bf16.msra.mxu1 %v3892_v58  ;;  %5434 = vst [vmem:[#allocation116_spill] sm:$0xff] %v3919_v57  ;;  %v157_v58 = vld [vmem:[#allocation9 + $0x298] sm:$0xff]  ;;  %5436 = vst [vmem:[#allocation118_spill] sm:$0xff] %v3925_v56 }
  0x9d   :  { %1010 = vmatprep.subr.bf16.mxu0 %v3895_v59  ;;  %1051 = vmatprep.subr.bf16.mxu1 %v3898_v53  ;;  %v3922_v53 = vcombine.high %v149_v8, %v153_v21  ;;  %v160_v59 = vld [vmem:[#allocation9 + $0x2b0] sm:$0xff]  ;;  %v161_v20 = vld [vmem:[#allocation9 + $0x2b8] sm:$0xff]  ;;  %5437 = vst [vmem:[#allocation119_spill] sm:$0xff] %v3928_v2 }
  0x9e   :  { %v3931_v48 = vcombine.high %v156_v43, %v160_v59  ;;  %v3937_v6 = vcombine.low %v156_v43, %v160_v59  ;;  %v3940_v21 = vcombine.low %v157_v58, %v161_v20  ;;  %v180_v43 = vld [vmem:[#allocation9 + $0x350] sm:$0xff] }
  0x9f   :  { %5435 = vst [vmem:[#allocation117_spill] sm:$0xff] %v3922_v53 }
  0xa0   :  { %1011 = vmatpush1.bf16.msra.mxu0 %v3901_v55  ;;  %1052 = vmatpush1.bf16.msra.mxu1 %v3904_v38  ;;  %5438 = vst [vmem:[#allocation120_spill] sm:$0xff] %v3931_v48  ;;  %v165_v38 = vld [vmem:[#allocation9 + $0x2d8] sm:$0xff]  ;;  %5440 = vst [vmem:[#allocation122_spill] sm:$0xff] %v3937_v6 }
  0xa1   :  { %1012 = vmatprep.subr.bf16.mxu0 %v3907_v61  ;;  %1053 = vmatprep.subr.bf16.mxu1 %v3910_v19  ;;  %v3934_v19 = vcombine.high %v157_v58, %v161_v20  ;;  %v168_v61 = vld [vmem:[#allocation9 + $0x2f0] sm:$0xff]  ;;  %v169_v55 = vld [vmem:[#allocation9 + $0x2f8] sm:$0xff]  ;;  %5441 = vst [vmem:[#allocation123_spill] sm:$0xff] %v3940_v21 }
  0xa2   :  { %v3943_v8 = vcombine.high %v164_v36, %v168_v61  ;;  %v3949_v59 = vcombine.low %v164_v36, %v168_v61  ;;  %v3952_v20 = vcombine.low %v165_v38, %v169_v55  ;;  %v188_v36 = vld [vmem:[#allocation9 + $0x390] sm:$0xff] }
  0xa3   :  { %5439 = vst [vmem:[#allocation121_spill] sm:$0xff] %v3934_v19 }
  0xa4   :  { %1013 = vmatpush1.bf16.msra.mxu0 %v3913_v28  ;;  %1054 = vmatpush1.bf16.msra.mxu1 %v3916_v22  ;;  %5442 = vst [vmem:[#allocation124_spill] sm:$0xff] %v3943_v8  ;;  %v173_v22 = vld [vmem:[#allocation9 + $0x318] sm:$0xff]  ;;  %5444 = vst [vmem:[#allocation126_spill] sm:$0xff] %v3949_v59 }
  0xa5   :  { %1014 = vmatprep.subr.bf16.mxu0 %v3919_v57  ;;  %1055 = vmatprep.subr.bf16.mxu1 %v3922_v53  ;;  %v3946_v53 = vcombine.high %v165_v38, %v169_v55  ;;  %v176_v57 = vld [vmem:[#allocation9 + $0x330] sm:$0xff]  ;;  %v177_v28 = vld [vmem:[#allocation9 + $0x338] sm:$0xff]  ;;  %5445 = vst [vmem:[#allocation127_spill] sm:$0xff] %v3952_v20 }
  0xa6   :  { %v3955_v58 = vcombine.high %v172_v45, %v176_v57  ;;  %v3961_v61 = vcombine.low %v172_v45, %v176_v57  ;;  %v3964_v55 = vcombine.low %v173_v22, %v177_v28  ;;  %v196_v45 = vld [vmem:[#allocation9 + $0x3d0] sm:$0xff] }
  0xa7   :  { %5443 = vst [vmem:[#allocation125_spill] sm:$0xff] %v3946_v53 }
  0xa8   :  { %1015 = vmatpush1.bf16.msra.mxu0 %v3925_v56  ;;  %1056 = vmatpush1.bf16.msra.mxu1 %v3928_v2  ;;  %5446 = vst [vmem:[#allocation128_spill] sm:$0xff] %v3955_v58  ;;  %v181_v2 = vld [vmem:[#allocation9 + $0x358] sm:$0xff]  ;;  %5448 = vst [vmem:[#allocation130_spill] sm:$0xff] %v3961_v61 }
  0xa9   :  { %1016 = vmatprep.subr.bf16.mxu0 %v3931_v48  ;;  %1057 = vmatprep.subr.bf16.mxu1 %v3934_v19  ;;  %v3958_v19 = vcombine.high %v173_v22, %v177_v28  ;;  %v184_v48 = vld [vmem:[#allocation9 + $0x370] sm:$0xff]  ;;  %v185_v56 = vld [vmem:[#allocation9 + $0x378] sm:$0xff]  ;;  %5449 = vst [vmem:[#allocation131_spill] sm:$0xff] %v3964_v55 }
  0xaa   :  { %v3967_v38 = vcombine.high %v180_v43, %v184_v48  ;;  %v3973_v57 = vcombine.low %v180_v43, %v184_v48  ;;  %v3976_v28 = vcombine.low %v181_v2, %v185_v56 }
  0xab   :  { %5447 = vst [vmem:[#allocation129_spill] sm:$0xff] %v3958_v19 }
  0xac   :  { %1017 = vmatpush1.bf16.msra.mxu0 %v3937_v6  ;;  %1058 = vmatpush1.bf16.msra.mxu1 %v3940_v21  ;;  %5450 = vst [vmem:[#allocation132_spill] sm:$0xff] %v3967_v38  ;;  %v189_v21 = vld [vmem:[#allocation9 + $0x398] sm:$0xff]  ;;  %5452 = vst [vmem:[#allocation134_spill] sm:$0xff] %v3973_v57 }
  0xad   :  { %1018 = vmatprep.subr.bf16.mxu0 %v3943_v8  ;;  %1059 = vmatprep.subr.bf16.mxu1 %v3946_v53  ;;  %v3970_v53 = vcombine.high %v181_v2, %v185_v56  ;;  %v192_v8 = vld [vmem:[#allocation9 + $0x3b0] sm:$0xff]  ;;  %v193_v6 = vld [vmem:[#allocation9 + $0x3b8] sm:$0xff]  ;;  %5453 = vst [vmem:[#allocation135_spill] sm:$0xff] %v3976_v28 }
  0xae   :  { %v3979_v22 = vcombine.high %v188_v36, %v192_v8  ;;  %v3985_v48 = vcombine.low %v188_v36, %v192_v8  ;;  %v3988_v56 = vcombine.low %v189_v21, %v193_v6  ;;  %v5468_v36 = vld [vmem:[#allocation63_spill] sm:$0xff] }
  0xaf   :  { %5451 = vst [vmem:[#allocation133_spill] sm:$0xff] %v3970_v53 }
  0xb0   :  { %1019 = vmatpush1.bf16.msra.mxu0 %v3949_v59  ;;  %1060 = vmatpush1.bf16.msra.mxu1 %v3952_v20  ;;  %5454 = vst [vmem:[#allocation136_spill] sm:$0xff] %v3979_v22  ;;  %v197_v20 = vld [vmem:[#allocation9 + $0x3d8] sm:$0xff]  ;;  %5456 = vst [vmem:[#allocation138_spill] sm:$0xff] %v3985_v48 }
  0xb1   :  { %1020 = vmatprep.subr.bf16.mxu0 %v3955_v58  ;;  %1061 = vmatprep.subr.bf16.mxu1 %v3958_v19  ;;  %v3982_v19 = vcombine.high %v189_v21, %v193_v6  ;;  %v200_v58 = vld [vmem:[#allocation9 + $0x3f0] sm:$0xff]  ;;  %v201_v59 = vld [vmem:[#allocation9 + $0x3f8] sm:$0xff]  ;;  %5457 = vst [vmem:[#allocation139_spill] sm:$0xff] %v3988_v56 }
  0xb2   :  { %v3991_v2 = vcombine.high %v196_v45, %v200_v58  ;;  %v3994_v43 = vcombine.high %v197_v20, %v201_v59  ;;  %v4000_v8 = vcombine.low %v197_v20, %v201_v59  ;;  %v5463_v6 = vld [vmem:[#allocation58_spill] sm:$0xff]  ;;  %v5464_v21 = vld [vmem:[#allocation57_spill] sm:$0xff]  ;;  %v5465_v59 = vld [vmem:[#allocation60_spill] sm:$0xff] }
  0xb3   :  { %5455 = vst [vmem:[#allocation137_spill] sm:$0xff] %v3982_v19  ;;  %v5466_v20 = vld [vmem:[#allocation59_spill] sm:$0xff] }
  0xb4   :  { %1021 = vmatpush1.bf16.msra.mxu0 %v3961_v61  ;;  %1062 = vmatpush1.bf16.msra.mxu1 %v3964_v55  ;;  %5458 = vst [vmem:[#allocation140_spill] sm:$0xff] %v3991_v2  ;;  %5459 = vst [vmem:[#allocation141_spill] sm:$0xff] %v3994_v43 }
  0xb5   :  { %1022 = vmatprep.subr.bf16.mxu0 %v3967_v38  ;;  %1063 = vmatprep.subr.bf16.mxu1 %v3970_v53  ;;  %v3997_v53 = vcombine.low %v196_v45, %v200_v58  ;;  %5461 = vst [vmem:[#allocation143_spill] sm:$0xff] %v4000_v8  ;;  %v5467_v58 = vld [vmem:[#allocation64_spill] sm:$0xff]  ;;  %v5469_v45 = vld [vmem:[#allocation66_spill] sm:$0xff] }
  0xb7   :  { %5460 = vst [vmem:[#allocation142_spill] sm:$0xff] %v3997_v53 }
  0xb8   :  { %1023 = vmatpush1.bf16.msra.mxu0 %v3973_v57  ;;  %1064 = vmatpush1.bf16.msra.mxu1 %v3976_v28 }
  0xb9   :  { %1024 = vmatprep.subr.bf16.mxu0 %v3979_v22  ;;  %1065 = vmatprep.subr.bf16.mxu1 %v3982_v19 }
  0xbc   :  { %1025 = vmatpush1.bf16.msra.mxu0 %v3985_v48  ;;  %1066 = vmatpush1.bf16.msra.mxu1 %v3988_v56 }
  0xbd   :  { %1026 = vmatprep.subr.bf16.mxu0 %v3991_v2  ;;  %1067 = vmatprep.subr.bf16.mxu1 %v3994_v43 }
  0xc0   :  { %1027 = vmatpush1.bf16.msra.mxu0 %v3997_v53  ;;  %1068 = vmatpush1.bf16.msra.mxu1 %v4000_v8 }
  0xc1   :  { %1153 = vmatprep.subr.bf16.mxu0 %v3615_v4  ;;  %1194 = vmatprep.subr.bf16.mxu1 %v3625_v13 }
  0xc3   :  { %1029 = vmatmul.mubr.bf16.vlgmr.msra.gmra.mrb[4].mxu0 %v3816_v3  ;;  %1070 = vmatmul.mubr.bf16.vlgmr.msra.gmra.mrb[4].mxu1 %v3816_v3  ;;  %v5462_v3 = vld [vmem:[#allocation55_spill] sm:$0xff] }
  0xc4   :  { %1154 = vmatpush1.bf16.msra.mxu0 %v3617_v5  ;;  %1195 = vmatpush1.bf16.msra.mxu1 %v3627_v14 }
  0xc5   :  { %1155 = vmatprep.subr.bf16.mxu0 %v3619_v7  ;;  %1196 = vmatprep.subr.bf16.mxu1 %v3632_v18 }
  0xc8   :  { %1156 = vmatpush1.bf16.msra.mxu0 %v3623_v12  ;;  %1197 = vmatpush1.bf16.msra.mxu1 %v3636_v23 }
  0xc9   :  { %1157 = vmatprep.subr.bf16.mxu0 %v3630_v17  ;;  %1198 = vmatprep.subr.bf16.mxu1 %v3642_v25 }
  0xcc   :  { %1158 = vmatpush1.bf16.msra.mxu0 %v3639_v24  ;;  %1199 = vmatpush1.bf16.msra.mxu1 %v3648_v31 }
  0xcd   :  { %1159 = vmatprep.subr.bf16.mxu0 %v3645_v26  ;;  %1200 = vmatprep.subr.bf16.mxu1 %v3654_v33 }
  0xd0   :  { %1160 = vmatpush1.bf16.msra.mxu0 %v3651_v32  ;;  %1201 = vmatpush1.bf16.msra.mxu1 %v3660_v39 }
  0xd1   :  { %1161 = vmatprep.subr.bf16.mxu0 %v3657_v34  ;;  %1202 = vmatprep.subr.bf16.mxu1 %v3666_v41 }
  0xd4   :  { %1162 = vmatpush1.bf16.msra.mxu0 %v3663_v40  ;;  %1203 = vmatpush1.bf16.msra.mxu1 %v3672_v47 }
  0xd5   :  { %1163 = vmatprep.subr.bf16.mxu0 %v3669_v42  ;;  %1204 = vmatprep.subr.bf16.mxu1 %v3678_v51 }
  0xd8   :  { %1164 = vmatpush1.bf16.msra.mxu0 %v3675_v50  ;;  %1205 = vmatpush1.bf16.msra.mxu1 %v3684_v62 }
  0xd9   :  { %1165 = vmatprep.subr.bf16.mxu0 %v3681_v54  ;;  %1206 = vmatprep.subr.bf16.mxu1 %v3690_v0 }
  0xdc   :  { %1166 = vmatpush1.bf16.msra.mxu0 %v3687_v63  ;;  %1207 = vmatpush1.bf16.msra.mxu1 %v3696_v10 }
  0xdd   :  { %1167 = vmatprep.subr.bf16.mxu0 %v3693_v1  ;;  %1208 = vmatprep.subr.bf16.mxu1 %v3702_v15 }
  0xe0   :  { %1168 = vmatpush1.bf16.msra.mxu0 %v3699_v11  ;;  %1209 = vmatpush1.bf16.msra.mxu1 %v3708_v27 }
  0xe1   :  { %1169 = vmatprep.subr.bf16.mxu0 %v3705_v16  ;;  %1210 = vmatprep.subr.bf16.mxu1 %v3714_v30 }
  0xe4   :  { %1170 = vmatpush1.bf16.msra.mxu0 %v3711_v29  ;;  %1211 = vmatpush1.bf16.msra.mxu1 %v3720_v46 }
  0xe5   :  { %1171 = vmatprep.subr.bf16.mxu0 %v3717_v35  ;;  %1212 = vmatprep.subr.bf16.mxu1 %v3726_v52 }
  0xe8   :  { %1172 = vmatpush1.bf16.msra.mxu0 %v3723_v49  ;;  %1213 = vmatpush1.bf16.msra.mxu1 %v3732_v60  ;;  %v5470_v60 = vld [vmem:[#allocation65_spill] sm:$0xff] }
  0xe9   :  { %1173 = vmatprep.subr.bf16.mxu0 %v5462_v3  ;;  %1214 = vmatprep.subr.bf16.mxu1 %v5463_v6  ;;  %v5471_v3 = vld [vmem:[#allocation68_spill] sm:$0xff]  ;;  %v5472_v6 = vld [vmem:[#allocation67_spill] sm:$0xff] }
  0xec   :  { %1174 = vmatpush1.bf16.msra.mxu0 %v5464_v21  ;;  %1215 = vmatpush1.bf16.msra.mxu1 %v5465_v59  ;;  %v5473_v21 = vld [vmem:[#allocation71_spill] sm:$0xff]  ;;  %v5474_v59 = vld [vmem:[#allocation70_spill] sm:$0xff] }
  0xed   :  { %1175 = vmatprep.subr.bf16.mxu0 %v5466_v20  ;;  %1216 = vmatprep.subr.bf16.mxu1 %v3750_v44  ;;  %v5475_v20 = vld [vmem:[#allocation73_spill] sm:$0xff]  ;;  %v5476_v44 = vld [vmem:[#allocation72_spill] sm:$0xff] }
  0xf0   :  { %1176 = vmatpush1.bf16.msra.mxu0 %v3747_v37  ;;  %1217 = vmatpush1.bf16.msra.mxu1 %v5467_v58  ;;  %v5477_v37 = vld [vmem:[#allocation75_spill] sm:$0xff]  ;;  %v5478_v58 = vld [vmem:[#allocation74_spill] sm:$0xff] }
  0xf1   :  { %1177 = vmatprep.subr.bf16.mxu0 %v5468_v36  ;;  %1218 = vmatprep.subr.bf16.mxu1 %v5469_v45  ;;  %v5479_v36 = vld [vmem:[#allocation77_spill] sm:$0xff]  ;;  %v5480_v45 = vld [vmem:[#allocation76_spill] sm:$0xff] }
  0xf4   :  { %1178 = vmatpush1.bf16.msra.mxu0 %v5470_v60  ;;  %1219 = vmatpush1.bf16.msra.mxu1 %v5471_v3  ;;  %v5481_v60 = vld [vmem:[#allocation79_spill] sm:$0xff]  ;;  %v5482_v3 = vld [vmem:[#allocation78_spill] sm:$0xff] }
  0xf5   :  { %1179 = vmatprep.subr.bf16.mxu0 %v5472_v6  ;;  %1220 = vmatprep.subr.bf16.mxu1 %v5473_v21  ;;  %v5483_v6 = vld [vmem:[#allocation81_spill] sm:$0xff]  ;;  %v5484_v21 = vld [vmem:[#allocation80_spill] sm:$0xff] }
  0xf8   :  { %1180 = vmatpush1.bf16.msra.mxu0 %v5474_v59  ;;  %1221 = vmatpush1.bf16.msra.mxu1 %v5475_v20  ;;  %v5485_v59 = vld [vmem:[#allocation82_spill] sm:$0xff]  ;;  %v1109_v20 = vld [vmem:[#allocation6 + $0x10] sm:$0xff] }
  0xf9   :  { %1181 = vmatprep.subr.bf16.mxu0 %v5476_v44  ;;  %1222 = vmatprep.subr.bf16.mxu1 %v5477_v37  ;;  %v1111_v44 = vunpack.c.l.bf16 %v1109_v20  ;;  %v1112_v49 = vunpack.c.h.bf16 %v1109_v20 }
  0xfc   :  { %1182 = vmatpush1.bf16.msra.mxu0 %v5478_v58  ;;  %1223 = vmatpush1.bf16.msra.mxu1 %v5479_v36  ;;  %v1110_v58 = vld [vmem:[#allocation6 + $0x18] sm:$0xff] }
  0xfd   :  { %1183 = vmatprep.subr.bf16.mxu0 %v5480_v45  ;;  %1224 = vmatprep.subr.bf16.mxu1 %v5481_v60  ;;  %v1114_v16 = vunpack.c.h.bf16 %v1110_v58 }
 0x100   :  { %1184 = vmatpush1.bf16.msra.mxu0 %v5482_v3  ;;  %1225 = vmatpush1.bf16.msra.mxu1 %v5483_v6 }
 0x101   :  { %1235 = vmatprep.subr.bf16.mxu0 %v5484_v21  ;;  %1276 = vmatprep.subr.bf16.mxu1 %v5485_v59  ;;  %v1113_v21 = vunpack.c.l.bf16 %v1110_v58  ;;  %v202_v58 = vld [vmem:[%s5059_s2] sm:$0xf] }
 0x156   :  { %v948_v37 = vpop.f32.mrb[0].mxu0  ;;  %v989_v52 = vpop.f32.mrb[0].mxu1 }
 0x157   :  { %v1115_v35 = vadd.f32 %v1111_v44, %v948_v37  ;;  %v950_v36 = vpop.f32.mrb[1].mxu0  ;;  %v991_v46 = vpop.f32.mrb[1].mxu1  ;;  %v1117_v20 = vadd.f32 %v1113_v21, %v989_v52 }
 0x158   :  { %v1116_v45 = vadd.f32 %v1112_v49, %v950_v36  ;;  %v952_v29 = vpop.f32.mrb[2].mxu0  ;;  %v993_v60 = vpop.f32.mrb[2].mxu1  ;;  %v1118_v59 = vadd.f32 %v1114_v16, %v991_v46 }
 0x159   :  { %v3055_v30 = vmul.f32 -1.442695, %v1115_v35  ;;  %v953_v3 = vpop.f32.mrb[3].mxu0  ;;  %v994_v6 = vpop.f32.mrb[3].mxu1 }
 0x15a   :  { %v3056_v27 = vmul.f32 -1.442695, %v1116_v45  ;;  %v3057_v11 = vmul.f32 -1.442695, %v1118_v59 }
 0x15b   :  { %3202 = vpow2.f32 %v3055_v30  ;;  %v5486_v30 = vld [vmem:[#allocation69_spill] sm:$0xff] }
 0x15c   :  { %3204 = vpow2.f32 %v3056_v27 }
 0x15d   :  { %3206 = vpow2.f32 %v3057_v11 }
 0x15e   :  { %3208 = vtanh.f32 %v1117_v20 }
 0x165   :  { %v3203_v15 = vpop.eup %3202 }
 0x166   :  { %v3205_v1 = vpop.eup %3204  ;;  %v1122_v37 = vadd.f32 1.0, %v3203_v15 }
 0x167   :  { %v1128_v44 = vadd.f32 1.0, %v3205_v1  ;;  %v3207_v29 = vpop.eup %3206  ;;  %v204_v1 = vlaneseq }
 0x168   :  { %3210 = vrcp.f32 %v1122_v37  ;;  %v3209_v35 = vpop.eup %3208  ;;  %v1135_v60 = vadd.f32 1.0, %v3207_v29 }
 0x169   :  { %3212 = vrcp.f32 %v1128_v44  ;;  %v205_v21 = vshrl.u32 %v204_v1, 7 }
 0x16a   :  { %3214 = vrcp.f32 %v1135_v60 }
 0x16b   :  { %v206_v59 = vsub.s32 0, %v205_v21  ;;  %v210_v36 = vsub.s32 1, %v205_v21  ;;  %v218_v37 = vsub.s32 3, %v205_v21  ;;  %v214_v1 = vsub.s32 2, %v205_v21 }
 0x16d   :  { %v4081_v45 = vrot.slane %v202_v58, %v206_v59  ;;  %v4083_v20 = vrot.slane %v202_v58, %v210_v36  ;;  %v4090_v36 = vrot.slane %v202_v58, %v214_v1 }
 0x16f   :  { %5488 = vst [vmem:[#allocation144_spill] sm:$0xff] %v4081_v45 }
 0x172   :  { %v3211_v49 = vpop.eup %3210 }
 0x173   :  { %v3213_v3 = vpop.eup %3212  ;;  %v1139_v6 = vmul.f32 %v3211_v49, %v3209_v35 }
 0x174   :  { %v1138_v27 = vmul.f32 %v3213_v3, %v5486_v30  ;;  %v3215_v11 = vpop.eup %3214 }
 0x176   :  { %v4075_v16 = vadd.f32 %v1139_v6, %v1138_v27 }
 0x178   :  { %5487 = vst [vmem:[#allocation69_spill] sm:$0xff] %v4075_v16  ;;  %3216 = vtanh.f32 %v4075_v16 }
 0x182   :  { %v3217_v46 = vpop.eup %3216 }
 0x183   :  { %v1142_v15 = vmul.f32 %v3217_v46, %v3215_v11  ;;  %v4087_v46 = vrot.slane %v202_v58, %v218_v37 }
 0x185   :  { %v1143_v52 = vpack.c.bf16 %v1142_v15, %v1142_v15 }
 0x187   :  { %1144 = vst [vmem:[#allocation2] sm:$0xf] %v1143_v52 }
 0x196   :  { %v1030_v44 = vpop.f32.mrb[4].mxu0  ;;  %v1071_v29 = vpop.f32.mrb[4].mxu1 }
 0x197   :  { %v1078_v35 = vadd.f32 %v1030_v44, %v4081_v45  ;;  %v1032_v49 = vpop.f32.mrb[5].mxu0  ;;  %v1073_v60 = vpop.f32.mrb[5].mxu1  ;;  %v1080_v45 = vadd.f32 %v1071_v29, %v4090_v36 }
 0x198   :  { %v1079_v3 = vadd.f32 %v1032_v49, %v4083_v20  ;;  %v1034_v6 = vpop.f32.mrb[6].mxu0  ;;  %v1075_v30 = vpop.f32.mrb[6].mxu1  ;;  %v1081_v59 = vadd.f32 %v1073_v60, %v4087_v46 }
 0x199   :  { %v3052_v27 = vmul.f32 -1.442695, %v1078_v35  ;;  %v1035_v11 = vpop.f32.mrb[7].mxu0  ;;  %v1076_v15 = vpop.f32.mrb[7].mxu1 }
 0x19a   :  { %v3053_v52 = vmul.f32 -1.442695, %v1079_v3  ;;  %v3054_v44 = vmul.f32 -1.442695, %v1081_v59 }
 0x19b   :  { %3218 = vpow2.f32 %v3052_v27 }
 0x19c   :  { %3220 = vpow2.f32 %v3053_v52 }
 0x19d   :  { %3222 = vpow2.f32 %v3054_v44  ;;  %v5489_v44 = vld [vmem:[#allocation83_spill] sm:$0xff] }
 0x19e   :  { %3224 = vtanh.f32 %v1080_v45 }
 0x1a5   :  { %v3219_v16 = vpop.eup %3218 }
 0x1a6   :  { %v3221_v49 = vpop.eup %3220  ;;  %v1085_v6 = vadd.f32 1.0, %v3219_v16 }
 0x1a7   :  { %v1091_v35 = vadd.f32 1.0, %v3221_v49  ;;  %v3223_v37 = vpop.eup %3222  ;;  %v5490_v49 = vld [vmem:[#allocation84_spill] sm:$0xff] }
 0x1a8   :  { %3226 = vrcp.f32 %v1085_v6  ;;  %v3225_v3 = vpop.eup %3224  ;;  %v1098_v30 = vadd.f32 1.0, %v3223_v37  ;;  %v5491_v6 = vld [vmem:[#allocation85_spill] sm:$0xff]  ;;  %v5493_v37 = vld [vmem:[#allocation87_spill] sm:$0xff] }
 0x1a9   :  { %3228 = vrcp.f32 %v1091_v35  ;;  %v5492_v35 = vld [vmem:[#allocation86_spill] sm:$0xff] }
 0x1aa   :  { %3230 = vrcp.f32 %v1098_v30  ;;  %v5496_v30 = vld [vmem:[#allocation90_spill] sm:$0xff] }
 0x1b2   :  { %v3227_v21 = vpop.eup %3226 }
 0x1b3   :  { %v3229_v27 = vpop.eup %3228  ;;  %v1102_v11 = vmul.f32 %v3227_v21, %v3225_v3  ;;  %v5494_v3 = vld [vmem:[#allocation88_spill] sm:$0xff]  ;;  %v5495_v21 = vld [vmem:[#allocation89_spill] sm:$0xff] }
 0x1b4   :  { %v1101_v60 = vmul.f32 0.0, %v3229_v27  ;;  %v3231_v29 = vpop.eup %3230  ;;  %v5497_v27 = vld [vmem:[#allocation91_spill] sm:$0xff] }
 0x1b6   :  { %v4093_v58 = vadd.f32 %v1102_v11, %v1101_v60  ;;  %v5498_v11 = vld [vmem:[#allocation92_spill] sm:$0xff]  ;;  %v5499_v60 = vld [vmem:[#allocation93_spill] sm:$0xff] }
 0x1b8   :  { %3232 = vtanh.f32 %v4093_v58 }
 0x1c2   :  { %v3233_v15 = vpop.eup %3232 }
 0x1c3   :  { %v1105_v52 = vmul.f32 %v3233_v15, %v3231_v29  ;;  %v5500_v29 = vld [vmem:[#allocation94_spill] sm:$0xff]  ;;  %v5501_v15 = vld [vmem:[#allocation95_spill] sm:$0xff] }
 0x1c5   :  { %v1106_v16 = vpack.c.bf16 %v1105_v52, %v1105_v52  ;;  %v5502_v52 = vld [vmem:[#allocation96_spill] sm:$0xff] }
 0x1c7   :  { %1107 = vst [vmem:[#allocation2 + $0x4] sm:$0xf] %v1106_v16  ;;  %v5503_v16 = vld [vmem:[#allocation97_spill] sm:$0xff] }
 0x1ce   :  { %v1145_v45 = vld [vmem:[#allocation2] sm:$0xff] }
 0x1cf   :  { %v3059_v1 = vcombine.high %v1145_v45, %v1145_v45  ;;  %v4096_v59 = vcombine.low %v1145_v45, %v1145_v45  ;;  %v5504_v45 = vld [vmem:[#allocation98_spill] sm:$0xff] }
 0x1d1   :  { %1185 = vmatprep.mubr.bf16.mxu0 %v3059_v1  ;;  %1226 = vmatprep.mubr.bf16.mxu1 %v3059_v1 }
 0x1d2   :  { %1186 = vmatmul.mubr.bf16.vlgmr.msra.gmra.mrb[8].mxu0 %v4096_v59  ;;  %1227 = vmatmul.mubr.bf16.vlgmr.msra.gmra.mrb[8].mxu1 %v4096_v59 }
 0x1d3   :  { %1236 = vmatpush1.bf16.msra.mxu0 %v3818_v9  ;;  %1277 = vmatpush1.bf16.msra.mxu1 %v5489_v44 }
 0x1d4   :  { %1267 = vmatprep.mubr.bf16.mxu0 %v3059_v1  ;;  %1308 = vmatprep.mubr.bf16.mxu1 %v3059_v1  ;;  %v5505_v1 = vld [vmem:[#allocation99_spill] sm:$0xff] }
 0x1d5   :  { %1237 = vmatprep.subr.bf16.mxu0 %v5490_v49  ;;  %1278 = vmatprep.subr.bf16.mxu1 %v5491_v6 }
 0x1d7   :  { %1238 = vmatpush1.bf16.msra.mxu0 %v5492_v35  ;;  %1279 = vmatpush1.bf16.msra.mxu1 %v5493_v37 }
 0x1d8   :  { %1239 = vmatprep.subr.bf16.mxu0 %v5494_v3  ;;  %1280 = vmatprep.subr.bf16.mxu1 %v5495_v21  ;;  %v5506_v21 = vld [vmem:[#allocation100_spill] sm:$0xff] }
 0x1db   :  { %1240 = vmatpush1.bf16.msra.mxu0 %v5496_v30  ;;  %1281 = vmatpush1.bf16.msra.mxu1 %v5497_v27  ;;  %v5507_v30 = vld [vmem:[#allocation101_spill] sm:$0xff]  ;;  %v5508_v27 = vld [vmem:[#allocation102_spill] sm:$0xff] }
 0x1dc   :  { %1241 = vmatprep.subr.bf16.mxu0 %v5498_v11  ;;  %1282 = vmatprep.subr.bf16.mxu1 %v5499_v60  ;;  %v5509_v11 = vld [vmem:[#allocation103_spill] sm:$0xff]  ;;  %v5510_v60 = vld [vmem:[#allocation104_spill] sm:$0xff] }
 0x1df   :  { %1242 = vmatpush1.bf16.msra.mxu0 %v5500_v29  ;;  %1283 = vmatpush1.bf16.msra.mxu1 %v5501_v15  ;;  %v5511_v29 = vld [vmem:[#allocation105_spill] sm:$0xff]  ;;  %v5512_v15 = vld [vmem:[#allocation106_spill] sm:$0xff] }
 0x1e0   :  { %1243 = vmatprep.subr.bf16.mxu0 %v5502_v52  ;;  %1284 = vmatprep.subr.bf16.mxu1 %v5503_v16  ;;  %v5513_v52 = vld [vmem:[#allocation107_spill] sm:$0xff]  ;;  %v5514_v16 = vld [vmem:[#allocation108_spill] sm:$0xff] }
 0x1e3   :  { %1244 = vmatpush1.bf16.msra.mxu0 %v5504_v45  ;;  %1285 = vmatpush1.bf16.msra.mxu1 %v5505_v1  ;;  %v5515_v45 = vld [vmem:[#allocation109_spill] sm:$0xff]  ;;  %v5516_v1 = vld [vmem:[#allocation110_spill] sm:$0xff] }
 0x1e4   :  { %1245 = vmatprep.subr.bf16.mxu0 %v5506_v21  ;;  %1286 = vmatprep.subr.bf16.mxu1 %v5507_v30  ;;  %v5517_v21 = vld [vmem:[#allocation111_spill] sm:$0xff]  ;;  %v5518_v30 = vld [vmem:[#allocation112_spill] sm:$0xff] }
 0x1e7   :  { %1246 = vmatpush1.bf16.msra.mxu0 %v5508_v27  ;;  %1287 = vmatpush1.bf16.msra.mxu1 %v5509_v11  ;;  %v5519_v27 = vld [vmem:[#allocation113_spill] sm:$0xff]  ;;  %v5520_v11 = vld [vmem:[#allocation114_spill] sm:$0xff] }
 0x1e8   :  { %1247 = vmatprep.subr.bf16.mxu0 %v5510_v60  ;;  %1288 = vmatprep.subr.bf16.mxu1 %v5511_v29  ;;  %v5521_v60 = vld [vmem:[#allocation115_spill] sm:$0xff]  ;;  %v5522_v29 = vld [vmem:[#allocation116_spill] sm:$0xff] }
 0x1eb   :  { %1248 = vmatpush1.bf16.msra.mxu0 %v5512_v15  ;;  %1289 = vmatpush1.bf16.msra.mxu1 %v5513_v52  ;;  %v5523_v15 = vld [vmem:[#allocation117_spill] sm:$0xff]  ;;  %v5524_v52 = vld [vmem:[#allocation118_spill] sm:$0xff] }
 0x1ec   :  { %1249 = vmatprep.subr.bf16.mxu0 %v5514_v16  ;;  %1290 = vmatprep.subr.bf16.mxu1 %v5515_v45  ;;  %v5525_v16 = vld [vmem:[#allocation119_spill] sm:$0xff]  ;;  %v5526_v45 = vld [vmem:[#allocation120_spill] sm:$0xff] }
 0x1ef   :  { %1250 = vmatpush1.bf16.msra.mxu0 %v5516_v1  ;;  %1291 = vmatpush1.bf16.msra.mxu1 %v5517_v21  ;;  %v5527_v1 = vld [vmem:[#allocation121_spill] sm:$0xff]  ;;  %v5528_v21 = vld [vmem:[#allocation122_spill] sm:$0xff] }
 0x1f0   :  { %1251 = vmatprep.subr.bf16.mxu0 %v5518_v30  ;;  %1292 = vmatprep.subr.bf16.mxu1 %v5519_v27  ;;  %v5529_v30 = vld [vmem:[#allocation123_spill] sm:$0xff]  ;;  %v5530_v27 = vld [vmem:[#allocation124_spill] sm:$0xff] }
 0x1f3   :  { %1252 = vmatpush1.bf16.msra.mxu0 %v5520_v11  ;;  %1293 = vmatpush1.bf16.msra.mxu1 %v5521_v60  ;;  %v5531_v11 = vld [vmem:[#allocation125_spill] sm:$0xff]  ;;  %v5532_v60 = vld [vmem:[#allocation126_spill] sm:$0xff] }
 0x1f4   :  { %1253 = vmatprep.subr.bf16.mxu0 %v5522_v29  ;;  %1294 = vmatprep.subr.bf16.mxu1 %v5523_v15  ;;  %v5533_v29 = vld [vmem:[#allocation127_spill] sm:$0xff]  ;;  %v5534_v15 = vld [vmem:[#allocation128_spill] sm:$0xff] }
 0x1f7   :  { %1254 = vmatpush1.bf16.msra.mxu0 %v5524_v52  ;;  %1295 = vmatpush1.bf16.msra.mxu1 %v5525_v16  ;;  %v5535_v52 = vld [vmem:[#allocation129_spill] sm:$0xff] }
 0x1f8   :  { %1255 = vmatprep.subr.bf16.mxu0 %v5526_v45  ;;  %1296 = vmatprep.subr.bf16.mxu1 %v5527_v1 }
 0x1fb   :  { %1256 = vmatpush1.bf16.msra.mxu0 %v5528_v21  ;;  %1297 = vmatpush1.bf16.msra.mxu1 %v5529_v30  ;;  %v5536_v21 = vld [vmem:[#allocation133_spill] sm:$0xff] }
 0x1fc   :  { %1257 = vmatprep.subr.bf16.mxu0 %v5530_v27  ;;  %1298 = vmatprep.subr.bf16.mxu1 %v5531_v11 }
 0x1ff   :  { %1258 = vmatpush1.bf16.msra.mxu0 %v5532_v60  ;;  %1299 = vmatpush1.bf16.msra.mxu1 %v5533_v29 }
 0x200   :  { %1259 = vmatprep.subr.bf16.mxu0 %v5534_v15  ;;  %1300 = vmatprep.subr.bf16.mxu1 %v5535_v52 }
 0x203   :  { %1260 = vmatpush1.bf16.msra.mxu0 %v3961_v61  ;;  %1301 = vmatpush1.bf16.msra.mxu1 %v3964_v55 }
 0x204   :  { %1261 = vmatprep.subr.bf16.mxu0 %v3967_v38  ;;  %1302 = vmatprep.subr.bf16.mxu1 %v5536_v21 }
 0x207   :  { %1262 = vmatpush1.bf16.msra.mxu0 %v3973_v57  ;;  %1303 = vmatpush1.bf16.msra.mxu1 %v3976_v28 }
 0x208   :  { %1263 = vmatprep.subr.bf16.mxu0 %v3979_v22  ;;  %1304 = vmatprep.subr.bf16.mxu1 %v3982_v19 }
 0x20b   :  { %1264 = vmatpush1.bf16.msra.mxu0 %v3985_v48  ;;  %1305 = vmatpush1.bf16.msra.mxu1 %v3988_v56 }
 0x20c   :  { %1265 = vmatprep.subr.bf16.mxu0 %v3991_v2  ;;  %1306 = vmatprep.subr.bf16.mxu1 %v3994_v43 }
 0x20f   :  { %1266 = vmatpush1.bf16.msra.mxu0 %v3997_v53  ;;  %1307 = vmatpush1.bf16.msra.mxu1 %v4000_v8 }
 0x210   :  { %1392 = vmatprep.subr.bf16.mxu0 %v3615_v4  ;;  %1433 = vmatprep.subr.bf16.mxu1 %v3625_v13 }
 0x212   :  { %1268 = vmatmul.mubr.bf16.vlgmr.msra.gmra.mrb[12].mxu0 %v4096_v59  ;;  %1309 = vmatmul.mubr.bf16.vlgmr.msra.gmra.mrb[12].mxu1 %v4096_v59  ;;  %v5537_v59 = vld [vmem:[#allocation43_spill] sm:$0xff] }
 0x213   :  { %1393 = vmatpush1.bf16.msra.mxu0 %v3617_v5  ;;  %1434 = vmatpush1.bf16.msra.mxu1 %v3627_v14 }
 0x214   :  { %1394 = vmatprep.subr.bf16.mxu0 %v3619_v7  ;;  %1435 = vmatprep.subr.bf16.mxu1 %v3632_v18 }
 0x217   :  { %1395 = vmatpush1.bf16.msra.mxu0 %v3623_v12  ;;  %1436 = vmatpush1.bf16.msra.mxu1 %v3636_v23 }
 0x218   :  { %1396 = vmatprep.subr.bf16.mxu0 %v3630_v17  ;;  %1437 = vmatprep.subr.bf16.mxu1 %v3642_v25 }
 0x21b   :  { %1397 = vmatpush1.bf16.msra.mxu0 %v3639_v24  ;;  %1438 = vmatpush1.bf16.msra.mxu1 %v3648_v31 }
 0x21c   :  { %1398 = vmatprep.subr.bf16.mxu0 %v3645_v26  ;;  %1439 = vmatprep.subr.bf16.mxu1 %v3654_v33 }
 0x21f   :  { %1399 = vmatpush1.bf16.msra.mxu0 %v3651_v32  ;;  %1440 = vmatpush1.bf16.msra.mxu1 %v3660_v39  ;;  %v1349_v39 = vld [vmem:[#allocation6 + $0x28] sm:$0xff] }
 0x220   :  { %1400 = vmatprep.subr.bf16.mxu0 %v3657_v34  ;;  %1441 = vmatprep.subr.bf16.mxu1 %v3666_v41  ;;  %v1353_v24 = vunpack.c.h.bf16 %v1349_v39 }
 0x223   :  { %1401 = vmatpush1.bf16.msra.mxu0 %v3663_v40  ;;  %1442 = vmatpush1.bf16.msra.mxu1 %v3672_v47  ;;  %v5538_v40 = vld [vmem:[#allocation46_spill] sm:$0xff]  ;;  %v5539_v47 = vld [vmem:[#allocation45_spill] sm:$0xff] }
 0x224   :  { %1402 = vmatprep.subr.bf16.mxu0 %v3669_v42  ;;  %1443 = vmatprep.subr.bf16.mxu1 %v3678_v51  ;;  %v5540_v42 = vld [vmem:[#allocation48_spill] sm:$0xff]  ;;  %v5541_v51 = vld [vmem:[#allocation47_spill] sm:$0xff] }
 0x227   :  { %1403 = vmatpush1.bf16.msra.mxu0 %v3675_v50  ;;  %1444 = vmatpush1.bf16.msra.mxu1 %v3684_v62  ;;  %v5542_v50 = vld [vmem:[#allocation50_spill] sm:$0xff]  ;;  %v5543_v62 = vld [vmem:[#allocation49_spill] sm:$0xff] }
 0x228   :  { %1404 = vmatprep.subr.bf16.mxu0 %v3681_v54  ;;  %1445 = vmatprep.subr.bf16.mxu1 %v3690_v0  ;;  %v5544_v54 = vld [vmem:[#allocation52_spill] sm:$0xff]  ;;  %v5545_v0 = vld [vmem:[#allocation51_spill] sm:$0xff] }
 0x22b   :  { %1405 = vmatpush1.bf16.msra.mxu0 %v3687_v63  ;;  %1446 = vmatpush1.bf16.msra.mxu1 %v3696_v10  ;;  %v5546_v63 = vld [vmem:[#allocation54_spill] sm:$0xff]  ;;  %v5547_v10 = vld [vmem:[#allocation53_spill] sm:$0xff] }
 0x22c   :  { %1406 = vmatprep.subr.bf16.mxu0 %v5537_v59  ;;  %1447 = vmatprep.subr.bf16.mxu1 %v5538_v40  ;;  %v5548_v59 = vld [vmem:[#allocation56_spill] sm:$0xff]  ;;  %v5549_v40 = vld [vmem:[#allocation55_spill] sm:$0xff] }
 0x22f   :  { %1407 = vmatpush1.bf16.msra.mxu0 %v5539_v47  ;;  %1448 = vmatpush1.bf16.msra.mxu1 %v5540_v42  ;;  %v5550_v47 = vld [vmem:[#allocation58_spill] sm:$0xff]  ;;  %v5551_v42 = vld [vmem:[#allocation57_spill] sm:$0xff] }
 0x230   :  { %1408 = vmatprep.subr.bf16.mxu0 %v5541_v51  ;;  %1449 = vmatprep.subr.bf16.mxu1 %v5542_v50  ;;  %v5552_v51 = vld [vmem:[#allocation60_spill] sm:$0xff]  ;;  %v5553_v50 = vld [vmem:[#allocation59_spill] sm:$0xff] }
 0x233   :  { %1409 = vmatpush1.bf16.msra.mxu0 %v5543_v62  ;;  %1450 = vmatpush1.bf16.msra.mxu1 %v5544_v54  ;;  %v5554_v62 = vld [vmem:[#allocation62_spill] sm:$0xff]  ;;  %v5555_v54 = vld [vmem:[#allocation61_spill] sm:$0xff] }
 0x234   :  { %1410 = vmatprep.subr.bf16.mxu0 %v5545_v0  ;;  %1451 = vmatprep.subr.bf16.mxu1 %v5546_v63  ;;  %v5556_v0 = vld [vmem:[#allocation64_spill] sm:$0xff]  ;;  %v5557_v63 = vld [vmem:[#allocation63_spill] sm:$0xff] }
 0x237   :  { %1411 = vmatpush1.bf16.msra.mxu0 %v5547_v10  ;;  %1452 = vmatpush1.bf16.msra.mxu1 %v5548_v59  ;;  %v5558_v10 = vld [vmem:[#allocation66_spill] sm:$0xff]  ;;  %v5559_v59 = vld [vmem:[#allocation65_spill] sm:$0xff] }
 0x238   :  { %1412 = vmatprep.subr.bf16.mxu0 %v5549_v40  ;;  %1453 = vmatprep.subr.bf16.mxu1 %v5550_v47  ;;  %v5560_v40 = vld [vmem:[#allocation68_spill] sm:$0xff]  ;;  %v5561_v47 = vld [vmem:[#allocation67_spill] sm:$0xff] }
 0x23b   :  { %1413 = vmatpush1.bf16.msra.mxu0 %v5551_v42  ;;  %1454 = vmatpush1.bf16.msra.mxu1 %v5552_v51  ;;  %v5562_v42 = vld [vmem:[#allocation71_spill] sm:$0xff]  ;;  %v5563_v51 = vld [vmem:[#allocation70_spill] sm:$0xff] }
 0x23c   :  { %1414 = vmatprep.subr.bf16.mxu0 %v5553_v50  ;;  %1455 = vmatprep.subr.bf16.mxu1 %v5554_v62  ;;  %v5564_v50 = vld [vmem:[#allocation73_spill] sm:$0xff]  ;;  %v5565_v62 = vld [vmem:[#allocation72_spill] sm:$0xff] }
 0x23f   :  { %1415 = vmatpush1.bf16.msra.mxu0 %v5555_v54  ;;  %1456 = vmatpush1.bf16.msra.mxu1 %v5556_v0  ;;  %v5566_v54 = vld [vmem:[#allocation75_spill] sm:$0xff]  ;;  %v5567_v0 = vld [vmem:[#allocation74_spill] sm:$0xff] }
 0x240   :  { %1416 = vmatprep.subr.bf16.mxu0 %v5557_v63  ;;  %1457 = vmatprep.subr.bf16.mxu1 %v5558_v10  ;;  %v5568_v63 = vld [vmem:[#allocation77_spill] sm:$0xff]  ;;  %v5569_v10 = vld [vmem:[#allocation76_spill] sm:$0xff] }
 0x243   :  { %1417 = vmatpush1.bf16.msra.mxu0 %v5559_v59  ;;  %1458 = vmatpush1.bf16.msra.mxu1 %v5560_v40  ;;  %v5570_v59 = vld [vmem:[#allocation79_spill] sm:$0xff]  ;;  %v5571_v40 = vld [vmem:[#allocation78_spill] sm:$0xff] }
 0x244   :  { %1418 = vmatprep.subr.bf16.mxu0 %v5561_v47  ;;  %1459 = vmatprep.subr.bf16.mxu1 %v5562_v42  ;;  %v5572_v47 = vld [vmem:[#allocation81_spill] sm:$0xff]  ;;  %v5573_v42 = vld [vmem:[#allocation80_spill] sm:$0xff] }
 0x247   :  { %1419 = vmatpush1.bf16.msra.mxu0 %v5563_v51  ;;  %1460 = vmatpush1.bf16.msra.mxu1 %v5564_v50  ;;  %v5574_v51 = vld [vmem:[#allocation82_spill] sm:$0xff]  ;;  %v1348_v50 = vld [vmem:[#allocation6 + $0x20] sm:$0xff] }
 0x248   :  { %1420 = vmatprep.subr.bf16.mxu0 %v5565_v62  ;;  %1461 = vmatprep.subr.bf16.mxu1 %v5566_v54  ;;  %v1350_v62 = vunpack.c.l.bf16 %v1348_v50  ;;  %v1351_v41 = vunpack.c.h.bf16 %v1348_v50 }
 0x24b   :  { %1421 = vmatpush1.bf16.msra.mxu0 %v5567_v0  ;;  %1462 = vmatpush1.bf16.msra.mxu1 %v5568_v63 }
 0x24c   :  { %1422 = vmatprep.subr.bf16.mxu0 %v5569_v10  ;;  %1463 = vmatprep.subr.bf16.mxu1 %v5570_v59 }
 0x24f   :  { %1423 = vmatpush1.bf16.msra.mxu0 %v5571_v40  ;;  %1464 = vmatpush1.bf16.msra.mxu1 %v5572_v47 }
 0x250   :  { %1474 = vmatprep.subr.bf16.mxu0 %v5573_v42  ;;  %1515 = vmatprep.subr.bf16.mxu1 %v5574_v51  ;;  %v1352_v42 = vunpack.c.l.bf16 %v1349_v39 }
 0x2a5   :  { %v1187_v54 = vpop.f32.mrb[8].mxu0  ;;  %v1228_v34 = vpop.f32.mrb[8].mxu1 }
 0x2a6   :  { %v1354_v0 = vadd.f32 %v1350_v62, %v1187_v54  ;;  %v1189_v63 = vpop.f32.mrb[9].mxu0  ;;  %v1230_v32 = vpop.f32.mrb[9].mxu1  ;;  %v1356_v50 = vadd.f32 %v1352_v42, %v1228_v34  ;;  %v5576_v42 = vld [vmem:[#allocation144_spill] sm:$0xff] }
 0x2a7   :  { %v1355_v10 = vadd.f32 %v1351_v41, %v1189_v63  ;;  %v1191_v33 = vpop.f32.mrb[10].mxu0  ;;  %v1232_v59 = vpop.f32.mrb[10].mxu1  ;;  %v1357_v51 = vadd.f32 %v1353_v24, %v1230_v32 }
 0x2a8   :  { %v3063_v26 = vmul.f32 -1.442695, %v1354_v0  ;;  %v1192_v40 = vpop.f32.mrb[11].mxu0  ;;  %v1233_v31 = vpop.f32.mrb[11].mxu1 }
 0x2a9   :  { %v3064_v47 = vmul.f32 -1.442695, %v1355_v10  ;;  %v3065_v25 = vmul.f32 -1.442695, %v1357_v51 }
 0x2aa   :  { %3234 = vpow2.f32 %v3063_v26  ;;  %v5575_v26 = vld [vmem:[#allocation69_spill] sm:$0xff] }
 0x2ab   :  { %3236 = vpow2.f32 %v3064_v47 }
 0x2ac   :  { %3238 = vpow2.f32 %v3065_v25 }
 0x2ad   :  { %3240 = vtanh.f32 %v1356_v50 }
 0x2b4   :  { %v3235_v17 = vpop.eup %3234 }
 0x2b5   :  { %v3237_v23 = vpop.eup %3236  ;;  %v1361_v54 = vadd.f32 1.0, %v3235_v17 }
 0x2b6   :  { %v1367_v62 = vadd.f32 1.0, %v3237_v23  ;;  %v3239_v33 = vpop.eup %3238 }
 0x2b7   :  { %3242 = vrcp.f32 %v1361_v54  ;;  %v3241_v41 = vpop.eup %3240  ;;  %v1374_v0 = vadd.f32 1.0, %v3239_v33 }
 0x2b8   :  { %3244 = vrcp.f32 %v1367_v62 }
 0x2b9   :  { %3246 = vrcp.f32 %v1374_v0 }
 0x2c1   :  { %v3243_v40 = vpop.eup %3242 }
 0x2c2   :  { %v3245_v31 = vpop.eup %3244  ;;  %v1378_v63 = vmul.f32 %v3243_v40, %v3241_v41 }
 0x2c3   :  { %v1377_v47 = vmul.f32 %v3245_v31, %v5575_v26  ;;  %v3247_v32 = vpop.eup %3246 }
 0x2c5   :  { %v4231_v24 = vadd.f32 %v1378_v63, %v1377_v47 }
 0x2c7   :  { %3248 = vtanh.f32 %v4231_v24 }
 0x2d1   :  { %v3249_v17 = vpop.eup %3248 }
 0x2d2   :  { %v1381_v25 = vmul.f32 %v3249_v17, %v3247_v32 }
 0x2d4   :  { %v1382_v34 = vpack.c.bf16 %v1381_v25, %v1381_v25 }
 0x2d6   :  { %1383 = vst [vmem:[#allocation2] sm:$0xf] %v1382_v34 }
 0x2e5   :  { %v1269_v23 = vpop.f32.mrb[12].mxu0  ;;  %v1310_v39 = vpop.f32.mrb[12].mxu1 }
 0x2e6   :  { %v1317_v51 = vadd.f32 %v1269_v23, %v5576_v42  ;;  %v1271_v10 = vpop.f32.mrb[13].mxu0  ;;  %v1312_v59 = vpop.f32.mrb[13].mxu1  ;;  %v1319_v26 = vadd.f32 %v1310_v39, %v4090_v36 }
 0x2e7   :  { %v1318_v50 = vadd.f32 %v1271_v10, %v4083_v20  ;;  %v1273_v54 = vpop.f32.mrb[14].mxu0  ;;  %v1314_v62 = vpop.f32.mrb[14].mxu1  ;;  %v1320_v63 = vadd.f32 %v1312_v59, %v4087_v46 }
 0x2e8   :  { %v3060_v33 = vmul.f32 -1.442695, %v1317_v51  ;;  %v1274_v41 = vpop.f32.mrb[15].mxu0  ;;  %v1315_v40 = vpop.f32.mrb[15].mxu1 }
 0x2e9   :  { %v3061_v31 = vmul.f32 -1.442695, %v1318_v50  ;;  %v3062_v0 = vmul.f32 -1.442695, %v1320_v63 }
 0x2ea   :  { %3250 = vpow2.f32 %v3060_v33 }
 0x2eb   :  { %3252 = vpow2.f32 %v3061_v31 }
 0x2ec   :  { %3254 = vpow2.f32 %v3062_v0 }
 0x2ed   :  { %3256 = vtanh.f32 %v1319_v26  ;;  %v5578_v26 = vld [vmem:[#allocation90_spill] sm:$0xff] }
 0x2f4   :  { %v3251_v47 = vpop.eup %3250 }
 0x2f5   :  { %v3253_v32 = vpop.eup %3252  ;;  %v1324_v17 = vadd.f32 1.0, %v3251_v47  ;;  %v5579_v47 = vld [vmem:[#allocation91_spill] sm:$0xff] }
 0x2f6   :  { %v1330_v25 = vadd.f32 1.0, %v3253_v32  ;;  %v3255_v34 = vpop.eup %3254  ;;  %v5580_v32 = vld [vmem:[#allocation92_spill] sm:$0xff] }
 0x2f7   :  { %3258 = vrcp.f32 %v1324_v17  ;;  %v3257_v23 = vpop.eup %3256  ;;  %v1337_v54 = vadd.f32 1.0, %v3255_v34  ;;  %v5581_v17 = vld [vmem:[#allocation93_spill] sm:$0xff]  ;;  %v5583_v34 = vld [vmem:[#allocation95_spill] sm:$0xff] }
 0x2f8   :  { %3260 = vrcp.f32 %v1330_v25  ;;  %v5582_v25 = vld [vmem:[#allocation94_spill] sm:$0xff] }
 0x2f9   :  { %3262 = vrcp.f32 %v1337_v54  ;;  %v5588_v54 = vld [vmem:[#allocation100_spill] sm:$0xff] }
 0x301   :  { %v3259_v51 = vpop.eup %3258 }
 0x302   :  { %v3261_v10 = vpop.eup %3260  ;;  %v1341_v50 = vmul.f32 %v3259_v51, %v3257_v23  ;;  %v5584_v23 = vld [vmem:[#allocation96_spill] sm:$0xff]  ;;  %v5585_v51 = vld [vmem:[#allocation97_spill] sm:$0xff] }
 0x303   :  { %v1340_v62 = vmul.f32 %v3261_v10, %v4093_v58  ;;  %v3263_v39 = vpop.eup %3262  ;;  %v5577_v58 = vld [vmem:[#allocation89_spill] sm:$0xff]  ;;  %v5586_v10 = vld [vmem:[#allocation98_spill] sm:$0xff] }
 0x305   :  { %v4239_v59 = vadd.f32 %v1341_v50, %v1340_v62  ;;  %v5587_v50 = vld [vmem:[#allocation99_spill] sm:$0xff]  ;;  %v5589_v62 = vld [vmem:[#allocation101_spill] sm:$0xff] }
 0x307   :  { %3264 = vtanh.f32 %v4239_v59 }
 0x311   :  { %v3265_v33 = vpop.eup %3264 }
 0x312   :  { %v1344_v41 = vmul.f32 %v3265_v33, %v3263_v39  ;;  %v5590_v39 = vld [vmem:[#allocation102_spill] sm:$0xff]  ;;  %v5591_v33 = vld [vmem:[#allocation103_spill] sm:$0xff] }
 0x314   :  { %v1345_v40 = vpack.c.bf16 %v1344_v41, %v1344_v41  ;;  %v5592_v41 = vld [vmem:[#allocation104_spill] sm:$0xff] }
 0x316   :  { %1346 = vst [vmem:[#allocation2 + $0x4] sm:$0xf] %v1345_v40  ;;  %v5593_v40 = vld [vmem:[#allocation105_spill] sm:$0xff] }
 0x31d   :  { %v1384_v31 = vld [vmem:[#allocation2] sm:$0xff] }
 0x31e   :  { %v3067_v63 = vcombine.high %v1384_v31, %v1384_v31  ;;  %v4242_v0 = vcombine.low %v1384_v31, %v1384_v31  ;;  %v5594_v31 = vld [vmem:[#allocation106_spill] sm:$0xff] }
 0x320   :  { %1424 = vmatprep.mubr.bf16.mxu0 %v3067_v63  ;;  %1465 = vmatprep.mubr.bf16.mxu1 %v3067_v63 }
 0x321   :  { %1425 = vmatmul.mubr.bf16.vlgmr.msra.gmra.mrb[16].mxu0 %v4242_v0  ;;  %1466 = vmatmul.mubr.bf16.vlgmr.msra.gmra.mrb[16].mxu1 %v4242_v0 }
 0x322   :  { %1475 = vmatpush1.bf16.msra.mxu0 %v3818_v9  ;;  %1516 = vmatpush1.bf16.msra.mxu1 %v5489_v44 }
 0x323   :  { %1506 = vmatprep.mubr.bf16.mxu0 %v3067_v63  ;;  %1547 = vmatprep.mubr.bf16.mxu1 %v3067_v63  ;;  %v5595_v63 = vld [vmem:[#allocation107_spill] sm:$0xff] }
 0x324   :  { %1476 = vmatprep.subr.bf16.mxu0 %v5490_v49  ;;  %1517 = vmatprep.subr.bf16.mxu1 %v5491_v6 }
 0x326   :  { %1477 = vmatpush1.bf16.msra.mxu0 %v5492_v35  ;;  %1518 = vmatpush1.bf16.msra.mxu1 %v5493_v37 }
 0x327   :  { %1478 = vmatprep.subr.bf16.mxu0 %v5494_v3  ;;  %1519 = vmatprep.subr.bf16.mxu1 %v5577_v58 }
 0x32a   :  { %1479 = vmatpush1.bf16.msra.mxu0 %v5578_v26  ;;  %1520 = vmatpush1.bf16.msra.mxu1 %v5579_v47 }
 0x32b   :  { %1480 = vmatprep.subr.bf16.mxu0 %v5580_v32  ;;  %1521 = vmatprep.subr.bf16.mxu1 %v5581_v17 }
 0x32e   :  { %1481 = vmatpush1.bf16.msra.mxu0 %v5582_v25  ;;  %1522 = vmatpush1.bf16.msra.mxu1 %v5583_v34 }
 0x32f   :  { %1482 = vmatprep.subr.bf16.mxu0 %v5584_v23  ;;  %1523 = vmatprep.subr.bf16.mxu1 %v5585_v51  ;;  %v5596_v51 = vld [vmem:[#allocation108_spill] sm:$0xff] }
 0x332   :  { %1483 = vmatpush1.bf16.msra.mxu0 %v5586_v10  ;;  %1524 = vmatpush1.bf16.msra.mxu1 %v5587_v50  ;;  %v5597_v10 = vld [vmem:[#allocation109_spill] sm:$0xff]  ;;  %v5598_v50 = vld [vmem:[#allocation110_spill] sm:$0xff] }
 0x333   :  { %1484 = vmatprep.subr.bf16.mxu0 %v5588_v54  ;;  %1525 = vmatprep.subr.bf16.mxu1 %v5589_v62  ;;  %v5599_v54 = vld [vmem:[#allocation111_spill] sm:$0xff]  ;;  %v5600_v62 = vld [vmem:[#allocation112_spill] sm:$0xff] }
 0x336   :  { %1485 = vmatpush1.bf16.msra.mxu0 %v5590_v39  ;;  %1526 = vmatpush1.bf16.msra.mxu1 %v5591_v33  ;;  %v5601_v39 = vld [vmem:[#allocation113_spill] sm:$0xff]  ;;  %v5602_v33 = vld [vmem:[#allocation114_spill] sm:$0xff] }
 0x337   :  { %1486 = vmatprep.subr.bf16.mxu0 %v5592_v41  ;;  %1527 = vmatprep.subr.bf16.mxu1 %v5593_v40  ;;  %v5603_v41 = vld [vmem:[#allocation115_spill] sm:$0xff]  ;;  %v5604_v40 = vld [vmem:[#allocation116_spill] sm:$0xff] }
 0x33a   :  { %1487 = vmatpush1.bf16.msra.mxu0 %v5594_v31  ;;  %1528 = vmatpush1.bf16.msra.mxu1 %v5595_v63  ;;  %v5605_v31 = vld [vmem:[#allocation117_spill] sm:$0xff]  ;;  %v5606_v63 = vld [vmem:[#allocation118_spill] sm:$0xff] }
 0x33b   :  { %1488 = vmatprep.subr.bf16.mxu0 %v5596_v51  ;;  %1529 = vmatprep.subr.bf16.mxu1 %v5597_v10 }
 0x33e   :  { %1489 = vmatpush1.bf16.msra.mxu0 %v5598_v50  ;;  %1530 = vmatpush1.bf16.msra.mxu1 %v5599_v54  ;;  %v5607_v54 = vld [vmem:[#allocation122_spill] sm:$0xff] }
 0x33f   :  { %1490 = vmatprep.subr.bf16.mxu0 %v5600_v62  ;;  %1531 = vmatprep.subr.bf16.mxu1 %v5601_v39 }
 0x342   :  { %1491 = vmatpush1.bf16.msra.mxu0 %v5602_v33  ;;  %1532 = vmatpush1.bf16.msra.mxu1 %v5603_v41 }
 0x343   :  { %1492 = vmatprep.subr.bf16.mxu0 %v5604_v40  ;;  %1533 = vmatprep.subr.bf16.mxu1 %v5605_v31 }
 0x346   :  { %1493 = vmatpush1.bf16.msra.mxu0 %v5606_v63  ;;  %1534 = vmatpush1.bf16.msra.mxu1 %v5525_v16 }
 0x347   :  { %1494 = vmatprep.subr.bf16.mxu0 %v5526_v45  ;;  %1535 = vmatprep.subr.bf16.mxu1 %v5527_v1 }
 0x34a   :  { %1495 = vmatpush1.bf16.msra.mxu0 %v5607_v54  ;;  %1536 = vmatpush1.bf16.msra.mxu1 %v5529_v30 }
 0x34b   :  { %1496 = vmatprep.subr.bf16.mxu0 %v5530_v27  ;;  %1537 = vmatprep.subr.bf16.mxu1 %v5531_v11 }
 0x34e   :  { %1497 = vmatpush1.bf16.msra.mxu0 %v5532_v60  ;;  %1538 = vmatpush1.bf16.msra.mxu1 %v5533_v29 }
 0x34f   :  { %1498 = vmatprep.subr.bf16.mxu0 %v5534_v15  ;;  %1539 = vmatprep.subr.bf16.mxu1 %v5535_v52 }
 0x352   :  { %1499 = vmatpush1.bf16.msra.mxu0 %v3961_v61  ;;  %1540 = vmatpush1.bf16.msra.mxu1 %v3964_v55 }
 0x353   :  { %1500 = vmatprep.subr.bf16.mxu0 %v3967_v38  ;;  %1541 = vmatprep.subr.bf16.mxu1 %v5536_v21 }
 0x356   :  { %1501 = vmatpush1.bf16.msra.mxu0 %v3973_v57  ;;  %1542 = vmatpush1.bf16.msra.mxu1 %v3976_v28 }
 0x357   :  { %1502 = vmatprep.subr.bf16.mxu0 %v3979_v22  ;;  %1543 = vmatprep.subr.bf16.mxu1 %v3982_v19 }
 0x35a   :  { %1503 = vmatpush1.bf16.msra.mxu0 %v3985_v48  ;;  %1544 = vmatpush1.bf16.msra.mxu1 %v3988_v56  ;;  %v1588_v48 = vld [vmem:[#allocation6 + $0x38] sm:$0xff] }
 0x35b   :  { %1504 = vmatprep.subr.bf16.mxu0 %v3991_v2  ;;  %1545 = vmatprep.subr.bf16.mxu1 %v3994_v43  ;;  %v5612_v43 = vld [vmem:[#allocation28_spill] sm:$0xff]  ;;  %v1592_v21 = vunpack.c.h.bf16 %v1588_v48 }
 0x35e   :  { %1505 = vmatpush1.bf16.msra.mxu0 %v3997_v53  ;;  %1546 = vmatpush1.bf16.msra.mxu1 %v4000_v8  ;;  %v5608_v53 = vld [vmem:[#allocation24_spill] sm:$0xff]  ;;  %v5609_v8 = vld [vmem:[#allocation22_spill] sm:$0xff] }
 0x35f   :  { %1631 = vmatprep.subr.bf16.mxu0 %v3615_v4  ;;  %1672 = vmatprep.subr.bf16.mxu1 %v3625_v13  ;;  %v5610_v4 = vld [vmem:[#allocation26_spill] sm:$0xff]  ;;  %v5611_v13 = vld [vmem:[#allocation25_spill] sm:$0xff] }
 0x361   :  { %1507 = vmatmul.mubr.bf16.vlgmr.msra.gmra.mrb[20].mxu0 %v4242_v0  ;;  %1548 = vmatmul.mubr.bf16.vlgmr.msra.gmra.mrb[20].mxu1 %v4242_v0  ;;  %v5613_v0 = vld [vmem:[#allocation27_spill] sm:$0xff] }
 0x362   :  { %1632 = vmatpush1.bf16.msra.mxu0 %v3617_v5  ;;  %1673 = vmatpush1.bf16.msra.mxu1 %v3627_v14  ;;  %v5614_v5 = vld [vmem:[#allocation30_spill] sm:$0xff]  ;;  %v5615_v14 = vld [vmem:[#allocation29_spill] sm:$0xff] }
 0x363   :  { %1633 = vmatprep.subr.bf16.mxu0 %v3619_v7  ;;  %1674 = vmatprep.subr.bf16.mxu1 %v3632_v18  ;;  %v5616_v7 = vld [vmem:[#allocation32_spill] sm:$0xff]  ;;  %v5617_v18 = vld [vmem:[#allocation31_spill] sm:$0xff] }
 0x366   :  { %1634 = vmatpush1.bf16.msra.mxu0 %v3623_v12  ;;  %1675 = vmatpush1.bf16.msra.mxu1 %v5608_v53  ;;  %v5618_v12 = vld [vmem:[#allocation34_spill] sm:$0xff]  ;;  %v5619_v53 = vld [vmem:[#allocation33_spill] sm:$0xff] }
 0x367   :  { %1635 = vmatprep.subr.bf16.mxu0 %v5609_v8  ;;  %1676 = vmatprep.subr.bf16.mxu1 %v5610_v4  ;;  %v5620_v8 = vld [vmem:[#allocation36_spill] sm:$0xff]  ;;  %v5621_v4 = vld [vmem:[#allocation35_spill] sm:$0xff] }
 0x36a   :  { %1636 = vmatpush1.bf16.msra.mxu0 %v5611_v13  ;;  %1677 = vmatpush1.bf16.msra.mxu1 %v5612_v43  ;;  %v5622_v13 = vld [vmem:[#allocation38_spill] sm:$0xff]  ;;  %v5623_v43 = vld [vmem:[#allocation37_spill] sm:$0xff] }
 0x36b   :  { %1637 = vmatprep.subr.bf16.mxu0 %v5613_v0  ;;  %1678 = vmatprep.subr.bf16.mxu1 %v5614_v5  ;;  %v5624_v0 = vld [vmem:[#allocation40_spill] sm:$0xff]  ;;  %v5625_v5 = vld [vmem:[#allocation39_spill] sm:$0xff] }
 0x36e   :  { %1638 = vmatpush1.bf16.msra.mxu0 %v5615_v14  ;;  %1679 = vmatpush1.bf16.msra.mxu1 %v5616_v7  ;;  %v5626_v14 = vld [vmem:[#allocation42_spill] sm:$0xff]  ;;  %v5627_v7 = vld [vmem:[#allocation41_spill] sm:$0xff] }
 0x36f   :  { %1639 = vmatprep.subr.bf16.mxu0 %v5617_v18  ;;  %1680 = vmatprep.subr.bf16.mxu1 %v5618_v12  ;;  %v5628_v18 = vld [vmem:[#allocation44_spill] sm:$0xff]  ;;  %v5629_v12 = vld [vmem:[#allocation43_spill] sm:$0xff] }
 0x372   :  { %1640 = vmatpush1.bf16.msra.mxu0 %v5619_v53  ;;  %1681 = vmatpush1.bf16.msra.mxu1 %v5620_v8  ;;  %v5630_v53 = vld [vmem:[#allocation46_spill] sm:$0xff]  ;;  %v5631_v8 = vld [vmem:[#allocation45_spill] sm:$0xff] }
 0x373   :  { %1641 = vmatprep.subr.bf16.mxu0 %v5621_v4  ;;  %1682 = vmatprep.subr.bf16.mxu1 %v5622_v13  ;;  %v5632_v4 = vld [vmem:[#allocation48_spill] sm:$0xff]  ;;  %v5633_v13 = vld [vmem:[#allocation47_spill] sm:$0xff] }
 0x376   :  { %1642 = vmatpush1.bf16.msra.mxu0 %v5623_v43  ;;  %1683 = vmatpush1.bf16.msra.mxu1 %v5624_v0  ;;  %v5634_v43 = vld [vmem:[#allocation50_spill] sm:$0xff]  ;;  %v5635_v0 = vld [vmem:[#allocation49_spill] sm:$0xff] }
 0x377   :  { %1643 = vmatprep.subr.bf16.mxu0 %v5625_v5  ;;  %1684 = vmatprep.subr.bf16.mxu1 %v5626_v14  ;;  %v5636_v5 = vld [vmem:[#allocation52_spill] sm:$0xff]  ;;  %v5637_v14 = vld [vmem:[#allocation51_spill] sm:$0xff] }
 0x37a   :  { %1644 = vmatpush1.bf16.msra.mxu0 %v5627_v7  ;;  %1685 = vmatpush1.bf16.msra.mxu1 %v5628_v18  ;;  %v5638_v7 = vld [vmem:[#allocation54_spill] sm:$0xff]  ;;  %v5639_v18 = vld [vmem:[#allocation53_spill] sm:$0xff] }
 0x37b   :  { %1645 = vmatprep.subr.bf16.mxu0 %v5629_v12  ;;  %1686 = vmatprep.subr.bf16.mxu1 %v5630_v53  ;;  %v5640_v12 = vld [vmem:[#allocation56_spill] sm:$0xff]  ;;  %v5641_v53 = vld [vmem:[#allocation55_spill] sm:$0xff] }
 0x37e   :  { %1646 = vmatpush1.bf16.msra.mxu0 %v5631_v8  ;;  %1687 = vmatpush1.bf16.msra.mxu1 %v5632_v4  ;;  %v5642_v8 = vld [vmem:[#allocation58_spill] sm:$0xff]  ;;  %v5643_v4 = vld [vmem:[#allocation57_spill] sm:$0xff] }
 0x37f   :  { %1647 = vmatprep.subr.bf16.mxu0 %v5633_v13  ;;  %1688 = vmatprep.subr.bf16.mxu1 %v5634_v43  ;;  %v5644_v13 = vld [vmem:[#allocation60_spill] sm:$0xff]  ;;  %v5645_v43 = vld [vmem:[#allocation59_spill] sm:$0xff] }
 0x382   :  { %1648 = vmatpush1.bf16.msra.mxu0 %v5635_v0  ;;  %1689 = vmatpush1.bf16.msra.mxu1 %v5636_v5  ;;  %v5646_v0 = vld [vmem:[#allocation62_spill] sm:$0xff]  ;;  %v5647_v5 = vld [vmem:[#allocation61_spill] sm:$0xff] }
 0x383   :  { %1649 = vmatprep.subr.bf16.mxu0 %v5637_v14  ;;  %1690 = vmatprep.subr.bf16.mxu1 %v5638_v7  ;;  %v5648_v14 = vld [vmem:[#allocation64_spill] sm:$0xff]  ;;  %v5649_v7 = vld [vmem:[#allocation63_spill] sm:$0xff] }
 0x386   :  { %1650 = vmatpush1.bf16.msra.mxu0 %v5639_v18  ;;  %1691 = vmatpush1.bf16.msra.mxu1 %v5640_v12  ;;  %v5650_v18 = vld [vmem:[#allocation66_spill] sm:$0xff]  ;;  %v5651_v12 = vld [vmem:[#allocation65_spill] sm:$0xff] }
 0x387   :  { %1651 = vmatprep.subr.bf16.mxu0 %v5641_v53  ;;  %1692 = vmatprep.subr.bf16.mxu1 %v5642_v8  ;;  %v5652_v53 = vld [vmem:[#allocation68_spill] sm:$0xff]  ;;  %v5653_v8 = vld [vmem:[#allocation67_spill] sm:$0xff] }
 0x38a   :  { %1652 = vmatpush1.bf16.msra.mxu0 %v5643_v4  ;;  %1693 = vmatpush1.bf16.msra.mxu1 %v5644_v13  ;;  %v5654_v4 = vld [vmem:[#allocation71_spill] sm:$0xff]  ;;  %v5655_v13 = vld [vmem:[#allocation70_spill] sm:$0xff] }
 0x38b   :  { %1653 = vmatprep.subr.bf16.mxu0 %v5645_v43  ;;  %1694 = vmatprep.subr.bf16.mxu1 %v5646_v0  ;;  %v5656_v43 = vld [vmem:[#allocation73_spill] sm:$0xff]  ;;  %v5657_v0 = vld [vmem:[#allocation72_spill] sm:$0xff] }
 0x38e   :  { %1654 = vmatpush1.bf16.msra.mxu0 %v5647_v5  ;;  %1695 = vmatpush1.bf16.msra.mxu1 %v5648_v14  ;;  %v5658_v5 = vld [vmem:[#allocation75_spill] sm:$0xff]  ;;  %v5659_v14 = vld [vmem:[#allocation74_spill] sm:$0xff] }
 0x38f   :  { %1655 = vmatprep.subr.bf16.mxu0 %v5649_v7  ;;  %1696 = vmatprep.subr.bf16.mxu1 %v5650_v18  ;;  %v5660_v7 = vld [vmem:[#allocation77_spill] sm:$0xff]  ;;  %v5661_v18 = vld [vmem:[#allocation76_spill] sm:$0xff] }
 0x392   :  { %1656 = vmatpush1.bf16.msra.mxu0 %v5651_v12  ;;  %1697 = vmatpush1.bf16.msra.mxu1 %v5652_v53  ;;  %v5662_v12 = vld [vmem:[#allocation79_spill] sm:$0xff]  ;;  %v5663_v53 = vld [vmem:[#allocation78_spill] sm:$0xff] }
 0x393   :  { %1657 = vmatprep.subr.bf16.mxu0 %v5653_v8  ;;  %1698 = vmatprep.subr.bf16.mxu1 %v5654_v4  ;;  %v5664_v8 = vld [vmem:[#allocation81_spill] sm:$0xff]  ;;  %v5665_v4 = vld [vmem:[#allocation80_spill] sm:$0xff] }
 0x396   :  { %1658 = vmatpush1.bf16.msra.mxu0 %v5655_v13  ;;  %1699 = vmatpush1.bf16.msra.mxu1 %v5656_v43  ;;  %v5666_v13 = vld [vmem:[#allocation82_spill] sm:$0xff]  ;;  %v1587_v43 = vld [vmem:[#allocation6 + $0x30] sm:$0xff] }
 0x397   :  { %1659 = vmatprep.subr.bf16.mxu0 %v5657_v0  ;;  %1700 = vmatprep.subr.bf16.mxu1 %v5658_v5  ;;  %v1589_v0 = vunpack.c.l.bf16 %v1587_v43  ;;  %v1590_v2 = vunpack.c.h.bf16 %v1587_v43 }
 0x39a   :  { %1660 = vmatpush1.bf16.msra.mxu0 %v5659_v14  ;;  %1701 = vmatpush1.bf16.msra.mxu1 %v5660_v7 }
 0x39b   :  { %1661 = vmatprep.subr.bf16.mxu0 %v5661_v18  ;;  %1702 = vmatprep.subr.bf16.mxu1 %v5662_v12 }
 0x39e   :  { %1662 = vmatpush1.bf16.msra.mxu0 %v5663_v53  ;;  %1703 = vmatpush1.bf16.msra.mxu1 %v5664_v8 }
 0x39f   :  { %1713 = vmatprep.subr.bf16.mxu0 %v5665_v4  ;;  %1754 = vmatprep.subr.bf16.mxu1 %v5666_v13  ;;  %v1591_v4 = vunpack.c.l.bf16 %v1588_v48 }
 0x3f4   :  { %v1426_v5 = vpop.f32.mrb[16].mxu0  ;;  %v1467_v56 = vpop.f32.mrb[16].mxu1 }
 0x3f5   :  { %v1593_v14 = vadd.f32 %v1589_v0, %v1426_v5  ;;  %v1428_v7 = vpop.f32.mrb[17].mxu0  ;;  %v1469_v19 = vpop.f32.mrb[17].mxu1  ;;  %v1595_v43 = vadd.f32 %v1591_v4, %v1467_v56 }
 0x3f6   :  { %v1594_v18 = vadd.f32 %v1590_v2, %v1428_v7  ;;  %v1430_v22 = vpop.f32.mrb[18].mxu0  ;;  %v1471_v12 = vpop.f32.mrb[18].mxu1  ;;  %v1596_v13 = vadd.f32 %v1592_v21, %v1469_v19 }
 0x3f7   :  { %v3071_v28 = vmul.f32 -1.442695, %v1593_v14  ;;  %v1431_v53 = vpop.f32.mrb[19].mxu0  ;;  %v1472_v57 = vpop.f32.mrb[19].mxu1 }
 0x3f8   :  { %v3072_v8 = vmul.f32 -1.442695, %v1594_v18  ;;  %v3073_v38 = vmul.f32 -1.442695, %v1596_v13 }
 0x3f9   :  { %3266 = vpow2.f32 %v3071_v28 }
 0x3fa   :  { %3268 = vpow2.f32 %v3072_v8 }
 0x3fb   :  { %3270 = vpow2.f32 %v3073_v38 }
 0x3fc   :  { %3272 = vtanh.f32 %v1595_v43 }
 0x403   :  { %v3267_v55 = vpop.eup %3266 }
 0x404   :  { %v3269_v61 = vpop.eup %3268  ;;  %v1600_v5 = vadd.f32 1.0, %v3267_v55 }
 0x405   :  { %v1606_v0 = vadd.f32 1.0, %v3269_v61  ;;  %v3271_v7 = vpop.eup %3270 }
 0x406   :  { %3274 = vrcp.f32 %v1600_v5  ;;  %v3273_v12 = vpop.eup %3272  ;;  %v1613_v57 = vadd.f32 1.0, %v3271_v7 }
 0x407   :  { %3276 = vrcp.f32 %v1606_v0 }
 0x408   :  { %3278 = vrcp.f32 %v1613_v57 }
 0x410   :  { %v3275_v14 = vpop.eup %3274 }
 0x411   :  { %v3277_v53 = vpop.eup %3276  ;;  %v1617_v18 = vmul.f32 %v3275_v14, %v3273_v12 }
 0x412   :  { %v1616_v28 = vmul.f32 %v3277_v53, %v4231_v24  ;;  %v3279_v4 = vpop.eup %3278 }
 0x414   :  { %v4377_v19 = vadd.f32 %v1617_v18, %v1616_v28 }
 0x416   :  { %3280 = vtanh.f32 %v4377_v19 }
 0x420   :  { %v3281_v13 = vpop.eup %3280 }
 0x421   :  { %v1620_v55 = vmul.f32 %v3281_v13, %v3279_v4 }
 0x423   :  { %v1621_v38 = vpack.c.bf16 %v1620_v55, %v1620_v55 }
 0x425   :  { %1622 = vst [vmem:[#allocation2] sm:$0xf] %v1621_v38 }
 0x434   :  { %v1508_v61 = vpop.f32.mrb[20].mxu0  ;;  %v1549_v22 = vpop.f32.mrb[20].mxu1 }
 0x435   :  { %v1556_v48 = vadd.f32 %v1508_v61, %v5576_v42  ;;  %v1510_v56 = vpop.f32.mrb[21].mxu0  ;;  %v1551_v2 = vpop.f32.mrb[21].mxu1  ;;  %v1558_v53 = vadd.f32 %v1549_v22, %v4090_v36 }
 0x436   :  { %v1557_v8 = vadd.f32 %v1510_v56, %v4083_v20  ;;  %v1512_v21 = vpop.f32.mrb[22].mxu0  ;;  %v1553_v24 = vpop.f32.mrb[22].mxu1  ;;  %v1559_v12 = vadd.f32 %v1551_v2, %v4087_v46 }
 0x437   :  { %v3068_v43 = vmul.f32 -1.442695, %v1556_v48  ;;  %v1513_v5 = vpop.f32.mrb[23].mxu0  ;;  %v1554_v0 = vpop.f32.mrb[23].mxu1 }
 0x438   :  { %v3069_v7 = vmul.f32 -1.442695, %v1557_v8  ;;  %v3070_v14 = vmul.f32 -1.442695, %v1559_v12  ;;  %v5668_v12 = vld [vmem:[#allocation98_spill] sm:$0xff] }
 0x439   :  { %3282 = vpow2.f32 %v3068_v43 }
 0x43a   :  { %3284 = vpow2.f32 %v3069_v7 }
 0x43b   :  { %3286 = vpow2.f32 %v3070_v14  ;;  %v5669_v14 = vld [vmem:[#allocation99_spill] sm:$0xff] }
 0x43c   :  { %3288 = vtanh.f32 %v1558_v53  ;;  %v5670_v53 = vld [vmem:[#allocation100_spill] sm:$0xff] }
 0x443   :  { %v3283_v18 = vpop.eup %3282 }
 0x444   :  { %v3285_v57 = vpop.eup %3284  ;;  %v1563_v28 = vadd.f32 1.0, %v3283_v18  ;;  %v5671_v18 = vld [vmem:[#allocation101_spill] sm:$0xff] }
 0x445   :  { %v1569_v4 = vadd.f32 1.0, %v3285_v57  ;;  %v3287_v13 = vpop.eup %3286  ;;  %v5672_v57 = vld [vmem:[#allocation102_spill] sm:$0xff] }
 0x446   :  { %3290 = vrcp.f32 %v1563_v28  ;;  %v3289_v55 = vpop.eup %3288  ;;  %v1576_v56 = vadd.f32 1.0, %v3287_v13  ;;  %v5673_v28 = vld [vmem:[#allocation103_spill] sm:$0xff]  ;;  %v5675_v13 = vld [vmem:[#allocation105_spill] sm:$0xff] }
 0x447   :  { %3292 = vrcp.f32 %v1569_v4  ;;  %v5674_v4 = vld [vmem:[#allocation104_spill] sm:$0xff] }
 0x448   :  { %3294 = vrcp.f32 %v1576_v56  ;;  %v5680_v56 = vld [vmem:[#allocation131_spill] sm:$0xff] }
 0x450   :  { %v3291_v38 = vpop.eup %3290 }
 0x451   :  { %v3293_v61 = vpop.eup %3292  ;;  %v1580_v48 = vmul.f32 %v3291_v38, %v3289_v55  ;;  %v5676_v55 = vld [vmem:[#allocation106_spill] sm:$0xff]  ;;  %v5677_v38 = vld [vmem:[#allocation107_spill] sm:$0xff] }
 0x452   :  { %v1579_v8 = vmul.f32 %v3293_v61, %v4239_v59  ;;  %v3295_v22 = vpop.eup %3294  ;;  %v5667_v59 = vld [vmem:[#allocation97_spill] sm:$0xff]  ;;  %v5678_v61 = vld [vmem:[#allocation111_spill] sm:$0xff] }
 0x454   :  { %v4385_v2 = vadd.f32 %v1580_v48, %v1579_v8  ;;  %v5679_v48 = vld [vmem:[#allocation130_spill] sm:$0xff]  ;;  %v5681_v8 = vld [vmem:[#allocation132_spill] sm:$0xff] }
 0x456   :  { %3296 = vtanh.f32 %v4385_v2 }
 0x460   :  { %v3297_v21 = vpop.eup %3296 }
 0x461   :  { %v1583_v24 = vmul.f32 %v3297_v21, %v3295_v22  ;;  %v5682_v22 = vld [vmem:[#allocation133_spill] sm:$0xff]  ;;  %v5683_v21 = vld [vmem:[#allocation134_spill] sm:$0xff] }
 0x463   :  { %v1584_v43 = vpack.c.bf16 %v1583_v24, %v1583_v24  ;;  %v5684_v24 = vld [vmem:[#allocation135_spill] sm:$0xff] }
 0x465   :  { %1585 = vst [vmem:[#allocation2 + $0x4] sm:$0xf] %v1584_v43  ;;  %v5685_v43 = vld [vmem:[#allocation136_spill] sm:$0xff] }
 0x46c   :  { %v1623_v5 = vld [vmem:[#allocation2] sm:$0xff] }
 0x46d   :  { %v3075_v0 = vcombine.high %v1623_v5, %v1623_v5  ;;  %v4388_v7 = vcombine.low %v1623_v5, %v1623_v5  ;;  %v5686_v5 = vld [vmem:[#allocation137_spill] sm:$0xff] }
 0x46f   :  { %1663 = vmatprep.mubr.bf16.mxu0 %v3075_v0  ;;  %1704 = vmatprep.mubr.bf16.mxu1 %v3075_v0 }
 0x470   :  { %1664 = vmatmul.mubr.bf16.vlgmr.msra.gmra.mrb[24].mxu0 %v4388_v7  ;;  %1705 = vmatmul.mubr.bf16.vlgmr.msra.gmra.mrb[24].mxu1 %v4388_v7 }
 0x471   :  { %1714 = vmatpush1.bf16.msra.mxu0 %v3818_v9  ;;  %1755 = vmatpush1.bf16.msra.mxu1 %v5489_v44 }
 0x472   :  { %1745 = vmatprep.mubr.bf16.mxu0 %v3075_v0  ;;  %1786 = vmatprep.mubr.bf16.mxu1 %v3075_v0  ;;  %v5687_v0 = vld [vmem:[#allocation138_spill] sm:$0xff] }
 0x473   :  { %1715 = vmatprep.subr.bf16.mxu0 %v5490_v49  ;;  %1756 = vmatprep.subr.bf16.mxu1 %v5491_v6 }
 0x475   :  { %1716 = vmatpush1.bf16.msra.mxu0 %v5492_v35  ;;  %1757 = vmatpush1.bf16.msra.mxu1 %v5493_v37 }
 0x476   :  { %1717 = vmatprep.subr.bf16.mxu0 %v5494_v3  ;;  %1758 = vmatprep.subr.bf16.mxu1 %v5577_v58 }
 0x479   :  { %1718 = vmatpush1.bf16.msra.mxu0 %v5578_v26  ;;  %1759 = vmatpush1.bf16.msra.mxu1 %v5579_v47 }
 0x47a   :  { %1719 = vmatprep.subr.bf16.mxu0 %v5580_v32  ;;  %1760 = vmatprep.subr.bf16.mxu1 %v5581_v17 }
 0x47d   :  { %1720 = vmatpush1.bf16.msra.mxu0 %v5582_v25  ;;  %1761 = vmatpush1.bf16.msra.mxu1 %v5583_v34 }
 0x47e   :  { %1721 = vmatprep.subr.bf16.mxu0 %v5584_v23  ;;  %1762 = vmatprep.subr.bf16.mxu1 %v5667_v59 }
 0x481   :  { %1722 = vmatpush1.bf16.msra.mxu0 %v5668_v12  ;;  %1763 = vmatpush1.bf16.msra.mxu1 %v5669_v14 }
 0x482   :  { %1723 = vmatprep.subr.bf16.mxu0 %v5670_v53  ;;  %1764 = vmatprep.subr.bf16.mxu1 %v5671_v18 }
 0x485   :  { %1724 = vmatpush1.bf16.msra.mxu0 %v5672_v57  ;;  %1765 = vmatpush1.bf16.msra.mxu1 %v5673_v28 }
 0x486   :  { %1725 = vmatprep.subr.bf16.mxu0 %v5674_v4  ;;  %1766 = vmatprep.subr.bf16.mxu1 %v5675_v13 }
 0x489   :  { %1726 = vmatpush1.bf16.msra.mxu0 %v5676_v55  ;;  %1767 = vmatpush1.bf16.msra.mxu1 %v5677_v38 }
 0x48a   :  { %1727 = vmatprep.subr.bf16.mxu0 %v5596_v51  ;;  %1768 = vmatprep.subr.bf16.mxu1 %v5597_v10 }
 0x48d   :  { %1728 = vmatpush1.bf16.msra.mxu0 %v5598_v50  ;;  %1769 = vmatpush1.bf16.msra.mxu1 %v5678_v61 }
 0x48e   :  { %1729 = vmatprep.subr.bf16.mxu0 %v5600_v62  ;;  %1770 = vmatprep.subr.bf16.mxu1 %v5601_v39 }
 0x491   :  { %1730 = vmatpush1.bf16.msra.mxu0 %v5602_v33  ;;  %1771 = vmatpush1.bf16.msra.mxu1 %v5603_v41 }
 0x492   :  { %1731 = vmatprep.subr.bf16.mxu0 %v5604_v40  ;;  %1772 = vmatprep.subr.bf16.mxu1 %v5605_v31 }
 0x495   :  { %1732 = vmatpush1.bf16.msra.mxu0 %v5606_v63  ;;  %1773 = vmatpush1.bf16.msra.mxu1 %v5525_v16 }
 0x496   :  { %1733 = vmatprep.subr.bf16.mxu0 %v5526_v45  ;;  %1774 = vmatprep.subr.bf16.mxu1 %v5527_v1 }
 0x499   :  { %1734 = vmatpush1.bf16.msra.mxu0 %v5607_v54  ;;  %1775 = vmatpush1.bf16.msra.mxu1 %v5529_v30 }
 0x49a   :  { %1735 = vmatprep.subr.bf16.mxu0 %v5530_v27  ;;  %1776 = vmatprep.subr.bf16.mxu1 %v5531_v11 }
 0x49d   :  { %1736 = vmatpush1.bf16.msra.mxu0 %v5532_v60  ;;  %1777 = vmatpush1.bf16.msra.mxu1 %v5533_v29  ;;  %v1827_v60 = vld [vmem:[#allocation6 + $0x48] sm:$0xff] }
 0x49e   :  { %1737 = vmatprep.subr.bf16.mxu0 %v5534_v15  ;;  %1778 = vmatprep.subr.bf16.mxu1 %v5535_v52  ;;  %v5688_v15 = vld [vmem:[#allocation139_spill] sm:$0xff]  ;;  %v5689_v52 = vld [vmem:[#allocation140_spill] sm:$0xff]  ;;  %v1831_v1 = vunpack.c.h.bf16 %v1827_v60 }
 0x4a1   :  { %1738 = vmatpush1.bf16.msra.mxu0 %v5679_v48  ;;  %1779 = vmatpush1.bf16.msra.mxu1 %v5680_v56  ;;  %v5690_v48 = vld [vmem:[#allocation141_spill] sm:$0xff]  ;;  %v5691_v56 = vld [vmem:[#allocation142_spill] sm:$0xff] }
 0x4a2   :  { %1739 = vmatprep.subr.bf16.mxu0 %v5681_v8  ;;  %1780 = vmatprep.subr.bf16.mxu1 %v5682_v22  ;;  %v5692_v8 = vld [vmem:[#allocation143_spill] sm:$0xff]  ;;  %v5693_v22 = vld [vmem:[#allocation16_spill] sm:$0xff] }
 0x4a5   :  { %1740 = vmatpush1.bf16.msra.mxu0 %v5683_v21  ;;  %1781 = vmatpush1.bf16.msra.mxu1 %v5684_v24  ;;  %v5694_v21 = vld [vmem:[#allocation20_spill] sm:$0xff] }
 0x4a6   :  { %1741 = vmatprep.subr.bf16.mxu0 %v5685_v43  ;;  %1782 = vmatprep.subr.bf16.mxu1 %v5686_v5  ;;  %v5695_v5 = vld [vmem:[#allocation17_spill] sm:$0xff]  ;;  %v5704_v43 = vld [vmem:[#allocation28_spill] sm:$0xff] }
 0x4a9   :  { %1742 = vmatpush1.bf16.msra.mxu0 %v5687_v0  ;;  %1783 = vmatpush1.bf16.msra.mxu1 %v5688_v15  ;;  %v5696_v0 = vld [vmem:[#allocation21_spill] sm:$0xff]  ;;  %v5697_v15 = vld [vmem:[#allocation18_spill] sm:$0xff] }
 0x4aa   :  { %1743 = vmatprep.subr.bf16.mxu0 %v5689_v52  ;;  %1784 = vmatprep.subr.bf16.mxu1 %v5690_v48  ;;  %v5698_v52 = vld [vmem:[#allocation23_spill] sm:$0xff] }
 0x4ab   :  { %v5699_v48 = vld [vmem:[#allocation19_spill] sm:$0xff] }
 0x4ad   :  { %1744 = vmatpush1.bf16.msra.mxu0 %v5691_v56  ;;  %1785 = vmatpush1.bf16.msra.mxu1 %v5692_v8  ;;  %v5700_v56 = vld [vmem:[#allocation24_spill] sm:$0xff]  ;;  %v5701_v8 = vld [vmem:[#allocation22_spill] sm:$0xff] }
 0x4ae   :  { %1870 = vmatprep.subr.bf16.mxu0 %v5693_v22  ;;  %1911 = vmatprep.subr.bf16.mxu1 %v5694_v21  ;;  %v5702_v22 = vld [vmem:[#allocation26_spill] sm:$0xff]  ;;  %v5703_v21 = vld [vmem:[#allocation25_spill] sm:$0xff] }
 0x4b0   :  { %1746 = vmatmul.mubr.bf16.vlgmr.msra.gmra.mrb[28].mxu0 %v4388_v7  ;;  %1787 = vmatmul.mubr.bf16.vlgmr.msra.gmra.mrb[28].mxu1 %v4388_v7  ;;  %v5705_v7 = vld [vmem:[#allocation27_spill] sm:$0xff] }
 0x4b1   :  { %1871 = vmatpush1.bf16.msra.mxu0 %v5695_v5  ;;  %1912 = vmatpush1.bf16.msra.mxu1 %v5696_v0  ;;  %v5706_v5 = vld [vmem:[#allocation30_spill] sm:$0xff]  ;;  %v5707_v0 = vld [vmem:[#allocation29_spill] sm:$0xff] }
 0x4b2   :  { %1872 = vmatprep.subr.bf16.mxu0 %v5697_v15  ;;  %1913 = vmatprep.subr.bf16.mxu1 %v5698_v52  ;;  %v5708_v15 = vld [vmem:[#allocation32_spill] sm:$0xff]  ;;  %v5709_v52 = vld [vmem:[#allocation31_spill] sm:$0xff] }
 0x4b5   :  { %1873 = vmatpush1.bf16.msra.mxu0 %v5699_v48  ;;  %1914 = vmatpush1.bf16.msra.mxu1 %v5700_v56  ;;  %v5710_v48 = vld [vmem:[#allocation34_spill] sm:$0xff]  ;;  %v5711_v56 = vld [vmem:[#allocation33_spill] sm:$0xff] }
 0x4b6   :  { %1874 = vmatprep.subr.bf16.mxu0 %v5701_v8  ;;  %1915 = vmatprep.subr.bf16.mxu1 %v5702_v22  ;;  %v5712_v8 = vld [vmem:[#allocation36_spill] sm:$0xff]  ;;  %v5713_v22 = vld [vmem:[#allocation35_spill] sm:$0xff] }
 0x4b9   :  { %1875 = vmatpush1.bf16.msra.mxu0 %v5703_v21  ;;  %1916 = vmatpush1.bf16.msra.mxu1 %v5704_v43  ;;  %v5714_v21 = vld [vmem:[#allocation38_spill] sm:$0xff]  ;;  %v5715_v43 = vld [vmem:[#allocation37_spill] sm:$0xff] }
 0x4ba   :  { %1876 = vmatprep.subr.bf16.mxu0 %v5705_v7  ;;  %1917 = vmatprep.subr.bf16.mxu1 %v5706_v5  ;;  %v5716_v7 = vld [vmem:[#allocation40_spill] sm:$0xff]  ;;  %v5717_v5 = vld [vmem:[#allocation39_spill] sm:$0xff] }
 0x4bd   :  { %1877 = vmatpush1.bf16.msra.mxu0 %v5707_v0  ;;  %1918 = vmatpush1.bf16.msra.mxu1 %v5708_v15  ;;  %v5718_v0 = vld [vmem:[#allocation42_spill] sm:$0xff]  ;;  %v5719_v15 = vld [vmem:[#allocation41_spill] sm:$0xff] }
 0x4be   :  { %1878 = vmatprep.subr.bf16.mxu0 %v5709_v52  ;;  %1919 = vmatprep.subr.bf16.mxu1 %v5710_v48  ;;  %v5720_v52 = vld [vmem:[#allocation44_spill] sm:$0xff]  ;;  %v5721_v48 = vld [vmem:[#allocation43_spill] sm:$0xff] }
 0x4c1   :  { %1879 = vmatpush1.bf16.msra.mxu0 %v5711_v56  ;;  %1920 = vmatpush1.bf16.msra.mxu1 %v5712_v8  ;;  %v5722_v56 = vld [vmem:[#allocation46_spill] sm:$0xff]  ;;  %v5723_v8 = vld [vmem:[#allocation45_spill] sm:$0xff] }
 0x4c2   :  { %1880 = vmatprep.subr.bf16.mxu0 %v5713_v22  ;;  %1921 = vmatprep.subr.bf16.mxu1 %v5714_v21  ;;  %v5724_v22 = vld [vmem:[#allocation48_spill] sm:$0xff]  ;;  %v5725_v21 = vld [vmem:[#allocation47_spill] sm:$0xff] }
 0x4c5   :  { %1881 = vmatpush1.bf16.msra.mxu0 %v5715_v43  ;;  %1922 = vmatpush1.bf16.msra.mxu1 %v5716_v7  ;;  %v5726_v43 = vld [vmem:[#allocation50_spill] sm:$0xff]  ;;  %v5727_v7 = vld [vmem:[#allocation49_spill] sm:$0xff] }
 0x4c6   :  { %1882 = vmatprep.subr.bf16.mxu0 %v5717_v5  ;;  %1923 = vmatprep.subr.bf16.mxu1 %v5718_v0  ;;  %v5728_v5 = vld [vmem:[#allocation52_spill] sm:$0xff]  ;;  %v5729_v0 = vld [vmem:[#allocation51_spill] sm:$0xff] }
 0x4c9   :  { %1883 = vmatpush1.bf16.msra.mxu0 %v5719_v15  ;;  %1924 = vmatpush1.bf16.msra.mxu1 %v5720_v52  ;;  %v5730_v15 = vld [vmem:[#allocation54_spill] sm:$0xff]  ;;  %v5731_v52 = vld [vmem:[#allocation53_spill] sm:$0xff] }
 0x4ca   :  { %1884 = vmatprep.subr.bf16.mxu0 %v5721_v48  ;;  %1925 = vmatprep.subr.bf16.mxu1 %v5722_v56  ;;  %v5732_v48 = vld [vmem:[#allocation56_spill] sm:$0xff]  ;;  %v5733_v56 = vld [vmem:[#allocation55_spill] sm:$0xff] }
 0x4cd   :  { %1885 = vmatpush1.bf16.msra.mxu0 %v5723_v8  ;;  %1926 = vmatpush1.bf16.msra.mxu1 %v5724_v22  ;;  %v5734_v8 = vld [vmem:[#allocation58_spill] sm:$0xff]  ;;  %v5735_v22 = vld [vmem:[#allocation57_spill] sm:$0xff] }
 0x4ce   :  { %1886 = vmatprep.subr.bf16.mxu0 %v5725_v21  ;;  %1927 = vmatprep.subr.bf16.mxu1 %v5726_v43  ;;  %v5736_v21 = vld [vmem:[#allocation60_spill] sm:$0xff]  ;;  %v5737_v43 = vld [vmem:[#allocation59_spill] sm:$0xff] }
 0x4d1   :  { %1887 = vmatpush1.bf16.msra.mxu0 %v5727_v7  ;;  %1928 = vmatpush1.bf16.msra.mxu1 %v5728_v5  ;;  %v5738_v7 = vld [vmem:[#allocation62_spill] sm:$0xff]  ;;  %v5739_v5 = vld [vmem:[#allocation61_spill] sm:$0xff] }
 0x4d2   :  { %1888 = vmatprep.subr.bf16.mxu0 %v5729_v0  ;;  %1929 = vmatprep.subr.bf16.mxu1 %v5730_v15  ;;  %v5740_v0 = vld [vmem:[#allocation64_spill] sm:$0xff]  ;;  %v5741_v15 = vld [vmem:[#allocation63_spill] sm:$0xff] }
 0x4d5   :  { %1889 = vmatpush1.bf16.msra.mxu0 %v5731_v52  ;;  %1930 = vmatpush1.bf16.msra.mxu1 %v5732_v48  ;;  %v5742_v52 = vld [vmem:[#allocation66_spill] sm:$0xff]  ;;  %v5743_v48 = vld [vmem:[#allocation65_spill] sm:$0xff] }
 0x4d6   :  { %1890 = vmatprep.subr.bf16.mxu0 %v5733_v56  ;;  %1931 = vmatprep.subr.bf16.mxu1 %v5734_v8  ;;  %v5744_v56 = vld [vmem:[#allocation68_spill] sm:$0xff]  ;;  %v5745_v8 = vld [vmem:[#allocation67_spill] sm:$0xff] }
 0x4d9   :  { %1891 = vmatpush1.bf16.msra.mxu0 %v5735_v22  ;;  %1932 = vmatpush1.bf16.msra.mxu1 %v5736_v21  ;;  %v5746_v22 = vld [vmem:[#allocation71_spill] sm:$0xff]  ;;  %v5747_v21 = vld [vmem:[#allocation70_spill] sm:$0xff] }
 0x4da   :  { %1892 = vmatprep.subr.bf16.mxu0 %v5737_v43  ;;  %1933 = vmatprep.subr.bf16.mxu1 %v5738_v7  ;;  %v5748_v43 = vld [vmem:[#allocation73_spill] sm:$0xff]  ;;  %v5749_v7 = vld [vmem:[#allocation72_spill] sm:$0xff] }
 0x4dd   :  { %1893 = vmatpush1.bf16.msra.mxu0 %v5739_v5  ;;  %1934 = vmatpush1.bf16.msra.mxu1 %v5740_v0  ;;  %v5750_v5 = vld [vmem:[#allocation75_spill] sm:$0xff]  ;;  %v5751_v0 = vld [vmem:[#allocation74_spill] sm:$0xff] }
 0x4de   :  { %1894 = vmatprep.subr.bf16.mxu0 %v5741_v15  ;;  %1935 = vmatprep.subr.bf16.mxu1 %v5742_v52  ;;  %v5752_v15 = vld [vmem:[#allocation77_spill] sm:$0xff]  ;;  %v5753_v52 = vld [vmem:[#allocation76_spill] sm:$0xff] }
 0x4e1   :  { %1895 = vmatpush1.bf16.msra.mxu0 %v5743_v48  ;;  %1936 = vmatpush1.bf16.msra.mxu1 %v5744_v56  ;;  %v5754_v48 = vld [vmem:[#allocation79_spill] sm:$0xff]  ;;  %v5755_v56 = vld [vmem:[#allocation78_spill] sm:$0xff] }
 0x4e2   :  { %1896 = vmatprep.subr.bf16.mxu0 %v5745_v8  ;;  %1937 = vmatprep.subr.bf16.mxu1 %v5746_v22  ;;  %v5756_v8 = vld [vmem:[#allocation81_spill] sm:$0xff]  ;;  %v5757_v22 = vld [vmem:[#allocation80_spill] sm:$0xff] }
 0x4e5   :  { %1897 = vmatpush1.bf16.msra.mxu0 %v5747_v21  ;;  %1938 = vmatpush1.bf16.msra.mxu1 %v5748_v43  ;;  %v5758_v21 = vld [vmem:[#allocation82_spill] sm:$0xff]  ;;  %v1826_v43 = vld [vmem:[#allocation6 + $0x40] sm:$0xff] }
 0x4e6   :  { %1898 = vmatprep.subr.bf16.mxu0 %v5749_v7  ;;  %1939 = vmatprep.subr.bf16.mxu1 %v5750_v5  ;;  %v1828_v7 = vunpack.c.l.bf16 %v1826_v43  ;;  %v1829_v24 = vunpack.c.h.bf16 %v1826_v43 }
 0x4e9   :  { %1899 = vmatpush1.bf16.msra.mxu0 %v5751_v0  ;;  %1940 = vmatpush1.bf16.msra.mxu1 %v5752_v15 }
 0x4ea   :  { %1900 = vmatprep.subr.bf16.mxu0 %v5753_v52  ;;  %1941 = vmatprep.subr.bf16.mxu1 %v5754_v48 }
 0x4ed   :  { %1901 = vmatpush1.bf16.msra.mxu0 %v5755_v56  ;;  %1942 = vmatpush1.bf16.msra.mxu1 %v5756_v8 }
 0x4ee   :  { %1952 = vmatprep.subr.bf16.mxu0 %v5757_v22  ;;  %1993 = vmatprep.subr.bf16.mxu1 %v5758_v21  ;;  %v1830_v22 = vunpack.c.l.bf16 %v1827_v60 }
 0x543   :  { %v1665_v5 = vpop.f32.mrb[24].mxu0  ;;  %v1706_v29 = vpop.f32.mrb[24].mxu1 }
 0x544   :  { %v1832_v0 = vadd.f32 %v1828_v7, %v1665_v5  ;;  %v1667_v15 = vpop.f32.mrb[25].mxu0  ;;  %v1708_v11 = vpop.f32.mrb[25].mxu1  ;;  %v1834_v43 = vadd.f32 %v1830_v22, %v1706_v29 }
 0x545   :  { %v1833_v52 = vadd.f32 %v1829_v24, %v1667_v15  ;;  %v1669_v27 = vpop.f32.mrb[26].mxu0  ;;  %v1710_v48 = vpop.f32.mrb[26].mxu1  ;;  %v1835_v21 = vadd.f32 %v1831_v1, %v1708_v11 }
 0x546   :  { %v3079_v30 = vmul.f32 -1.442695, %v1832_v0  ;;  %v1670_v56 = vpop.f32.mrb[27].mxu0  ;;  %v1711_v54 = vpop.f32.mrb[27].mxu1 }
 0x547   :  { %v3080_v8 = vmul.f32 -1.442695, %v1833_v52  ;;  %v3081_v45 = vmul.f32 -1.442695, %v1835_v21 }
 0x548   :  { %3298 = vpow2.f32 %v3079_v30 }
 0x549   :  { %3300 = vpow2.f32 %v3080_v8 }
 0x54a   :  { %3302 = vpow2.f32 %v3081_v45 }
 0x54b   :  { %3304 = vtanh.f32 %v1834_v43 }
 0x552   :  { %v3299_v16 = vpop.eup %3298 }
 0x553   :  { %v3301_v63 = vpop.eup %3300  ;;  %v1839_v5 = vadd.f32 1.0, %v3299_v16 }
 0x554   :  { %v1845_v7 = vadd.f32 1.0, %v3301_v63  ;;  %v3303_v27 = vpop.eup %3302 }
 0x555   :  { %3306 = vrcp.f32 %v1839_v5  ;;  %v3305_v15 = vpop.eup %3304  ;;  %v1852_v56 = vadd.f32 1.0, %v3303_v27 }
 0x556   :  { %3308 = vrcp.f32 %v1845_v7 }
 0x557   :  { %3310 = vrcp.f32 %v1852_v56 }
 0x55f   :  { %v3307_v48 = vpop.eup %3306 }
 0x560   :  { %v3309_v54 = vpop.eup %3308  ;;  %v1856_v52 = vmul.f32 %v3307_v48, %v3305_v15 }
 0x561   :  { %v1855_v30 = vmul.f32 %v3309_v54, %v4377_v19  ;;  %v3311_v60 = vpop.eup %3310 }
 0x563   :  { %v4523_v11 = vadd.f32 %v1856_v52, %v1855_v30 }
 0x565   :  { %3312 = vtanh.f32 %v4523_v11 }
 0x56f   :  { %v3313_v29 = vpop.eup %3312 }
 0x570   :  { %v1859_v16 = vmul.f32 %v3313_v29, %v3311_v60 }
 0x572   :  { %v1860_v45 = vpack.c.bf16 %v1859_v16, %v1859_v16 }
 0x574   :  { %1861 = vst [vmem:[#allocation2] sm:$0xf] %v1860_v45 }
 0x583   :  { %v1747_v1 = vpop.f32.mrb[28].mxu0  ;;  %v1788_v63 = vpop.f32.mrb[28].mxu1 }
 0x584   :  { %v1795_v8 = vadd.f32 %v1747_v1, %v5576_v42  ;;  %v1749_v22 = vpop.f32.mrb[29].mxu0  ;;  %v1790_v21 = vpop.f32.mrb[29].mxu1  ;;  %v1797_v54 = vadd.f32 %v1788_v63, %v4090_v36 }
 0x585   :  { %v1796_v24 = vadd.f32 %v1749_v22, %v4083_v20  ;;  %v1751_v0 = vpop.f32.mrb[30].mxu0  ;;  %v1792_v19 = vpop.f32.mrb[30].mxu1  ;;  %v1798_v15 = vadd.f32 %v1790_v21, %v4087_v46 }
 0x586   :  { %v3076_v43 = vmul.f32 -1.442695, %v1795_v8  ;;  %v1752_v5 = vpop.f32.mrb[31].mxu0  ;;  %v1793_v7 = vpop.f32.mrb[31].mxu1 }
 0x587   :  { %v3077_v27 = vmul.f32 -1.442695, %v1796_v24  ;;  %v3078_v48 = vmul.f32 -1.442695, %v1798_v15  ;;  %v5760_v15 = vld [vmem:[#allocation119_spill] sm:$0xff] }
 0x588   :  { %3314 = vpow2.f32 %v3076_v43 }
 0x589   :  { %3316 = vpow2.f32 %v3077_v27 }
 0x58a   :  { %3318 = vpow2.f32 %v3078_v48  ;;  %v5761_v48 = vld [vmem:[#allocation120_spill] sm:$0xff] }
 0x58b   :  { %3320 = vtanh.f32 %v1797_v54  ;;  %v5762_v54 = vld [vmem:[#allocation121_spill] sm:$0xff] }
 0x592   :  { %v3315_v52 = vpop.eup %3314 }
 0x593   :  { %v3317_v56 = vpop.eup %3316  ;;  %v1802_v30 = vadd.f32 1.0, %v3315_v52  ;;  %v5763_v52 = vld [vmem:[#allocation122_spill] sm:$0xff] }
 0x594   :  { %v1808_v60 = vadd.f32 1.0, %v3317_v56  ;;  %v3319_v29 = vpop.eup %3318  ;;  %v5764_v56 = vld [vmem:[#allocation123_spill] sm:$0xff] }
 0x595   :  { %3322 = vrcp.f32 %v1802_v30  ;;  %v3321_v16 = vpop.eup %3320  ;;  %v1815_v22 = vadd.f32 1.0, %v3319_v29  ;;  %v5765_v30 = vld [vmem:[#allocation124_spill] sm:$0xff]  ;;  %v5767_v29 = vld [vmem:[#allocation126_spill] sm:$0xff] }
 0x596   :  { %3324 = vrcp.f32 %v1808_v60  ;;  %v5766_v60 = vld [vmem:[#allocation125_spill] sm:$0xff] }
 0x597   :  { %3326 = vrcp.f32 %v1815_v22  ;;  %v5772_v22 = vld [vmem:[#allocation131_spill] sm:$0xff] }
 0x59f   :  { %v3323_v45 = vpop.eup %3322 }
 0x5a0   :  { %v3325_v1 = vpop.eup %3324  ;;  %v1819_v8 = vmul.f32 %v3323_v45, %v3321_v16  ;;  %v5768_v16 = vld [vmem:[#allocation127_spill] sm:$0xff]  ;;  %v5769_v45 = vld [vmem:[#allocation128_spill] sm:$0xff] }
 0x5a1   :  { %v1818_v24 = vmul.f32 %v3325_v1, %v4385_v2  ;;  %v3327_v63 = vpop.eup %3326  ;;  %v5759_v2 = vld [vmem:[#allocation118_spill] sm:$0xff]  ;;  %v5770_v1 = vld [vmem:[#allocation129_spill] sm:$0xff] }
 0x5a3   :  { %v4531_v21 = vadd.f32 %v1819_v8, %v1818_v24  ;;  %v5771_v8 = vld [vmem:[#allocation130_spill] sm:$0xff]  ;;  %v5773_v24 = vld [vmem:[#allocation132_spill] sm:$0xff] }
 0x5a5   :  { %3328 = vtanh.f32 %v4531_v21 }
 0x5af   :  { %v3329_v0 = vpop.eup %3328 }
 0x5b0   :  { %v1822_v19 = vmul.f32 %v3329_v0, %v3327_v63  ;;  %v5774_v63 = vld [vmem:[#allocation133_spill] sm:$0xff]  ;;  %v5775_v0 = vld [vmem:[#allocation134_spill] sm:$0xff] }
 0x5b2   :  { %v1823_v43 = vpack.c.bf16 %v1822_v19, %v1822_v19  ;;  %v5776_v19 = vld [vmem:[#allocation135_spill] sm:$0xff] }
 0x5b4   :  { %1824 = vst [vmem:[#allocation2 + $0x4] sm:$0xf] %v1823_v43  ;;  %v5777_v43 = vld [vmem:[#allocation136_spill] sm:$0xff] }
 0x5bb   :  { %v1862_v5 = vld [vmem:[#allocation2] sm:$0xff] }
 0x5bc   :  { %v3083_v7 = vcombine.high %v1862_v5, %v1862_v5  ;;  %v4534_v27 = vcombine.low %v1862_v5, %v1862_v5  ;;  %v5778_v5 = vld [vmem:[#allocation137_spill] sm:$0xff] }
 0x5be   :  { %1902 = vmatprep.mubr.bf16.mxu0 %v3083_v7  ;;  %1943 = vmatprep.mubr.bf16.mxu1 %v3083_v7 }
 0x5bf   :  { %1903 = vmatmul.mubr.bf16.vlgmr.msra.gmra.mrb[32].mxu0 %v4534_v27  ;;  %1944 = vmatmul.mubr.bf16.vlgmr.msra.gmra.mrb[32].mxu1 %v4534_v27 }
 0x5c0   :  { %1953 = vmatpush1.bf16.msra.mxu0 %v3818_v9  ;;  %1994 = vmatpush1.bf16.msra.mxu1 %v5489_v44 }
 0x5c1   :  { %1984 = vmatprep.mubr.bf16.mxu0 %v3083_v7  ;;  %2025 = vmatprep.mubr.bf16.mxu1 %v3083_v7  ;;  %v5779_v7 = vld [vmem:[#allocation138_spill] sm:$0xff] }
 0x5c2   :  { %1954 = vmatprep.subr.bf16.mxu0 %v5490_v49  ;;  %1995 = vmatprep.subr.bf16.mxu1 %v5491_v6 }
 0x5c4   :  { %1955 = vmatpush1.bf16.msra.mxu0 %v5492_v35  ;;  %1996 = vmatpush1.bf16.msra.mxu1 %v5493_v37 }
 0x5c5   :  { %1956 = vmatprep.subr.bf16.mxu0 %v5494_v3  ;;  %1997 = vmatprep.subr.bf16.mxu1 %v5577_v58 }
 0x5c8   :  { %1957 = vmatpush1.bf16.msra.mxu0 %v5578_v26  ;;  %1998 = vmatpush1.bf16.msra.mxu1 %v5579_v47 }
 0x5c9   :  { %1958 = vmatprep.subr.bf16.mxu0 %v5580_v32  ;;  %1999 = vmatprep.subr.bf16.mxu1 %v5581_v17 }
 0x5cc   :  { %1959 = vmatpush1.bf16.msra.mxu0 %v5582_v25  ;;  %2000 = vmatpush1.bf16.msra.mxu1 %v5583_v34 }
 0x5cd   :  { %1960 = vmatprep.subr.bf16.mxu0 %v5584_v23  ;;  %2001 = vmatprep.subr.bf16.mxu1 %v5667_v59 }
 0x5d0   :  { %1961 = vmatpush1.bf16.msra.mxu0 %v5668_v12  ;;  %2002 = vmatpush1.bf16.msra.mxu1 %v5669_v14 }
 0x5d1   :  { %1962 = vmatprep.subr.bf16.mxu0 %v5670_v53  ;;  %2003 = vmatprep.subr.bf16.mxu1 %v5671_v18 }
 0x5d4   :  { %1963 = vmatpush1.bf16.msra.mxu0 %v5672_v57  ;;  %2004 = vmatpush1.bf16.msra.mxu1 %v5673_v28 }
 0x5d5   :  { %1964 = vmatprep.subr.bf16.mxu0 %v5674_v4  ;;  %2005 = vmatprep.subr.bf16.mxu1 %v5675_v13 }
 0x5d8   :  { %1965 = vmatpush1.bf16.msra.mxu0 %v5676_v55  ;;  %2006 = vmatpush1.bf16.msra.mxu1 %v5677_v38 }
 0x5d9   :  { %1966 = vmatprep.subr.bf16.mxu0 %v5596_v51  ;;  %2007 = vmatprep.subr.bf16.mxu1 %v5597_v10 }
 0x5dc   :  { %1967 = vmatpush1.bf16.msra.mxu0 %v5598_v50  ;;  %2008 = vmatpush1.bf16.msra.mxu1 %v5678_v61 }
 0x5dd   :  { %1968 = vmatprep.subr.bf16.mxu0 %v5600_v62  ;;  %2009 = vmatprep.subr.bf16.mxu1 %v5601_v39 }
 0x5e0   :  { %1969 = vmatpush1.bf16.msra.mxu0 %v5602_v33  ;;  %2010 = vmatpush1.bf16.msra.mxu1 %v5603_v41 }
 0x5e1   :  { %1970 = vmatprep.subr.bf16.mxu0 %v5604_v40  ;;  %2011 = vmatprep.subr.bf16.mxu1 %v5605_v31 }
 0x5e4   :  { %1971 = vmatpush1.bf16.msra.mxu0 %v5759_v2  ;;  %2012 = vmatpush1.bf16.msra.mxu1 %v5760_v15 }
 0x5e5   :  { %1972 = vmatprep.subr.bf16.mxu0 %v5761_v48  ;;  %2013 = vmatprep.subr.bf16.mxu1 %v5762_v54 }
 0x5e8   :  { %1973 = vmatpush1.bf16.msra.mxu0 %v5763_v52  ;;  %2014 = vmatpush1.bf16.msra.mxu1 %v5764_v56 }
 0x5e9   :  { %1974 = vmatprep.subr.bf16.mxu0 %v5765_v30  ;;  %2015 = vmatprep.subr.bf16.mxu1 %v5766_v60 }
 0x5ec   :  { %1975 = vmatpush1.bf16.msra.mxu0 %v5767_v29  ;;  %2016 = vmatpush1.bf16.msra.mxu1 %v5768_v16  ;;  %v2066_v29 = vld [vmem:[#allocation6 + $0x58] sm:$0xff] }
 0x5ed   :  { %1976 = vmatprep.subr.bf16.mxu0 %v5769_v45  ;;  %2017 = vmatprep.subr.bf16.mxu1 %v5770_v1  ;;  %v5780_v45 = vld [vmem:[#allocation139_spill] sm:$0xff]  ;;  %v5781_v1 = vld [vmem:[#allocation140_spill] sm:$0xff]  ;;  %v2070_v54 = vunpack.c.h.bf16 %v2066_v29 }
 0x5f0   :  { %1977 = vmatpush1.bf16.msra.mxu0 %v5771_v8  ;;  %2018 = vmatpush1.bf16.msra.mxu1 %v5772_v22  ;;  %v5782_v8 = vld [vmem:[#allocation141_spill] sm:$0xff]  ;;  %v5783_v22 = vld [vmem:[#allocation142_spill] sm:$0xff] }
 0x5f1   :  { %1978 = vmatprep.subr.bf16.mxu0 %v5773_v24  ;;  %2019 = vmatprep.subr.bf16.mxu1 %v5774_v63  ;;  %v5784_v24 = vld [vmem:[#allocation143_spill] sm:$0xff]  ;;  %v5785_v63 = vld [vmem:[#allocation16_spill] sm:$0xff] }
 0x5f4   :  { %1979 = vmatpush1.bf16.msra.mxu0 %v5775_v0  ;;  %2020 = vmatpush1.bf16.msra.mxu1 %v5776_v19  ;;  %v5786_v0 = vld [vmem:[#allocation20_spill] sm:$0xff] }
 0x5f5   :  { %1980 = vmatprep.subr.bf16.mxu0 %v5777_v43  ;;  %2021 = vmatprep.subr.bf16.mxu1 %v5778_v5  ;;  %v5787_v5 = vld [vmem:[#allocation17_spill] sm:$0xff]  ;;  %v5796_v43 = vld [vmem:[#allocation28_spill] sm:$0xff] }
 0x5f8   :  { %1981 = vmatpush1.bf16.msra.mxu0 %v5779_v7  ;;  %2022 = vmatpush1.bf16.msra.mxu1 %v5780_v45  ;;  %v5788_v7 = vld [vmem:[#allocation21_spill] sm:$0xff]  ;;  %v5789_v45 = vld [vmem:[#allocation18_spill] sm:$0xff] }
 0x5f9   :  { %1982 = vmatprep.subr.bf16.mxu0 %v5781_v1  ;;  %2023 = vmatprep.subr.bf16.mxu1 %v5782_v8  ;;  %v5790_v1 = vld [vmem:[#allocation23_spill] sm:$0xff] }
 0x5fa   :  { %v5791_v8 = vld [vmem:[#allocation19_spill] sm:$0xff] }
 0x5fc   :  { %1983 = vmatpush1.bf16.msra.mxu0 %v5783_v22  ;;  %2024 = vmatpush1.bf16.msra.mxu1 %v5784_v24  ;;  %v5792_v22 = vld [vmem:[#allocation24_spill] sm:$0xff]  ;;  %v5793_v24 = vld [vmem:[#allocation22_spill] sm:$0xff] }
 0x5fd   :  { %2109 = vmatprep.subr.bf16.mxu0 %v5785_v63  ;;  %2150 = vmatprep.subr.bf16.mxu1 %v5786_v0  ;;  %v5794_v63 = vld [vmem:[#allocation26_spill] sm:$0xff]  ;;  %v5795_v0 = vld [vmem:[#allocation25_spill] sm:$0xff] }
 0x5ff   :  { %1985 = vmatmul.mubr.bf16.vlgmr.msra.gmra.mrb[36].mxu0 %v4534_v27  ;;  %2026 = vmatmul.mubr.bf16.vlgmr.msra.gmra.mrb[36].mxu1 %v4534_v27  ;;  %v5797_v27 = vld [vmem:[#allocation27_spill] sm:$0xff] }
 0x600   :  { %2110 = vmatpush1.bf16.msra.mxu0 %v5787_v5  ;;  %2151 = vmatpush1.bf16.msra.mxu1 %v5788_v7  ;;  %v5798_v5 = vld [vmem:[#allocation30_spill] sm:$0xff]  ;;  %v5799_v7 = vld [vmem:[#allocation29_spill] sm:$0xff] }
 0x601   :  { %2111 = vmatprep.subr.bf16.mxu0 %v5789_v45  ;;  %2152 = vmatprep.subr.bf16.mxu1 %v5790_v1  ;;  %v5800_v45 = vld [vmem:[#allocation32_spill] sm:$0xff]  ;;  %v5801_v1 = vld [vmem:[#allocation31_spill] sm:$0xff] }
 0x604   :  { %2112 = vmatpush1.bf16.msra.mxu0 %v5791_v8  ;;  %2153 = vmatpush1.bf16.msra.mxu1 %v5792_v22  ;;  %v5802_v8 = vld [vmem:[#allocation34_spill] sm:$0xff]  ;;  %v5803_v22 = vld [vmem:[#allocation33_spill] sm:$0xff] }
 0x605   :  { %2113 = vmatprep.subr.bf16.mxu0 %v5793_v24  ;;  %2154 = vmatprep.subr.bf16.mxu1 %v5794_v63  ;;  %v5804_v24 = vld [vmem:[#allocation36_spill] sm:$0xff]  ;;  %v5805_v63 = vld [vmem:[#allocation35_spill] sm:$0xff] }
 0x608   :  { %2114 = vmatpush1.bf16.msra.mxu0 %v5795_v0  ;;  %2155 = vmatpush1.bf16.msra.mxu1 %v5796_v43  ;;  %v5806_v0 = vld [vmem:[#allocation38_spill] sm:$0xff]  ;;  %v5807_v43 = vld [vmem:[#allocation37_spill] sm:$0xff] }
 0x609   :  { %2115 = vmatprep.subr.bf16.mxu0 %v5797_v27  ;;  %2156 = vmatprep.subr.bf16.mxu1 %v5798_v5  ;;  %v5808_v27 = vld [vmem:[#allocation40_spill] sm:$0xff]  ;;  %v5809_v5 = vld [vmem:[#allocation39_spill] sm:$0xff] }
 0x60c   :  { %2116 = vmatpush1.bf16.msra.mxu0 %v5799_v7  ;;  %2157 = vmatpush1.bf16.msra.mxu1 %v5800_v45  ;;  %v5810_v7 = vld [vmem:[#allocation42_spill] sm:$0xff]  ;;  %v5811_v45 = vld [vmem:[#allocation41_spill] sm:$0xff] }
 0x60d   :  { %2117 = vmatprep.subr.bf16.mxu0 %v5801_v1  ;;  %2158 = vmatprep.subr.bf16.mxu1 %v5802_v8  ;;  %v5812_v1 = vld [vmem:[#allocation44_spill] sm:$0xff]  ;;  %v5813_v8 = vld [vmem:[#allocation43_spill] sm:$0xff] }
 0x610   :  { %2118 = vmatpush1.bf16.msra.mxu0 %v5803_v22  ;;  %2159 = vmatpush1.bf16.msra.mxu1 %v5804_v24  ;;  %v5814_v22 = vld [vmem:[#allocation46_spill] sm:$0xff]  ;;  %v5815_v24 = vld [vmem:[#allocation45_spill] sm:$0xff] }
 0x611   :  { %2119 = vmatprep.subr.bf16.mxu0 %v5805_v63  ;;  %2160 = vmatprep.subr.bf16.mxu1 %v5806_v0  ;;  %v5816_v63 = vld [vmem:[#allocation48_spill] sm:$0xff]  ;;  %v5817_v0 = vld [vmem:[#allocation47_spill] sm:$0xff] }
 0x614   :  { %2120 = vmatpush1.bf16.msra.mxu0 %v5807_v43  ;;  %2161 = vmatpush1.bf16.msra.mxu1 %v5808_v27  ;;  %v5818_v43 = vld [vmem:[#allocation50_spill] sm:$0xff]  ;;  %v5819_v27 = vld [vmem:[#allocation49_spill] sm:$0xff] }
 0x615   :  { %2121 = vmatprep.subr.bf16.mxu0 %v5809_v5  ;;  %2162 = vmatprep.subr.bf16.mxu1 %v5810_v7  ;;  %v5820_v5 = vld [vmem:[#allocation52_spill] sm:$0xff]  ;;  %v5821_v7 = vld [vmem:[#allocation51_spill] sm:$0xff] }
 0x618   :  { %2122 = vmatpush1.bf16.msra.mxu0 %v5811_v45  ;;  %2163 = vmatpush1.bf16.msra.mxu1 %v5812_v1  ;;  %v5822_v45 = vld [vmem:[#allocation54_spill] sm:$0xff]  ;;  %v5823_v1 = vld [vmem:[#allocation53_spill] sm:$0xff] }
 0x619   :  { %2123 = vmatprep.subr.bf16.mxu0 %v5813_v8  ;;  %2164 = vmatprep.subr.bf16.mxu1 %v5814_v22  ;;  %v5824_v8 = vld [vmem:[#allocation56_spill] sm:$0xff]  ;;  %v5825_v22 = vld [vmem:[#allocation55_spill] sm:$0xff] }
 0x61c   :  { %2124 = vmatpush1.bf16.msra.mxu0 %v5815_v24  ;;  %2165 = vmatpush1.bf16.msra.mxu1 %v5816_v63  ;;  %v5826_v24 = vld [vmem:[#allocation58_spill] sm:$0xff]  ;;  %v5827_v63 = vld [vmem:[#allocation57_spill] sm:$0xff] }
 0x61d   :  { %2125 = vmatprep.subr.bf16.mxu0 %v5817_v0  ;;  %2166 = vmatprep.subr.bf16.mxu1 %v5818_v43  ;;  %v5828_v0 = vld [vmem:[#allocation60_spill] sm:$0xff]  ;;  %v5829_v43 = vld [vmem:[#allocation59_spill] sm:$0xff] }
 0x620   :  { %2126 = vmatpush1.bf16.msra.mxu0 %v5819_v27  ;;  %2167 = vmatpush1.bf16.msra.mxu1 %v5820_v5  ;;  %v5830_v27 = vld [vmem:[#allocation62_spill] sm:$0xff]  ;;  %v5831_v5 = vld [vmem:[#allocation61_spill] sm:$0xff] }
 0x621   :  { %2127 = vmatprep.subr.bf16.mxu0 %v5821_v7  ;;  %2168 = vmatprep.subr.bf16.mxu1 %v5822_v45  ;;  %v5832_v7 = vld [vmem:[#allocation64_spill] sm:$0xff]  ;;  %v5833_v45 = vld [vmem:[#allocation63_spill] sm:$0xff] }
 0x624   :  { %2128 = vmatpush1.bf16.msra.mxu0 %v5823_v1  ;;  %2169 = vmatpush1.bf16.msra.mxu1 %v5824_v8  ;;  %v5834_v1 = vld [vmem:[#allocation66_spill] sm:$0xff]  ;;  %v5835_v8 = vld [vmem:[#allocation65_spill] sm:$0xff] }
 0x625   :  { %2129 = vmatprep.subr.bf16.mxu0 %v5825_v22  ;;  %2170 = vmatprep.subr.bf16.mxu1 %v5826_v24  ;;  %v5836_v22 = vld [vmem:[#allocation68_spill] sm:$0xff]  ;;  %v5837_v24 = vld [vmem:[#allocation67_spill] sm:$0xff] }
 0x628   :  { %2130 = vmatpush1.bf16.msra.mxu0 %v5827_v63  ;;  %2171 = vmatpush1.bf16.msra.mxu1 %v5828_v0  ;;  %v5838_v63 = vld [vmem:[#allocation71_spill] sm:$0xff]  ;;  %v5839_v0 = vld [vmem:[#allocation70_spill] sm:$0xff] }
 0x629   :  { %2131 = vmatprep.subr.bf16.mxu0 %v5829_v43  ;;  %2172 = vmatprep.subr.bf16.mxu1 %v5830_v27  ;;  %v5840_v43 = vld [vmem:[#allocation73_spill] sm:$0xff]  ;;  %v5841_v27 = vld [vmem:[#allocation72_spill] sm:$0xff] }
 0x62c   :  { %2132 = vmatpush1.bf16.msra.mxu0 %v5831_v5  ;;  %2173 = vmatpush1.bf16.msra.mxu1 %v5832_v7  ;;  %v5842_v5 = vld [vmem:[#allocation75_spill] sm:$0xff]  ;;  %v5843_v7 = vld [vmem:[#allocation74_spill] sm:$0xff] }
 0x62d   :  { %2133 = vmatprep.subr.bf16.mxu0 %v5833_v45  ;;  %2174 = vmatprep.subr.bf16.mxu1 %v5834_v1  ;;  %v5844_v45 = vld [vmem:[#allocation77_spill] sm:$0xff]  ;;  %v5845_v1 = vld [vmem:[#allocation76_spill] sm:$0xff] }
 0x630   :  { %2134 = vmatpush1.bf16.msra.mxu0 %v5835_v8  ;;  %2175 = vmatpush1.bf16.msra.mxu1 %v5836_v22  ;;  %v5846_v8 = vld [vmem:[#allocation79_spill] sm:$0xff]  ;;  %v5847_v22 = vld [vmem:[#allocation78_spill] sm:$0xff] }
 0x631   :  { %2135 = vmatprep.subr.bf16.mxu0 %v5837_v24  ;;  %2176 = vmatprep.subr.bf16.mxu1 %v5838_v63  ;;  %v5848_v24 = vld [vmem:[#allocation81_spill] sm:$0xff]  ;;  %v5849_v63 = vld [vmem:[#allocation80_spill] sm:$0xff] }
 0x634   :  { %2136 = vmatpush1.bf16.msra.mxu0 %v5839_v0  ;;  %2177 = vmatpush1.bf16.msra.mxu1 %v5840_v43  ;;  %v5850_v0 = vld [vmem:[#allocation82_spill] sm:$0xff]  ;;  %v2065_v43 = vld [vmem:[#allocation6 + $0x50] sm:$0xff] }
 0x635   :  { %2137 = vmatprep.subr.bf16.mxu0 %v5841_v27  ;;  %2178 = vmatprep.subr.bf16.mxu1 %v5842_v5  ;;  %v2067_v27 = vunpack.c.l.bf16 %v2065_v43  ;;  %v2068_v19 = vunpack.c.h.bf16 %v2065_v43 }
 0x638   :  { %2138 = vmatpush1.bf16.msra.mxu0 %v5843_v7  ;;  %2179 = vmatpush1.bf16.msra.mxu1 %v5844_v45 }
 0x639   :  { %2139 = vmatprep.subr.bf16.mxu0 %v5845_v1  ;;  %2180 = vmatprep.subr.bf16.mxu1 %v5846_v8 }
 0x63c   :  { %2140 = vmatpush1.bf16.msra.mxu0 %v5847_v22  ;;  %2181 = vmatpush1.bf16.msra.mxu1 %v5848_v24 }
 0x63d   :  { %2191 = vmatprep.subr.bf16.mxu0 %v5849_v63  ;;  %2232 = vmatprep.subr.bf16.mxu1 %v5850_v0  ;;  %v2069_v63 = vunpack.c.l.bf16 %v2066_v29 }
 0x692   :  { %v1904_v5 = vpop.f32.mrb[32].mxu0  ;;  %v1945_v16 = vpop.f32.mrb[32].mxu1 }
 0x693   :  { %v2071_v7 = vadd.f32 %v2067_v27, %v1904_v5  ;;  %v1906_v45 = vpop.f32.mrb[33].mxu0  ;;  %v1947_v60 = vpop.f32.mrb[33].mxu1  ;;  %v2073_v43 = vadd.f32 %v2069_v63, %v1945_v16 }
 0x694   :  { %v2072_v1 = vadd.f32 %v2068_v19, %v1906_v45  ;;  %v1908_v30 = vpop.f32.mrb[34].mxu0  ;;  %v1949_v8 = vpop.f32.mrb[34].mxu1  ;;  %v2074_v0 = vadd.f32 %v2070_v54, %v1947_v60 }
 0x695   :  { %v3087_v56 = vmul.f32 -1.442695, %v2071_v7  ;;  %v1909_v22 = vpop.f32.mrb[35].mxu0  ;;  %v1950_v52 = vpop.f32.mrb[35].mxu1 }
 0x696   :  { %v3088_v24 = vmul.f32 -1.442695, %v2072_v1  ;;  %v3089_v48 = vmul.f32 -1.442695, %v2074_v0 }
 0x697   :  { %3330 = vpow2.f32 %v3087_v56 }
 0x698   :  { %3332 = vpow2.f32 %v3088_v24 }
 0x699   :  { %3334 = vpow2.f32 %v3089_v48 }
 0x69a   :  { %3336 = vtanh.f32 %v2073_v43 }
 0x6a1   :  { %v3331_v15 = vpop.eup %3330 }
 0x6a2   :  { %v3333_v2 = vpop.eup %3332  ;;  %v2078_v5 = vadd.f32 1.0, %v3331_v15 }
 0x6a3   :  { %v2084_v27 = vadd.f32 1.0, %v3333_v2  ;;  %v3335_v30 = vpop.eup %3334 }
 0x6a4   :  { %3338 = vrcp.f32 %v2078_v5  ;;  %v3337_v45 = vpop.eup %3336  ;;  %v2091_v22 = vadd.f32 1.0, %v3335_v30 }
 0x6a5   :  { %3340 = vrcp.f32 %v2084_v27 }
 0x6a6   :  { %3342 = vrcp.f32 %v2091_v22 }
 0x6ae   :  { %v3339_v8 = vpop.eup %3338 }
 0x6af   :  { %v3341_v52 = vpop.eup %3340  ;;  %v2095_v1 = vmul.f32 %v3339_v8, %v3337_v45 }
 0x6b0   :  { %v2094_v56 = vmul.f32 %v3341_v52, %v4523_v11  ;;  %v3343_v60 = vpop.eup %3342 }
 0x6b2   :  { %v4669_v54 = vadd.f32 %v2095_v1, %v2094_v56 }
 0x6b4   :  { %3344 = vtanh.f32 %v4669_v54 }
 0x6be   :  { %v3345_v15 = vpop.eup %3344 }
 0x6bf   :  { %v2098_v48 = vmul.f32 %v3345_v15, %v3343_v60 }
 0x6c1   :  { %v2099_v29 = vpack.c.bf16 %v2098_v48, %v2098_v48 }
 0x6c3   :  { %2100 = vst [vmem:[#allocation2] sm:$0xf] %v2099_v29 }
 0x6d2   :  { %v1986_v2 = vpop.f32.mrb[36].mxu0  ;;  %v2027_v16 = vpop.f32.mrb[36].mxu1 }
 0x6d3   :  { %v2034_v24 = vadd.f32 %v1986_v2, %v5576_v42  ;;  %v1988_v63 = vpop.f32.mrb[37].mxu0  ;;  %v2029_v0 = vpop.f32.mrb[37].mxu1  ;;  %v2036_v52 = vadd.f32 %v2027_v16, %v4090_v36 }
 0x6d4   :  { %v2035_v19 = vadd.f32 %v1988_v63, %v4083_v20  ;;  %v1990_v7 = vpop.f32.mrb[38].mxu0  ;;  %v2031_v11 = vpop.f32.mrb[38].mxu1  ;;  %v2037_v45 = vadd.f32 %v2029_v0, %v4087_v46 }
 0x6d5   :  { %v3084_v43 = vmul.f32 -1.442695, %v2034_v24  ;;  %v1991_v5 = vpop.f32.mrb[39].mxu0  ;;  %v2032_v27 = vpop.f32.mrb[39].mxu1 }
 0x6d6   :  { %v3085_v30 = vmul.f32 -1.442695, %v2035_v19  ;;  %v3086_v8 = vmul.f32 -1.442695, %v2037_v45  ;;  %v5852_v45 = vld [vmem:[#allocation119_spill] sm:$0xff] }
 0x6d7   :  { %3346 = vpow2.f32 %v3084_v43 }
 0x6d8   :  { %3348 = vpow2.f32 %v3085_v30 }
 0x6d9   :  { %3350 = vpow2.f32 %v3086_v8  ;;  %v5853_v8 = vld [vmem:[#allocation120_spill] sm:$0xff] }
 0x6da   :  { %3352 = vtanh.f32 %v2036_v52  ;;  %v5854_v52 = vld [vmem:[#allocation121_spill] sm:$0xff] }
 0x6e1   :  { %v3347_v1 = vpop.eup %3346 }
 0x6e2   :  { %v3349_v22 = vpop.eup %3348  ;;  %v2041_v56 = vadd.f32 1.0, %v3347_v1  ;;  %v5855_v1 = vld [vmem:[#allocation122_spill] sm:$0xff] }
 0x6e3   :  { %v2047_v60 = vadd.f32 1.0, %v3349_v22  ;;  %v3351_v15 = vpop.eup %3350  ;;  %v5856_v22 = vld [vmem:[#allocation123_spill] sm:$0xff] }
 0x6e4   :  { %3354 = vrcp.f32 %v2041_v56  ;;  %v3353_v48 = vpop.eup %3352  ;;  %v2054_v63 = vadd.f32 1.0, %v3351_v15  ;;  %v5857_v56 = vld [vmem:[#allocation124_spill] sm:$0xff]  ;;  %v5859_v15 = vld [vmem:[#allocation126_spill] sm:$0xff] }
 0x6e5   :  { %3356 = vrcp.f32 %v2047_v60  ;;  %v5858_v60 = vld [vmem:[#allocation125_spill] sm:$0xff] }
 0x6e6   :  { %3358 = vrcp.f32 %v2054_v63  ;;  %v5864_v63 = vld [vmem:[#allocation131_spill] sm:$0xff] }
 0x6ee   :  { %v3355_v29 = vpop.eup %3354 }
 0x6ef   :  { %v3357_v2 = vpop.eup %3356  ;;  %v2058_v24 = vmul.f32 %v3355_v29, %v3353_v48  ;;  %v5860_v48 = vld [vmem:[#allocation127_spill] sm:$0xff]  ;;  %v5861_v29 = vld [vmem:[#allocation128_spill] sm:$0xff] }
 0x6f0   :  { %v2057_v19 = vmul.f32 %v3357_v2, %v4531_v21  ;;  %v3359_v16 = vpop.eup %3358  ;;  %v5851_v21 = vld [vmem:[#allocation118_spill] sm:$0xff]  ;;  %v5862_v2 = vld [vmem:[#allocation129_spill] sm:$0xff] }
 0x6f2   :  { %v4677_v0 = vadd.f32 %v2058_v24, %v2057_v19  ;;  %v5863_v24 = vld [vmem:[#allocation130_spill] sm:$0xff]  ;;  %v5865_v19 = vld [vmem:[#allocation132_spill] sm:$0xff] }
 0x6f4   :  { %3360 = vtanh.f32 %v4677_v0 }
 0x6fe   :  { %v3361_v7 = vpop.eup %3360 }
 0x6ff   :  { %v2061_v11 = vmul.f32 %v3361_v7, %v3359_v16  ;;  %v5866_v16 = vld [vmem:[#allocation133_spill] sm:$0xff]  ;;  %v5867_v7 = vld [vmem:[#allocation134_spill] sm:$0xff] }
 0x701   :  { %v2062_v43 = vpack.c.bf16 %v2061_v11, %v2061_v11  ;;  %v5868_v11 = vld [vmem:[#allocation135_spill] sm:$0xff] }
 0x703   :  { %2063 = vst [vmem:[#allocation2 + $0x4] sm:$0xf] %v2062_v43  ;;  %v5869_v43 = vld [vmem:[#allocation136_spill] sm:$0xff] }
 0x70a   :  { %v2101_v5 = vld [vmem:[#allocation2] sm:$0xff] }
 0x70b   :  { %v3091_v27 = vcombine.high %v2101_v5, %v2101_v5  ;;  %v4680_v30 = vcombine.low %v2101_v5, %v2101_v5  ;;  %v5870_v5 = vld [vmem:[#allocation137_spill] sm:$0xff] }
 0x70d   :  { %2141 = vmatprep.mubr.bf16.mxu0 %v3091_v27  ;;  %2182 = vmatprep.mubr.bf16.mxu1 %v3091_v27 }
 0x70e   :  { %2142 = vmatmul.mubr.bf16.vlgmr.msra.gmra.mrb[40].mxu0 %v4680_v30  ;;  %2183 = vmatmul.mubr.bf16.vlgmr.msra.gmra.mrb[40].mxu1 %v4680_v30 }
 0x70f   :  { %2192 = vmatpush1.bf16.msra.mxu0 %v3818_v9  ;;  %2233 = vmatpush1.bf16.msra.mxu1 %v5489_v44 }
 0x710   :  { %2223 = vmatprep.mubr.bf16.mxu0 %v3091_v27  ;;  %2264 = vmatprep.mubr.bf16.mxu1 %v3091_v27  ;;  %v5871_v27 = vld [vmem:[#allocation138_spill] sm:$0xff] }
 0x711   :  { %2193 = vmatprep.subr.bf16.mxu0 %v5490_v49  ;;  %2234 = vmatprep.subr.bf16.mxu1 %v5491_v6 }
 0x713   :  { %2194 = vmatpush1.bf16.msra.mxu0 %v5492_v35  ;;  %2235 = vmatpush1.bf16.msra.mxu1 %v5493_v37 }
 0x714   :  { %2195 = vmatprep.subr.bf16.mxu0 %v5494_v3  ;;  %2236 = vmatprep.subr.bf16.mxu1 %v5577_v58 }
 0x717   :  { %2196 = vmatpush1.bf16.msra.mxu0 %v5578_v26  ;;  %2237 = vmatpush1.bf16.msra.mxu1 %v5579_v47 }
 0x718   :  { %2197 = vmatprep.subr.bf16.mxu0 %v5580_v32  ;;  %2238 = vmatprep.subr.bf16.mxu1 %v5581_v17 }
 0x71b   :  { %2198 = vmatpush1.bf16.msra.mxu0 %v5582_v25  ;;  %2239 = vmatpush1.bf16.msra.mxu1 %v5583_v34 }
 0x71c   :  { %2199 = vmatprep.subr.bf16.mxu0 %v5584_v23  ;;  %2240 = vmatprep.subr.bf16.mxu1 %v5667_v59 }
 0x71f   :  { %2200 = vmatpush1.bf16.msra.mxu0 %v5668_v12  ;;  %2241 = vmatpush1.bf16.msra.mxu1 %v5669_v14 }
 0x720   :  { %2201 = vmatprep.subr.bf16.mxu0 %v5670_v53  ;;  %2242 = vmatprep.subr.bf16.mxu1 %v5671_v18 }
 0x723   :  { %2202 = vmatpush1.bf16.msra.mxu0 %v5672_v57  ;;  %2243 = vmatpush1.bf16.msra.mxu1 %v5673_v28 }
 0x724   :  { %2203 = vmatprep.subr.bf16.mxu0 %v5674_v4  ;;  %2244 = vmatprep.subr.bf16.mxu1 %v5675_v13 }
 0x727   :  { %2204 = vmatpush1.bf16.msra.mxu0 %v5676_v55  ;;  %2245 = vmatpush1.bf16.msra.mxu1 %v5677_v38 }
 0x728   :  { %2205 = vmatprep.subr.bf16.mxu0 %v5596_v51  ;;  %2246 = vmatprep.subr.bf16.mxu1 %v5597_v10 }
 0x72b   :  { %2206 = vmatpush1.bf16.msra.mxu0 %v5598_v50  ;;  %2247 = vmatpush1.bf16.msra.mxu1 %v5678_v61 }
 0x72c   :  { %2207 = vmatprep.subr.bf16.mxu0 %v5600_v62  ;;  %2248 = vmatprep.subr.bf16.mxu1 %v5601_v39 }
 0x72f   :  { %2208 = vmatpush1.bf16.msra.mxu0 %v5602_v33  ;;  %2249 = vmatpush1.bf16.msra.mxu1 %v5603_v41 }
 0x730   :  { %2209 = vmatprep.subr.bf16.mxu0 %v5604_v40  ;;  %2250 = vmatprep.subr.bf16.mxu1 %v5605_v31 }
 0x733   :  { %2210 = vmatpush1.bf16.msra.mxu0 %v5851_v21  ;;  %2251 = vmatpush1.bf16.msra.mxu1 %v5852_v45 }
 0x734   :  { %2211 = vmatprep.subr.bf16.mxu0 %v5853_v8  ;;  %2252 = vmatprep.subr.bf16.mxu1 %v5854_v52 }
 0x737   :  { %2212 = vmatpush1.bf16.msra.mxu0 %v5855_v1  ;;  %2253 = vmatpush1.bf16.msra.mxu1 %v5856_v22 }
 0x738   :  { %2213 = vmatprep.subr.bf16.mxu0 %v5857_v56  ;;  %2254 = vmatprep.subr.bf16.mxu1 %v5858_v60 }
 0x73b   :  { %2214 = vmatpush1.bf16.msra.mxu0 %v5859_v15  ;;  %2255 = vmatpush1.bf16.msra.mxu1 %v5860_v48  ;;  %v2305_v15 = vld [vmem:[#allocation6 + $0x68] sm:$0xff] }
 0x73c   :  { %2215 = vmatprep.subr.bf16.mxu0 %v5861_v29  ;;  %2256 = vmatprep.subr.bf16.mxu1 %v5862_v2  ;;  %v5872_v29 = vld [vmem:[#allocation139_spill] sm:$0xff]  ;;  %v5873_v2 = vld [vmem:[#allocation140_spill] sm:$0xff]  ;;  %v2309_v52 = vunpack.c.h.bf16 %v2305_v15 }
 0x73f   :  { %2216 = vmatpush1.bf16.msra.mxu0 %v5863_v24  ;;  %2257 = vmatpush1.bf16.msra.mxu1 %v5864_v63  ;;  %v5874_v24 = vld [vmem:[#allocation141_spill] sm:$0xff]  ;;  %v5875_v63 = vld [vmem:[#allocation142_spill] sm:$0xff] }
 0x740   :  { %2217 = vmatprep.subr.bf16.mxu0 %v5865_v19  ;;  %2258 = vmatprep.subr.bf16.mxu1 %v5866_v16  ;;  %v5876_v19 = vld [vmem:[#allocation143_spill] sm:$0xff]  ;;  %v5877_v16 = vld [vmem:[#allocation16_spill] sm:$0xff] }
 0x743   :  { %2218 = vmatpush1.bf16.msra.mxu0 %v5867_v7  ;;  %2259 = vmatpush1.bf16.msra.mxu1 %v5868_v11  ;;  %v5878_v7 = vld [vmem:[#allocation20_spill] sm:$0xff] }
 0x744   :  { %2219 = vmatprep.subr.bf16.mxu0 %v5869_v43  ;;  %2260 = vmatprep.subr.bf16.mxu1 %v5870_v5  ;;  %v5879_v5 = vld [vmem:[#allocation17_spill] sm:$0xff]  ;;  %v5888_v43 = vld [vmem:[#allocation28_spill] sm:$0xff] }
 0x747   :  { %2220 = vmatpush1.bf16.msra.mxu0 %v5871_v27  ;;  %2261 = vmatpush1.bf16.msra.mxu1 %v5872_v29  ;;  %v5880_v27 = vld [vmem:[#allocation21_spill] sm:$0xff]  ;;  %v5881_v29 = vld [vmem:[#allocation18_spill] sm:$0xff] }
 0x748   :  { %2221 = vmatprep.subr.bf16.mxu0 %v5873_v2  ;;  %2262 = vmatprep.subr.bf16.mxu1 %v5874_v24  ;;  %v5882_v2 = vld [vmem:[#allocation23_spill] sm:$0xff] }
 0x749   :  { %v5883_v24 = vld [vmem:[#allocation19_spill] sm:$0xff] }
 0x74b   :  { %2222 = vmatpush1.bf16.msra.mxu0 %v5875_v63  ;;  %2263 = vmatpush1.bf16.msra.mxu1 %v5876_v19  ;;  %v5884_v63 = vld [vmem:[#allocation24_spill] sm:$0xff]  ;;  %v5885_v19 = vld [vmem:[#allocation22_spill] sm:$0xff] }
 0x74c   :  { %2348 = vmatprep.subr.bf16.mxu0 %v5877_v16  ;;  %2389 = vmatprep.subr.bf16.mxu1 %v5878_v7  ;;  %v5886_v16 = vld [vmem:[#allocation26_spill] sm:$0xff]  ;;  %v5887_v7 = vld [vmem:[#allocation25_spill] sm:$0xff] }
 0x74e   :  { %2224 = vmatmul.mubr.bf16.vlgmr.msra.gmra.mrb[44].mxu0 %v4680_v30  ;;  %2265 = vmatmul.mubr.bf16.vlgmr.msra.gmra.mrb[44].mxu1 %v4680_v30  ;;  %v5889_v30 = vld [vmem:[#allocation27_spill] sm:$0xff] }
 0x74f   :  { %2349 = vmatpush1.bf16.msra.mxu0 %v5879_v5  ;;  %2390 = vmatpush1.bf16.msra.mxu1 %v5880_v27  ;;  %v5890_v5 = vld [vmem:[#allocation30_spill] sm:$0xff]  ;;  %v5891_v27 = vld [vmem:[#allocation29_spill] sm:$0xff] }
 0x750   :  { %2350 = vmatprep.subr.bf16.mxu0 %v5881_v29  ;;  %2391 = vmatprep.subr.bf16.mxu1 %v5882_v2  ;;  %v5892_v29 = vld [vmem:[#allocation32_spill] sm:$0xff]  ;;  %v5893_v2 = vld [vmem:[#allocation31_spill] sm:$0xff] }
 0x753   :  { %2351 = vmatpush1.bf16.msra.mxu0 %v5883_v24  ;;  %2392 = vmatpush1.bf16.msra.mxu1 %v5884_v63  ;;  %v5894_v24 = vld [vmem:[#allocation34_spill] sm:$0xff]  ;;  %v5895_v63 = vld [vmem:[#allocation33_spill] sm:$0xff] }
 0x754   :  { %2352 = vmatprep.subr.bf16.mxu0 %v5885_v19  ;;  %2393 = vmatprep.subr.bf16.mxu1 %v5886_v16  ;;  %v5896_v19 = vld [vmem:[#allocation36_spill] sm:$0xff]  ;;  %v5897_v16 = vld [vmem:[#allocation35_spill] sm:$0xff] }
 0x757   :  { %2353 = vmatpush1.bf16.msra.mxu0 %v5887_v7  ;;  %2394 = vmatpush1.bf16.msra.mxu1 %v5888_v43  ;;  %v5898_v7 = vld [vmem:[#allocation38_spill] sm:$0xff]  ;;  %v5899_v43 = vld [vmem:[#allocation37_spill] sm:$0xff] }
 0x758   :  { %2354 = vmatprep.subr.bf16.mxu0 %v5889_v30  ;;  %2395 = vmatprep.subr.bf16.mxu1 %v5890_v5  ;;  %v5900_v30 = vld [vmem:[#allocation40_spill] sm:$0xff]  ;;  %v5901_v5 = vld [vmem:[#allocation39_spill] sm:$0xff] }
 0x75b   :  { %2355 = vmatpush1.bf16.msra.mxu0 %v5891_v27  ;;  %2396 = vmatpush1.bf16.msra.mxu1 %v5892_v29  ;;  %v5902_v27 = vld [vmem:[#allocation42_spill] sm:$0xff]  ;;  %v5903_v29 = vld [vmem:[#allocation41_spill] sm:$0xff] }
 0x75c   :  { %2356 = vmatprep.subr.bf16.mxu0 %v5893_v2  ;;  %2397 = vmatprep.subr.bf16.mxu1 %v5894_v24  ;;  %v5904_v2 = vld [vmem:[#allocation44_spill] sm:$0xff]  ;;  %v5905_v24 = vld [vmem:[#allocation43_spill] sm:$0xff] }
 0x75f   :  { %2357 = vmatpush1.bf16.msra.mxu0 %v5895_v63  ;;  %2398 = vmatpush1.bf16.msra.mxu1 %v5896_v19  ;;  %v5906_v63 = vld [vmem:[#allocation46_spill] sm:$0xff]  ;;  %v5907_v19 = vld [vmem:[#allocation45_spill] sm:$0xff] }
 0x760   :  { %2358 = vmatprep.subr.bf16.mxu0 %v5897_v16  ;;  %2399 = vmatprep.subr.bf16.mxu1 %v5898_v7  ;;  %v5908_v16 = vld [vmem:[#allocation48_spill] sm:$0xff]  ;;  %v5909_v7 = vld [vmem:[#allocation47_spill] sm:$0xff] }
 0x763   :  { %2359 = vmatpush1.bf16.msra.mxu0 %v5899_v43  ;;  %2400 = vmatpush1.bf16.msra.mxu1 %v5900_v30  ;;  %v5910_v43 = vld [vmem:[#allocation50_spill] sm:$0xff]  ;;  %v5911_v30 = vld [vmem:[#allocation49_spill] sm:$0xff] }
 0x764   :  { %2360 = vmatprep.subr.bf16.mxu0 %v5901_v5  ;;  %2401 = vmatprep.subr.bf16.mxu1 %v5902_v27  ;;  %v5912_v5 = vld [vmem:[#allocation52_spill] sm:$0xff]  ;;  %v5913_v27 = vld [vmem:[#allocation51_spill] sm:$0xff] }
 0x767   :  { %2361 = vmatpush1.bf16.msra.mxu0 %v5903_v29  ;;  %2402 = vmatpush1.bf16.msra.mxu1 %v5904_v2  ;;  %v5914_v29 = vld [vmem:[#allocation54_spill] sm:$0xff]  ;;  %v5915_v2 = vld [vmem:[#allocation53_spill] sm:$0xff] }
 0x768   :  { %2362 = vmatprep.subr.bf16.mxu0 %v5905_v24  ;;  %2403 = vmatprep.subr.bf16.mxu1 %v5906_v63  ;;  %v5916_v24 = vld [vmem:[#allocation56_spill] sm:$0xff]  ;;  %v5917_v63 = vld [vmem:[#allocation55_spill] sm:$0xff] }
 0x76b   :  { %2363 = vmatpush1.bf16.msra.mxu0 %v5907_v19  ;;  %2404 = vmatpush1.bf16.msra.mxu1 %v5908_v16  ;;  %v5918_v19 = vld [vmem:[#allocation58_spill] sm:$0xff]  ;;  %v5919_v16 = vld [vmem:[#allocation57_spill] sm:$0xff] }
 0x76c   :  { %2364 = vmatprep.subr.bf16.mxu0 %v5909_v7  ;;  %2405 = vmatprep.subr.bf16.mxu1 %v5910_v43  ;;  %v5920_v7 = vld [vmem:[#allocation60_spill] sm:$0xff]  ;;  %v5921_v43 = vld [vmem:[#allocation59_spill] sm:$0xff] }
 0x76f   :  { %2365 = vmatpush1.bf16.msra.mxu0 %v5911_v30  ;;  %2406 = vmatpush1.bf16.msra.mxu1 %v5912_v5  ;;  %v5922_v30 = vld [vmem:[#allocation62_spill] sm:$0xff]  ;;  %v5923_v5 = vld [vmem:[#allocation61_spill] sm:$0xff] }
 0x770   :  { %2366 = vmatprep.subr.bf16.mxu0 %v5913_v27  ;;  %2407 = vmatprep.subr.bf16.mxu1 %v5914_v29  ;;  %v5924_v27 = vld [vmem:[#allocation64_spill] sm:$0xff]  ;;  %v5925_v29 = vld [vmem:[#allocation63_spill] sm:$0xff] }
 0x773   :  { %2367 = vmatpush1.bf16.msra.mxu0 %v5915_v2  ;;  %2408 = vmatpush1.bf16.msra.mxu1 %v5916_v24  ;;  %v5926_v2 = vld [vmem:[#allocation66_spill] sm:$0xff]  ;;  %v5927_v24 = vld [vmem:[#allocation65_spill] sm:$0xff] }
 0x774   :  { %2368 = vmatprep.subr.bf16.mxu0 %v5917_v63  ;;  %2409 = vmatprep.subr.bf16.mxu1 %v5918_v19  ;;  %v5928_v63 = vld [vmem:[#allocation68_spill] sm:$0xff]  ;;  %v5929_v19 = vld [vmem:[#allocation67_spill] sm:$0xff] }
 0x777   :  { %2369 = vmatpush1.bf16.msra.mxu0 %v5919_v16  ;;  %2410 = vmatpush1.bf16.msra.mxu1 %v5920_v7  ;;  %v5930_v16 = vld [vmem:[#allocation71_spill] sm:$0xff]  ;;  %v5931_v7 = vld [vmem:[#allocation70_spill] sm:$0xff] }
 0x778   :  { %2370 = vmatprep.subr.bf16.mxu0 %v5921_v43  ;;  %2411 = vmatprep.subr.bf16.mxu1 %v5922_v30  ;;  %v5932_v43 = vld [vmem:[#allocation73_spill] sm:$0xff]  ;;  %v5933_v30 = vld [vmem:[#allocation72_spill] sm:$0xff] }
 0x77b   :  { %2371 = vmatpush1.bf16.msra.mxu0 %v5923_v5  ;;  %2412 = vmatpush1.bf16.msra.mxu1 %v5924_v27  ;;  %v5934_v5 = vld [vmem:[#allocation75_spill] sm:$0xff]  ;;  %v5935_v27 = vld [vmem:[#allocation74_spill] sm:$0xff] }
 0x77c   :  { %2372 = vmatprep.subr.bf16.mxu0 %v5925_v29  ;;  %2413 = vmatprep.subr.bf16.mxu1 %v5926_v2  ;;  %v5936_v29 = vld [vmem:[#allocation77_spill] sm:$0xff]  ;;  %v5937_v2 = vld [vmem:[#allocation76_spill] sm:$0xff] }
 0x77f   :  { %2373 = vmatpush1.bf16.msra.mxu0 %v5927_v24  ;;  %2414 = vmatpush1.bf16.msra.mxu1 %v5928_v63  ;;  %v5938_v24 = vld [vmem:[#allocation79_spill] sm:$0xff]  ;;  %v5939_v63 = vld [vmem:[#allocation78_spill] sm:$0xff] }
 0x780   :  { %2374 = vmatprep.subr.bf16.mxu0 %v5929_v19  ;;  %2415 = vmatprep.subr.bf16.mxu1 %v5930_v16  ;;  %v5940_v19 = vld [vmem:[#allocation81_spill] sm:$0xff]  ;;  %v5941_v16 = vld [vmem:[#allocation80_spill] sm:$0xff] }
 0x783   :  { %2375 = vmatpush1.bf16.msra.mxu0 %v5931_v7  ;;  %2416 = vmatpush1.bf16.msra.mxu1 %v5932_v43  ;;  %v5942_v7 = vld [vmem:[#allocation82_spill] sm:$0xff]  ;;  %v2304_v43 = vld [vmem:[#allocation6 + $0x60] sm:$0xff] }
 0x784   :  { %2376 = vmatprep.subr.bf16.mxu0 %v5933_v30  ;;  %2417 = vmatprep.subr.bf16.mxu1 %v5934_v5  ;;  %v2306_v30 = vunpack.c.l.bf16 %v2304_v43  ;;  %v2307_v11 = vunpack.c.h.bf16 %v2304_v43 }
 0x787   :  { %2377 = vmatpush1.bf16.msra.mxu0 %v5935_v27  ;;  %2418 = vmatpush1.bf16.msra.mxu1 %v5936_v29 }
 0x788   :  { %2378 = vmatprep.subr.bf16.mxu0 %v5937_v2  ;;  %2419 = vmatprep.subr.bf16.mxu1 %v5938_v24 }
 0x78b   :  { %2379 = vmatpush1.bf16.msra.mxu0 %v5939_v63  ;;  %2420 = vmatpush1.bf16.msra.mxu1 %v5940_v19 }
 0x78c   :  { %2430 = vmatprep.subr.bf16.mxu0 %v5941_v16  ;;  %2471 = vmatprep.subr.bf16.mxu1 %v5942_v7  ;;  %v2308_v16 = vunpack.c.l.bf16 %v2305_v15 }
 0x7e1   :  { %v2143_v5 = vpop.f32.mrb[40].mxu0  ;;  %v2184_v48 = vpop.f32.mrb[40].mxu1 }
 0x7e2   :  { %v2310_v27 = vadd.f32 %v2306_v30, %v2143_v5  ;;  %v2145_v29 = vpop.f32.mrb[41].mxu0  ;;  %v2186_v60 = vpop.f32.mrb[41].mxu1  ;;  %v2312_v43 = vadd.f32 %v2308_v16, %v2184_v48 }
 0x7e3   :  { %v2311_v2 = vadd.f32 %v2307_v11, %v2145_v29  ;;  %v2147_v56 = vpop.f32.mrb[42].mxu0  ;;  %v2188_v24 = vpop.f32.mrb[42].mxu1  ;;  %v2313_v7 = vadd.f32 %v2309_v52, %v2186_v60 }
 0x7e4   :  { %v3095_v22 = vmul.f32 -1.442695, %v2310_v27  ;;  %v2148_v63 = vpop.f32.mrb[43].mxu0  ;;  %v2189_v1 = vpop.f32.mrb[43].mxu1 }
 0x7e5   :  { %v3096_v19 = vmul.f32 -1.442695, %v2311_v2  ;;  %v3097_v8 = vmul.f32 -1.442695, %v2313_v7 }
 0x7e6   :  { %3362 = vpow2.f32 %v3095_v22 }
 0x7e7   :  { %3364 = vpow2.f32 %v3096_v19 }
 0x7e8   :  { %3366 = vpow2.f32 %v3097_v8 }
 0x7e9   :  { %3368 = vtanh.f32 %v2312_v43 }
 0x7f0   :  { %v3363_v45 = vpop.eup %3362 }
 0x7f1   :  { %v3365_v21 = vpop.eup %3364  ;;  %v2317_v5 = vadd.f32 1.0, %v3363_v45 }
 0x7f2   :  { %v2323_v30 = vadd.f32 1.0, %v3365_v21  ;;  %v3367_v56 = vpop.eup %3366 }
 0x7f3   :  { %3370 = vrcp.f32 %v2317_v5  ;;  %v3369_v29 = vpop.eup %3368  ;;  %v2330_v63 = vadd.f32 1.0, %v3367_v56 }
 0x7f4   :  { %3372 = vrcp.f32 %v2323_v30 }
 0x7f5   :  { %3374 = vrcp.f32 %v2330_v63 }
 0x7fd   :  { %v3371_v24 = vpop.eup %3370 }
 0x7fe   :  { %v3373_v1 = vpop.eup %3372  ;;  %v2334_v2 = vmul.f32 %v3371_v24, %v3369_v29 }
 0x7ff   :  { %v2333_v22 = vmul.f32 %v3373_v1, %v4669_v54  ;;  %v3375_v60 = vpop.eup %3374 }
 0x801   :  { %v4815_v52 = vadd.f32 %v2334_v2, %v2333_v22 }
 0x803   :  { %3376 = vtanh.f32 %v4815_v52 }
 0x80d   :  { %v3377_v45 = vpop.eup %3376 }
 0x80e   :  { %v2337_v8 = vmul.f32 %v3377_v45, %v3375_v60 }
 0x810   :  { %v2338_v15 = vpack.c.bf16 %v2337_v8, %v2337_v8 }
 0x812   :  { %2339 = vst [vmem:[#allocation2] sm:$0xf] %v2338_v15 }
 0x821   :  { %v2225_v21 = vpop.f32.mrb[44].mxu0  ;;  %v2266_v48 = vpop.f32.mrb[44].mxu1 }
 0x822   :  { %v2273_v19 = vadd.f32 %v2225_v21, %v5576_v42  ;;  %v2227_v16 = vpop.f32.mrb[45].mxu0  ;;  %v2268_v7 = vpop.f32.mrb[45].mxu1  ;;  %v2275_v1 = vadd.f32 %v2266_v48, %v4090_v36 }
 0x823   :  { %v2274_v11 = vadd.f32 %v2227_v16, %v4083_v20  ;;  %v2229_v27 = vpop.f32.mrb[46].mxu0  ;;  %v2270_v54 = vpop.f32.mrb[46].mxu1  ;;  %v2276_v29 = vadd.f32 %v2268_v7, %v4087_v46 }
 0x824   :  { %v3092_v43 = vmul.f32 -1.442695, %v2273_v19  ;;  %v2230_v5 = vpop.f32.mrb[47].mxu0  ;;  %v2271_v30 = vpop.f32.mrb[47].mxu1 }
 0x825   :  { %v3093_v56 = vmul.f32 -1.442695, %v2274_v11  ;;  %v3094_v24 = vmul.f32 -1.442695, %v2276_v29  ;;  %v5944_v29 = vld [vmem:[#allocation119_spill] sm:$0xff] }
 0x826   :  { %3378 = vpow2.f32 %v3092_v43 }
 0x827   :  { %3380 = vpow2.f32 %v3093_v56 }
 0x828   :  { %3382 = vpow2.f32 %v3094_v24  ;;  %v5945_v24 = vld [vmem:[#allocation120_spill] sm:$0xff] }
 0x829   :  { %3384 = vtanh.f32 %v2275_v1  ;;  %v5946_v1 = vld [vmem:[#allocation121_spill] sm:$0xff] }
 0x830   :  { %v3379_v2 = vpop.eup %3378 }
 0x831   :  { %v3381_v63 = vpop.eup %3380  ;;  %v2280_v22 = vadd.f32 1.0, %v3379_v2  ;;  %v5947_v2 = vld [vmem:[#allocation122_spill] sm:$0xff] }
 0x832   :  { %v2286_v60 = vadd.f32 1.0, %v3381_v63  ;;  %v3383_v45 = vpop.eup %3382  ;;  %v5948_v63 = vld [vmem:[#allocation123_spill] sm:$0xff] }
 0x833   :  { %3386 = vrcp.f32 %v2280_v22  ;;  %v3385_v8 = vpop.eup %3384  ;;  %v2293_v16 = vadd.f32 1.0, %v3383_v45  ;;  %v5949_v22 = vld [vmem:[#allocation124_spill] sm:$0xff]  ;;  %v5951_v45 = vld [vmem:[#allocation126_spill] sm:$0xff] }
 0x834   :  { %3388 = vrcp.f32 %v2286_v60  ;;  %v5950_v60 = vld [vmem:[#allocation125_spill] sm:$0xff] }
 0x835   :  { %3390 = vrcp.f32 %v2293_v16  ;;  %v5956_v16 = vld [vmem:[#allocation131_spill] sm:$0xff] }
 0x83d   :  { %v3387_v15 = vpop.eup %3386 }
 0x83e   :  { %v3389_v21 = vpop.eup %3388  ;;  %v2297_v19 = vmul.f32 %v3387_v15, %v3385_v8  ;;  %v5952_v8 = vld [vmem:[#allocation127_spill] sm:$0xff]  ;;  %v5953_v15 = vld [vmem:[#allocation128_spill] sm:$0xff] }
 0x83f   :  { %v2296_v11 = vmul.f32 %v3389_v21, %v4677_v0  ;;  %v3391_v48 = vpop.eup %3390  ;;  %v5943_v0 = vld [vmem:[#allocation118_spill] sm:$0xff]  ;;  %v5954_v21 = vld [vmem:[#allocation129_spill] sm:$0xff] }
 0x841   :  { %v4823_v7 = vadd.f32 %v2297_v19, %v2296_v11  ;;  %v5955_v19 = vld [vmem:[#allocation130_spill] sm:$0xff]  ;;  %v5957_v11 = vld [vmem:[#allocation132_spill] sm:$0xff] }
 0x843   :  { %3392 = vtanh.f32 %v4823_v7 }
 0x84d   :  { %v3393_v27 = vpop.eup %3392 }
 0x84e   :  { %v2300_v54 = vmul.f32 %v3393_v27, %v3391_v48  ;;  %v5958_v48 = vld [vmem:[#allocation133_spill] sm:$0xff]  ;;  %v5959_v27 = vld [vmem:[#allocation134_spill] sm:$0xff] }
 0x850   :  { %v2301_v43 = vpack.c.bf16 %v2300_v54, %v2300_v54  ;;  %v5960_v54 = vld [vmem:[#allocation135_spill] sm:$0xff] }
 0x852   :  { %2302 = vst [vmem:[#allocation2 + $0x4] sm:$0xf] %v2301_v43  ;;  %v5961_v43 = vld [vmem:[#allocation136_spill] sm:$0xff] }
 0x859   :  { %v2340_v5 = vld [vmem:[#allocation2] sm:$0xff] }
 0x85a   :  { %v3099_v30 = vcombine.high %v2340_v5, %v2340_v5  ;;  %v4826_v56 = vcombine.low %v2340_v5, %v2340_v5  ;;  %v5962_v5 = vld [vmem:[#allocation137_spill] sm:$0xff] }
 0x85c   :  { %2380 = vmatprep.mubr.bf16.mxu0 %v3099_v30  ;;  %2421 = vmatprep.mubr.bf16.mxu1 %v3099_v30 }
 0x85d   :  { %2381 = vmatmul.mubr.bf16.vlgmr.msra.gmra.mrb[48].mxu0 %v4826_v56  ;;  %2422 = vmatmul.mubr.bf16.vlgmr.msra.gmra.mrb[48].mxu1 %v4826_v56 }
 0x85e   :  { %2431 = vmatpush1.bf16.msra.mxu0 %v3818_v9  ;;  %2472 = vmatpush1.bf16.msra.mxu1 %v5489_v44 }
 0x85f   :  { %2462 = vmatprep.mubr.bf16.mxu0 %v3099_v30  ;;  %2503 = vmatprep.mubr.bf16.mxu1 %v3099_v30  ;;  %v5963_v30 = vld [vmem:[#allocation138_spill] sm:$0xff] }
 0x860   :  { %2432 = vmatprep.subr.bf16.mxu0 %v5490_v49  ;;  %2473 = vmatprep.subr.bf16.mxu1 %v5491_v6 }
 0x862   :  { %2433 = vmatpush1.bf16.msra.mxu0 %v5492_v35  ;;  %2474 = vmatpush1.bf16.msra.mxu1 %v5493_v37 }
 0x863   :  { %2434 = vmatprep.subr.bf16.mxu0 %v5494_v3  ;;  %2475 = vmatprep.subr.bf16.mxu1 %v5577_v58 }
 0x866   :  { %2435 = vmatpush1.bf16.msra.mxu0 %v5578_v26  ;;  %2476 = vmatpush1.bf16.msra.mxu1 %v5579_v47 }
 0x867   :  { %2436 = vmatprep.subr.bf16.mxu0 %v5580_v32  ;;  %2477 = vmatprep.subr.bf16.mxu1 %v5581_v17 }
 0x86a   :  { %2437 = vmatpush1.bf16.msra.mxu0 %v5582_v25  ;;  %2478 = vmatpush1.bf16.msra.mxu1 %v5583_v34 }
 0x86b   :  { %2438 = vmatprep.subr.bf16.mxu0 %v5584_v23  ;;  %2479 = vmatprep.subr.bf16.mxu1 %v5667_v59 }
 0x86e   :  { %2439 = vmatpush1.bf16.msra.mxu0 %v5668_v12  ;;  %2480 = vmatpush1.bf16.msra.mxu1 %v5669_v14 }
 0x86f   :  { %2440 = vmatprep.subr.bf16.mxu0 %v5670_v53  ;;  %2481 = vmatprep.subr.bf16.mxu1 %v5671_v18 }
 0x872   :  { %2441 = vmatpush1.bf16.msra.mxu0 %v5672_v57  ;;  %2482 = vmatpush1.bf16.msra.mxu1 %v5673_v28 }
 0x873   :  { %2442 = vmatprep.subr.bf16.mxu0 %v5674_v4  ;;  %2483 = vmatprep.subr.bf16.mxu1 %v5675_v13 }
 0x876   :  { %2443 = vmatpush1.bf16.msra.mxu0 %v5676_v55  ;;  %2484 = vmatpush1.bf16.msra.mxu1 %v5677_v38 }
 0x877   :  { %2444 = vmatprep.subr.bf16.mxu0 %v5596_v51  ;;  %2485 = vmatprep.subr.bf16.mxu1 %v5597_v10 }
 0x87a   :  { %2445 = vmatpush1.bf16.msra.mxu0 %v5598_v50  ;;  %2486 = vmatpush1.bf16.msra.mxu1 %v5678_v61 }
 0x87b   :  { %2446 = vmatprep.subr.bf16.mxu0 %v5600_v62  ;;  %2487 = vmatprep.subr.bf16.mxu1 %v5601_v39 }
 0x87e   :  { %2447 = vmatpush1.bf16.msra.mxu0 %v5602_v33  ;;  %2488 = vmatpush1.bf16.msra.mxu1 %v5603_v41 }
 0x87f   :  { %2448 = vmatprep.subr.bf16.mxu0 %v5604_v40  ;;  %2489 = vmatprep.subr.bf16.mxu1 %v5605_v31 }
 0x882   :  { %2449 = vmatpush1.bf16.msra.mxu0 %v5943_v0  ;;  %2490 = vmatpush1.bf16.msra.mxu1 %v5944_v29 }
 0x883   :  { %2450 = vmatprep.subr.bf16.mxu0 %v5945_v24  ;;  %2491 = vmatprep.subr.bf16.mxu1 %v5946_v1 }
 0x886   :  { %2451 = vmatpush1.bf16.msra.mxu0 %v5947_v2  ;;  %2492 = vmatpush1.bf16.msra.mxu1 %v5948_v63 }
 0x887   :  { %2452 = vmatprep.subr.bf16.mxu0 %v5949_v22  ;;  %2493 = vmatprep.subr.bf16.mxu1 %v5950_v60 }
 0x88a   :  { %2453 = vmatpush1.bf16.msra.mxu0 %v5951_v45  ;;  %2494 = vmatpush1.bf16.msra.mxu1 %v5952_v8  ;;  %v2544_v45 = vld [vmem:[#allocation6 + $0x78] sm:$0xff] }
 0x88b   :  { %2454 = vmatprep.subr.bf16.mxu0 %v5953_v15  ;;  %2495 = vmatprep.subr.bf16.mxu1 %v5954_v21  ;;  %v5964_v15 = vld [vmem:[#allocation139_spill] sm:$0xff]  ;;  %v5965_v21 = vld [vmem:[#allocation140_spill] sm:$0xff]  ;;  %v2548_v1 = vunpack.c.h.bf16 %v2544_v45 }
 0x88e   :  { %2455 = vmatpush1.bf16.msra.mxu0 %v5955_v19  ;;  %2496 = vmatpush1.bf16.msra.mxu1 %v5956_v16  ;;  %v5966_v19 = vld [vmem:[#allocation141_spill] sm:$0xff]  ;;  %v5967_v16 = vld [vmem:[#allocation142_spill] sm:$0xff] }
 0x88f   :  { %2456 = vmatprep.subr.bf16.mxu0 %v5957_v11  ;;  %2497 = vmatprep.subr.bf16.mxu1 %v5958_v48  ;;  %v5968_v11 = vld [vmem:[#allocation143_spill] sm:$0xff]  ;;  %v5969_v48 = vld [vmem:[#allocation16_spill] sm:$0xff] }
 0x892   :  { %2457 = vmatpush1.bf16.msra.mxu0 %v5959_v27  ;;  %2498 = vmatpush1.bf16.msra.mxu1 %v5960_v54  ;;  %v5970_v27 = vld [vmem:[#allocation20_spill] sm:$0xff] }
 0x893   :  { %2458 = vmatprep.subr.bf16.mxu0 %v5961_v43  ;;  %2499 = vmatprep.subr.bf16.mxu1 %v5962_v5  ;;  %v5971_v5 = vld [vmem:[#allocation17_spill] sm:$0xff]  ;;  %v5980_v43 = vld [vmem:[#allocation28_spill] sm:$0xff] }
 0x896   :  { %2459 = vmatpush1.bf16.msra.mxu0 %v5963_v30  ;;  %2500 = vmatpush1.bf16.msra.mxu1 %v5964_v15  ;;  %v5972_v30 = vld [vmem:[#allocation21_spill] sm:$0xff]  ;;  %v5973_v15 = vld [vmem:[#allocation18_spill] sm:$0xff] }
 0x897   :  { %2460 = vmatprep.subr.bf16.mxu0 %v5965_v21  ;;  %2501 = vmatprep.subr.bf16.mxu1 %v5966_v19  ;;  %v5974_v21 = vld [vmem:[#allocation23_spill] sm:$0xff] }
 0x898   :  { %v5975_v19 = vld [vmem:[#allocation19_spill] sm:$0xff] }
 0x89a   :  { %2461 = vmatpush1.bf16.msra.mxu0 %v5967_v16  ;;  %2502 = vmatpush1.bf16.msra.mxu1 %v5968_v11  ;;  %v5976_v16 = vld [vmem:[#allocation24_spill] sm:$0xff]  ;;  %v5977_v11 = vld [vmem:[#allocation22_spill] sm:$0xff] }
 0x89b   :  { %2587 = vmatprep.subr.bf16.mxu0 %v5969_v48  ;;  %2628 = vmatprep.subr.bf16.mxu1 %v5970_v27  ;;  %v5978_v48 = vld [vmem:[#allocation26_spill] sm:$0xff]  ;;  %v5979_v27 = vld [vmem:[#allocation25_spill] sm:$0xff] }
 0x89d   :  { %2463 = vmatmul.mubr.bf16.vlgmr.msra.gmra.mrb[52].mxu0 %v4826_v56  ;;  %2504 = vmatmul.mubr.bf16.vlgmr.msra.gmra.mrb[52].mxu1 %v4826_v56  ;;  %v5981_v56 = vld [vmem:[#allocation27_spill] sm:$0xff] }
 0x89e   :  { %2588 = vmatpush1.bf16.msra.mxu0 %v5971_v5  ;;  %2629 = vmatpush1.bf16.msra.mxu1 %v5972_v30  ;;  %v5982_v5 = vld [vmem:[#allocation30_spill] sm:$0xff]  ;;  %v5983_v30 = vld [vmem:[#allocation29_spill] sm:$0xff] }
 0x89f   :  { %2589 = vmatprep.subr.bf16.mxu0 %v5973_v15  ;;  %2630 = vmatprep.subr.bf16.mxu1 %v5974_v21  ;;  %v5984_v15 = vld [vmem:[#allocation32_spill] sm:$0xff]  ;;  %v5985_v21 = vld [vmem:[#allocation31_spill] sm:$0xff] }
 0x8a2   :  { %2590 = vmatpush1.bf16.msra.mxu0 %v5975_v19  ;;  %2631 = vmatpush1.bf16.msra.mxu1 %v5976_v16  ;;  %v5986_v19 = vld [vmem:[#allocation34_spill] sm:$0xff]  ;;  %v5987_v16 = vld [vmem:[#allocation33_spill] sm:$0xff] }
 0x8a3   :  { %2591 = vmatprep.subr.bf16.mxu0 %v5977_v11  ;;  %2632 = vmatprep.subr.bf16.mxu1 %v5978_v48  ;;  %v5988_v11 = vld [vmem:[#allocation36_spill] sm:$0xff]  ;;  %v5989_v48 = vld [vmem:[#allocation35_spill] sm:$0xff] }
 0x8a6   :  { %2592 = vmatpush1.bf16.msra.mxu0 %v5979_v27  ;;  %2633 = vmatpush1.bf16.msra.mxu1 %v5980_v43  ;;  %v5990_v27 = vld [vmem:[#allocation38_spill] sm:$0xff]  ;;  %v5991_v43 = vld [vmem:[#allocation37_spill] sm:$0xff] }
 0x8a7   :  { %2593 = vmatprep.subr.bf16.mxu0 %v5981_v56  ;;  %2634 = vmatprep.subr.bf16.mxu1 %v5982_v5  ;;  %v5992_v56 = vld [vmem:[#allocation40_spill] sm:$0xff]  ;;  %v5993_v5 = vld [vmem:[#allocation39_spill] sm:$0xff] }
 0x8aa   :  { %2594 = vmatpush1.bf16.msra.mxu0 %v5983_v30  ;;  %2635 = vmatpush1.bf16.msra.mxu1 %v5984_v15  ;;  %v5994_v30 = vld [vmem:[#allocation42_spill] sm:$0xff]  ;;  %v5995_v15 = vld [vmem:[#allocation41_spill] sm:$0xff] }
 0x8ab   :  { %2595 = vmatprep.subr.bf16.mxu0 %v5985_v21  ;;  %2636 = vmatprep.subr.bf16.mxu1 %v5986_v19  ;;  %v5996_v21 = vld [vmem:[#allocation44_spill] sm:$0xff]  ;;  %v5997_v19 = vld [vmem:[#allocation43_spill] sm:$0xff] }
 0x8ae   :  { %2596 = vmatpush1.bf16.msra.mxu0 %v5987_v16  ;;  %2637 = vmatpush1.bf16.msra.mxu1 %v5988_v11  ;;  %v5998_v16 = vld [vmem:[#allocation46_spill] sm:$0xff]  ;;  %v5999_v11 = vld [vmem:[#allocation45_spill] sm:$0xff] }
 0x8af   :  { %2597 = vmatprep.subr.bf16.mxu0 %v5989_v48  ;;  %2638 = vmatprep.subr.bf16.mxu1 %v5990_v27  ;;  %v6000_v48 = vld [vmem:[#allocation48_spill] sm:$0xff]  ;;  %v6001_v27 = vld [vmem:[#allocation47_spill] sm:$0xff] }
 0x8b2   :  { %2598 = vmatpush1.bf16.msra.mxu0 %v5991_v43  ;;  %2639 = vmatpush1.bf16.msra.mxu1 %v5992_v56  ;;  %v6002_v43 = vld [vmem:[#allocation50_spill] sm:$0xff]  ;;  %v6003_v56 = vld [vmem:[#allocation49_spill] sm:$0xff] }
 0x8b3   :  { %2599 = vmatprep.subr.bf16.mxu0 %v5993_v5  ;;  %2640 = vmatprep.subr.bf16.mxu1 %v5994_v30  ;;  %v6004_v5 = vld [vmem:[#allocation52_spill] sm:$0xff]  ;;  %v6005_v30 = vld [vmem:[#allocation51_spill] sm:$0xff] }
 0x8b6   :  { %2600 = vmatpush1.bf16.msra.mxu0 %v5995_v15  ;;  %2641 = vmatpush1.bf16.msra.mxu1 %v5996_v21  ;;  %v6006_v15 = vld [vmem:[#allocation54_spill] sm:$0xff]  ;;  %v6007_v21 = vld [vmem:[#allocation53_spill] sm:$0xff] }
 0x8b7   :  { %2601 = vmatprep.subr.bf16.mxu0 %v5997_v19  ;;  %2642 = vmatprep.subr.bf16.mxu1 %v5998_v16  ;;  %v6008_v19 = vld [vmem:[#allocation56_spill] sm:$0xff]  ;;  %v6009_v16 = vld [vmem:[#allocation55_spill] sm:$0xff] }
 0x8ba   :  { %2602 = vmatpush1.bf16.msra.mxu0 %v5999_v11  ;;  %2643 = vmatpush1.bf16.msra.mxu1 %v6000_v48  ;;  %v6010_v11 = vld [vmem:[#allocation58_spill] sm:$0xff]  ;;  %v6011_v48 = vld [vmem:[#allocation57_spill] sm:$0xff] }
 0x8bb   :  { %2603 = vmatprep.subr.bf16.mxu0 %v6001_v27  ;;  %2644 = vmatprep.subr.bf16.mxu1 %v6002_v43  ;;  %v6012_v27 = vld [vmem:[#allocation60_spill] sm:$0xff]  ;;  %v6013_v43 = vld [vmem:[#allocation59_spill] sm:$0xff] }
 0x8be   :  { %2604 = vmatpush1.bf16.msra.mxu0 %v6003_v56  ;;  %2645 = vmatpush1.bf16.msra.mxu1 %v6004_v5  ;;  %v6014_v56 = vld [vmem:[#allocation62_spill] sm:$0xff]  ;;  %v6015_v5 = vld [vmem:[#allocation61_spill] sm:$0xff] }
 0x8bf   :  { %2605 = vmatprep.subr.bf16.mxu0 %v6005_v30  ;;  %2646 = vmatprep.subr.bf16.mxu1 %v6006_v15  ;;  %v6016_v30 = vld [vmem:[#allocation64_spill] sm:$0xff]  ;;  %v6017_v15 = vld [vmem:[#allocation63_spill] sm:$0xff] }
 0x8c2   :  { %2606 = vmatpush1.bf16.msra.mxu0 %v6007_v21  ;;  %2647 = vmatpush1.bf16.msra.mxu1 %v6008_v19  ;;  %v6018_v21 = vld [vmem:[#allocation66_spill] sm:$0xff]  ;;  %v6019_v19 = vld [vmem:[#allocation65_spill] sm:$0xff] }
 0x8c3   :  { %2607 = vmatprep.subr.bf16.mxu0 %v6009_v16  ;;  %2648 = vmatprep.subr.bf16.mxu1 %v6010_v11  ;;  %v6020_v16 = vld [vmem:[#allocation68_spill] sm:$0xff]  ;;  %v6021_v11 = vld [vmem:[#allocation67_spill] sm:$0xff] }
 0x8c6   :  { %2608 = vmatpush1.bf16.msra.mxu0 %v6011_v48  ;;  %2649 = vmatpush1.bf16.msra.mxu1 %v6012_v27  ;;  %v6022_v48 = vld [vmem:[#allocation71_spill] sm:$0xff]  ;;  %v6023_v27 = vld [vmem:[#allocation70_spill] sm:$0xff] }
 0x8c7   :  { %2609 = vmatprep.subr.bf16.mxu0 %v6013_v43  ;;  %2650 = vmatprep.subr.bf16.mxu1 %v6014_v56  ;;  %v6024_v43 = vld [vmem:[#allocation73_spill] sm:$0xff]  ;;  %v6025_v56 = vld [vmem:[#allocation72_spill] sm:$0xff] }
 0x8ca   :  { %2610 = vmatpush1.bf16.msra.mxu0 %v6015_v5  ;;  %2651 = vmatpush1.bf16.msra.mxu1 %v6016_v30  ;;  %v6026_v5 = vld [vmem:[#allocation75_spill] sm:$0xff]  ;;  %v6027_v30 = vld [vmem:[#allocation74_spill] sm:$0xff] }
 0x8cb   :  { %2611 = vmatprep.subr.bf16.mxu0 %v6017_v15  ;;  %2652 = vmatprep.subr.bf16.mxu1 %v6018_v21  ;;  %v6028_v15 = vld [vmem:[#allocation77_spill] sm:$0xff]  ;;  %v6029_v21 = vld [vmem:[#allocation76_spill] sm:$0xff] }
 0x8ce   :  { %2612 = vmatpush1.bf16.msra.mxu0 %v6019_v19  ;;  %2653 = vmatpush1.bf16.msra.mxu1 %v6020_v16  ;;  %v6030_v19 = vld [vmem:[#allocation79_spill] sm:$0xff]  ;;  %v6031_v16 = vld [vmem:[#allocation78_spill] sm:$0xff] }
 0x8cf   :  { %2613 = vmatprep.subr.bf16.mxu0 %v6021_v11  ;;  %2654 = vmatprep.subr.bf16.mxu1 %v6022_v48  ;;  %v6032_v11 = vld [vmem:[#allocation81_spill] sm:$0xff]  ;;  %v6033_v48 = vld [vmem:[#allocation80_spill] sm:$0xff] }
 0x8d2   :  { %2614 = vmatpush1.bf16.msra.mxu0 %v6023_v27  ;;  %2655 = vmatpush1.bf16.msra.mxu1 %v6024_v43  ;;  %v6034_v27 = vld [vmem:[#allocation82_spill] sm:$0xff]  ;;  %v2543_v43 = vld [vmem:[#allocation6 + $0x70] sm:$0xff] }
 0x8d3   :  { %2615 = vmatprep.subr.bf16.mxu0 %v6025_v56  ;;  %2656 = vmatprep.subr.bf16.mxu1 %v6026_v5  ;;  %v2545_v56 = vunpack.c.l.bf16 %v2543_v43  ;;  %v2546_v54 = vunpack.c.h.bf16 %v2543_v43 }
 0x8d6   :  { %2616 = vmatpush1.bf16.msra.mxu0 %v6027_v30  ;;  %2657 = vmatpush1.bf16.msra.mxu1 %v6028_v15 }
 0x8d7   :  { %2617 = vmatprep.subr.bf16.mxu0 %v6029_v21  ;;  %2658 = vmatprep.subr.bf16.mxu1 %v6030_v19 }
 0x8da   :  { %2618 = vmatpush1.bf16.msra.mxu0 %v6031_v16  ;;  %2659 = vmatpush1.bf16.msra.mxu1 %v6032_v11 }
 0x8db   :  { %2669 = vmatprep.subr.bf16.mxu0 %v6033_v48  ;;  %2710 = vmatprep.subr.bf16.mxu1 %v6034_v27  ;;  %v2547_v27 = vunpack.c.l.bf16 %v2544_v45 }
 0x930   :  { %v2382_v5 = vpop.f32.mrb[48].mxu0  ;;  %v2423_v8 = vpop.f32.mrb[48].mxu1 }
 0x931   :  { %v2549_v30 = vadd.f32 %v2545_v56, %v2382_v5  ;;  %v2384_v15 = vpop.f32.mrb[49].mxu0  ;;  %v2425_v60 = vpop.f32.mrb[49].mxu1  ;;  %v2551_v43 = vadd.f32 %v2547_v27, %v2423_v8 }
 0x932   :  { %v2550_v21 = vadd.f32 %v2546_v54, %v2384_v15  ;;  %v2386_v22 = vpop.f32.mrb[50].mxu0  ;;  %v2427_v19 = vpop.f32.mrb[50].mxu1  ;;  %v2552_v48 = vadd.f32 %v2548_v1, %v2425_v60 }
 0x933   :  { %v3103_v63 = vmul.f32 -1.442695, %v2549_v30  ;;  %v2387_v16 = vpop.f32.mrb[51].mxu0  ;;  %v2428_v2 = vpop.f32.mrb[51].mxu1 }
 0x934   :  { %v3104_v11 = vmul.f32 -1.442695, %v2550_v21  ;;  %v3105_v24 = vmul.f32 -1.442695, %v2552_v48 }
 0x935   :  { %3394 = vpow2.f32 %v3103_v63 }
 0x936   :  { %3396 = vpow2.f32 %v3104_v11 }
 0x937   :  { %3398 = vpow2.f32 %v3105_v24 }
 0x938   :  { %3400 = vtanh.f32 %v2551_v43 }
 0x93f   :  { %v3395_v29 = vpop.eup %3394 }
 0x940   :  { %v3397_v0 = vpop.eup %3396  ;;  %v2556_v56 = vadd.f32 1.0, %v3395_v29 }
 0x941   :  { %v2562_v5 = vadd.f32 1.0, %v3397_v0  ;;  %v3399_v22 = vpop.eup %3398 }
 0x942   :  { %3402 = vrcp.f32 %v2556_v56  ;;  %v3401_v54 = vpop.eup %3400  ;;  %v2569_v21 = vadd.f32 1.0, %v3399_v22 }
 0x943   :  { %3404 = vrcp.f32 %v2562_v5 }
 0x944   :  { %3406 = vrcp.f32 %v2569_v21 }
 0x94c   :  { %v3403_v30 = vpop.eup %3402 }
 0x94d   :  { %v3405_v2 = vpop.eup %3404  ;;  %v2573_v15 = vmul.f32 %v3403_v30, %v3401_v54 }
 0x94e   :  { %v2572_v63 = vmul.f32 %v3405_v2, %v4815_v52  ;;  %v3407_v60 = vpop.eup %3406 }
 0x950   :  { %v2574_v1 = vadd.f32 %v2573_v15, %v2572_v63 }
 0x952   :  { %3408 = vtanh.f32 %v2574_v1 }
 0x95c   :  { %v3409_v45 = vpop.eup %3408 }
 0x95d   :  { %v2576_v8 = vmul.f32 %v3409_v45, %v3407_v60 }
 0x95f   :  { %v2577_v29 = vpack.c.bf16 %v2576_v8, %v2576_v8 }
 0x961   :  { %2578 = vst [vmem:[#allocation2] sm:$0xf] %v2577_v29 }
 0x970   :  { %v2464_v24 = vpop.f32.mrb[52].mxu0  ;;  %v2505_v0 = vpop.f32.mrb[52].mxu1 }
 0x971   :  { %v2512_v19 = vadd.f32 %v2464_v24, %v5576_v42  ;;  %v2466_v16 = vpop.f32.mrb[53].mxu0  ;;  %v2507_v11 = vpop.f32.mrb[53].mxu1  ;;  %v2514_v2 = vadd.f32 %v2505_v0, %v4090_v36 }
 0x972   :  { %v2513_v48 = vadd.f32 %v2466_v16, %v4083_v20  ;;  %v2468_v27 = vpop.f32.mrb[54].mxu0  ;;  %v2509_v43 = vpop.f32.mrb[54].mxu1  ;;  %v2515_v54 = vadd.f32 %v2507_v11, %v4087_v46 }
 0x973   :  { %v3100_v56 = vmul.f32 -1.442695, %v2512_v19  ;;  %v2469_v52 = vpop.f32.mrb[55].mxu0  ;;  %v2510_v5 = vpop.f32.mrb[55].mxu1 }
 0x974   :  { %v3101_v22 = vmul.f32 -1.442695, %v2513_v48  ;;  %v3102_v30 = vmul.f32 -1.442695, %v2515_v54 }
 0x975   :  { %3410 = vpow2.f32 %v3100_v56 }
 0x976   :  { %3412 = vpow2.f32 %v3101_v22 }
 0x977   :  { %3414 = vpow2.f32 %v3102_v30 }
 0x978   :  { %3416 = vtanh.f32 %v2514_v2 }
 0x97f   :  { %v3411_v15 = vpop.eup %3410 }
 0x980   :  { %v3413_v21 = vpop.eup %3412  ;;  %v2519_v63 = vadd.f32 1.0, %v3411_v15 }
 0x981   :  { %v2525_v1 = vadd.f32 1.0, %v3413_v21  ;;  %v3415_v60 = vpop.eup %3414 }
 0x982   :  { %3418 = vrcp.f32 %v2519_v63  ;;  %v3417_v45 = vpop.eup %3416  ;;  %v2532_v19 = vadd.f32 1.0, %v3415_v60 }
 0x983   :  { %3420 = vrcp.f32 %v2525_v1 }
 0x984   :  { %3422 = vrcp.f32 %v2532_v19 }
 0x98c   :  { %v3419_v8 = vpop.eup %3418 }
 0x98d   :  { %v3421_v29 = vpop.eup %3420  ;;  %v2536_v24 = vmul.f32 %v3419_v8, %v3417_v45 }
 0x98e   :  { %v2535_v16 = vmul.f32 %v3421_v29, %v4823_v7  ;;  %v3423_v0 = vpop.eup %3422 }
 0x990   :  { %v4966_v11 = vadd.f32 %v2536_v24, %v2535_v16 }
 0x992   :  { %3424 = vtanh.f32 %v4966_v11 }
 0x99c   :  { %v3425_v48 = vpop.eup %3424 }
 0x99d   :  { %v2539_v27 = vmul.f32 %v3425_v48, %v3423_v0 }
 0x99f   :  { %v2540_v43 = vpack.c.bf16 %v2539_v27, %v2539_v27 }
 0x9a1   :  { %2541 = vst [vmem:[#allocation2 + $0x4] sm:$0xf] %v2540_v43 }
 0x9a8   :  { %v2579_v56 = vld [vmem:[#allocation2] sm:$0xff] }
 0x9a9   :  { %v3107_v52 = vcombine.high %v2579_v56, %v2579_v56  ;;  %v4969_v5 = vcombine.low %v2579_v56, %v2579_v56 }
 0x9ab   :  { %2619 = vmatprep.mubr.bf16.mxu0 %v3107_v52  ;;  %2660 = vmatprep.mubr.bf16.mxu1 %v3107_v52 }
 0x9ac   :  { %2620 = vmatmul.mubr.bf16.vlgmr.msra.gmra.mrb[56].mxu0 %v4969_v5  ;;  %2661 = vmatmul.mubr.bf16.vlgmr.msra.gmra.mrb[56].mxu1 %v4969_v5 }
 0x9ad   :  { %2670 = vmatpush1.bf16.msra.mxu0 %v3818_v9  ;;  %2711 = vmatpush1.bf16.msra.mxu1 %v5489_v44  ;;  %v6035_v9 = vld [vmem:[#allocation118_spill] sm:$0xff]  ;;  %v6036_v44 = vld [vmem:[#allocation119_spill] sm:$0xff] }
 0x9ae   :  { %2701 = vmatprep.mubr.bf16.mxu0 %v3107_v52  ;;  %2742 = vmatprep.mubr.bf16.mxu1 %v3107_v52 }
 0x9af   :  { %2671 = vmatprep.subr.bf16.mxu0 %v5490_v49  ;;  %2712 = vmatprep.subr.bf16.mxu1 %v5491_v6  ;;  %v6037_v49 = vld [vmem:[#allocation120_spill] sm:$0xff]  ;;  %v6038_v6 = vld [vmem:[#allocation121_spill] sm:$0xff] }
 0x9b1   :  { %2672 = vmatpush1.bf16.msra.mxu0 %v5492_v35  ;;  %2713 = vmatpush1.bf16.msra.mxu1 %v5493_v37  ;;  %v6039_v35 = vld [vmem:[#allocation122_spill] sm:$0xff]  ;;  %v6040_v37 = vld [vmem:[#allocation123_spill] sm:$0xff] }
 0x9b2   :  { %2673 = vmatprep.subr.bf16.mxu0 %v5494_v3  ;;  %2714 = vmatprep.subr.bf16.mxu1 %v5577_v58  ;;  %v6041_v3 = vld [vmem:[#allocation124_spill] sm:$0xff]  ;;  %v6042_v58 = vld [vmem:[#allocation125_spill] sm:$0xff] }
 0x9b5   :  { %2674 = vmatpush1.bf16.msra.mxu0 %v5578_v26  ;;  %2715 = vmatpush1.bf16.msra.mxu1 %v5579_v47  ;;  %v6043_v26 = vld [vmem:[#allocation126_spill] sm:$0xff]  ;;  %v6044_v47 = vld [vmem:[#allocation127_spill] sm:$0xff] }
 0x9b6   :  { %2675 = vmatprep.subr.bf16.mxu0 %v5580_v32  ;;  %2716 = vmatprep.subr.bf16.mxu1 %v5581_v17  ;;  %v6045_v32 = vld [vmem:[#allocation128_spill] sm:$0xff]  ;;  %v6046_v17 = vld [vmem:[#allocation129_spill] sm:$0xff] }
 0x9b9   :  { %2676 = vmatpush1.bf16.msra.mxu0 %v5582_v25  ;;  %2717 = vmatpush1.bf16.msra.mxu1 %v5583_v34  ;;  %v6047_v25 = vld [vmem:[#allocation130_spill] sm:$0xff]  ;;  %v6048_v34 = vld [vmem:[#allocation131_spill] sm:$0xff] }
 0x9ba   :  { %2677 = vmatprep.subr.bf16.mxu0 %v5584_v23  ;;  %2718 = vmatprep.subr.bf16.mxu1 %v5667_v59  ;;  %v6049_v23 = vld [vmem:[#allocation132_spill] sm:$0xff]  ;;  %v6059_v59 = vld [vmem:[#allocation142_spill] sm:$0xff] }
 0x9bd   :  { %2678 = vmatpush1.bf16.msra.mxu0 %v5668_v12  ;;  %2719 = vmatpush1.bf16.msra.mxu1 %v5669_v14  ;;  %v6060_v12 = vld [vmem:[#allocation143_spill] sm:$0xff] }
 0x9be   :  { %2679 = vmatprep.subr.bf16.mxu0 %v5670_v53  ;;  %2720 = vmatprep.subr.bf16.mxu1 %v5671_v18  ;;  %v3178_v14 = vld [vmem:[#allocation11] sm:$0xff]   ;;  %v3546_v53 = vmov 0.0   ;;  %v3179_v18 = vld [vmem:[#allocation11 + $0x8] sm:$0xff]  }
 0x9c1   :  { %2680 = vmatpush1.bf16.msra.mxu0 %v5672_v57  ;;  %2721 = vmatpush1.bf16.msra.mxu1 %v5673_v28  ;;  %v3180_v57 = vld [vmem:[#allocation11 + $0x10] sm:$0xff]   ;;  %v3181_v28 = vld [vmem:[#allocation11 + $0x18] sm:$0xff]  }
 0x9c2   :  { %2681 = vmatprep.subr.bf16.mxu0 %v5674_v4  ;;  %2722 = vmatprep.subr.bf16.mxu1 %v5675_v13  ;;  %v3182_v4 = vld [vmem:[#allocation11 + $0x20] sm:$0xff]   ;;  %v3183_v13 = vld [vmem:[#allocation11 + $0x28] sm:$0xff]  }
 0x9c5   :  { %2682 = vmatpush1.bf16.msra.mxu0 %v5676_v55  ;;  %2723 = vmatpush1.bf16.msra.mxu1 %v5677_v38  ;;  %v3184_v55 = vld [vmem:[#allocation11 + $0x30] sm:$0xff]   ;;  %v3185_v38 = vld [vmem:[#allocation11 + $0x38] sm:$0xff]  }
 0x9c6   :  { %2683 = vmatprep.subr.bf16.mxu0 %v5596_v51  ;;  %2724 = vmatprep.subr.bf16.mxu1 %v5597_v10  ;;  %v6050_v51 = vld [vmem:[#allocation133_spill] sm:$0xff]  ;;  %v6051_v10 = vld [vmem:[#allocation134_spill] sm:$0xff] }
 0x9c9   :  { %2684 = vmatpush1.bf16.msra.mxu0 %v5598_v50  ;;  %2725 = vmatpush1.bf16.msra.mxu1 %v5678_v61  ;;  %v6052_v50 = vld [vmem:[#allocation135_spill] sm:$0xff] }
 0x9ca   :  { %2685 = vmatprep.subr.bf16.mxu0 %v5600_v62  ;;  %2726 = vmatprep.subr.bf16.mxu1 %v5601_v39  ;;  %v6053_v62 = vld [vmem:[#allocation136_spill] sm:$0xff]  ;;  %v6054_v39 = vld [vmem:[#allocation137_spill] sm:$0xff] }
 0x9cd   :  { %2686 = vmatpush1.bf16.msra.mxu0 %v5602_v33  ;;  %2727 = vmatpush1.bf16.msra.mxu1 %v5603_v41  ;;  %v6055_v33 = vld [vmem:[#allocation138_spill] sm:$0xff]  ;;  %v6056_v41 = vld [vmem:[#allocation139_spill] sm:$0xff] }
 0x9ce   :  { %2687 = vmatprep.subr.bf16.mxu0 %v5604_v40  ;;  %2728 = vmatprep.subr.bf16.mxu1 %v5605_v31  ;;  %v6057_v40 = vld [vmem:[#allocation140_spill] sm:$0xff]  ;;  %v6058_v31 = vld [vmem:[#allocation141_spill] sm:$0xff] }
 0x9d1   :  { %2688 = vmatpush1.bf16.msra.mxu0 %v6035_v9  ;;  %2729 = vmatpush1.bf16.msra.mxu1 %v6036_v44 }
 0x9d2   :  { %2689 = vmatprep.subr.bf16.mxu0 %v6037_v49  ;;  %2730 = vmatprep.subr.bf16.mxu1 %v6038_v6 }
 0x9d5   :  { %2690 = vmatpush1.bf16.msra.mxu0 %v6039_v35  ;;  %2731 = vmatpush1.bf16.msra.mxu1 %v6040_v37 }
 0x9d6   :  { %2691 = vmatprep.subr.bf16.mxu0 %v6041_v3  ;;  %2732 = vmatprep.subr.bf16.mxu1 %v6042_v58 }
 0x9d9   :  { %2692 = vmatpush1.bf16.msra.mxu0 %v6043_v26  ;;  %2733 = vmatpush1.bf16.msra.mxu1 %v6044_v47 }
 0x9da   :  { %2693 = vmatprep.subr.bf16.mxu0 %v6045_v32  ;;  %2734 = vmatprep.subr.bf16.mxu1 %v6046_v17 }
 0x9dd   :  { %2694 = vmatpush1.bf16.msra.mxu0 %v6047_v25  ;;  %2735 = vmatpush1.bf16.msra.mxu1 %v6048_v34  ;;  %v3111_v25 = vld [vmem:[%s5061_s4] ss:$0 sm:$0xff] }
 0x9de   :  { %2695 = vmatprep.subr.bf16.mxu0 %v6049_v23  ;;  %2736 = vmatprep.subr.bf16.mxu1 %v6050_v51 }
 0x9e1   :  { %2696 = vmatpush1.bf16.msra.mxu0 %v6051_v10  ;;  %2737 = vmatpush1.bf16.msra.mxu1 %v6052_v50 }
 0x9e2   :  { %2697 = vmatprep.subr.bf16.mxu0 %v6053_v62  ;;  %2738 = vmatprep.subr.bf16.mxu1 %v6054_v39 }
 0x9e5   :  { %2698 = vmatpush1.bf16.msra.mxu0 %v6055_v33  ;;  %2739 = vmatpush1.bf16.msra.mxu1 %v6056_v41 }
 0x9e6   :  { %2699 = vmatprep.subr.bf16.mxu0 %v6057_v40  ;;  %2740 = vmatprep.subr.bf16.mxu1 %v6058_v31 }
 0x9e9   :  { %2700 = vmatpush1.bf16.msra.mxu0 %v6059_v59  ;;  %2741 = vmatpush1.bf16.msra.mxu1 %v6060_v12 }
 0x9ea   :  { %3129 = vmatprep.subr.bf16.mxu0 %v3546_v53 }
 0x9ec   :  { %2702 = vmatmul.mubr.bf16.vlgmr.msra.gmra.mrb[60].mxu0 %v4969_v5  ;;  %2743 = vmatmul.mubr.bf16.vlgmr.msra.gmra.mrb[60].mxu1 %v4969_v5 }
 0x9ed   :  { %3130 = vmatpush3.bf16.msra.mxu0 %v3178_v14  ;;  %3145 = vmatprep.mubr.msk.bf16.mxu0 %vm3547_vm0, %v3546_v53 }
 0x9ee   :  { %3131 = vmatprep.subr.bf16.mxu0 %v3546_v53 }
 0x9f1   :  { %3132 = vmatpush3.bf16.msra.mxu0 %v3179_v18 }
 0x9f2   :  { %3133 = vmatprep.subr.bf16.mxu0 %v3546_v53 }
 0x9f5   :  { %3134 = vmatpush3.bf16.msra.mxu0 %v3180_v57 }
 0x9f6   :  { %3135 = vmatprep.subr.bf16.mxu0 %v3546_v53 }
 0x9f9   :  { %3136 = vmatpush3.bf16.msra.mxu0 %v3181_v28 }
 0x9fa   :  { %3137 = vmatprep.subr.bf16.mxu0 %v3546_v53 }
 0x9fd   :  { %3138 = vmatpush3.bf16.msra.mxu0 %v3182_v4 }
 0x9fe   :  { %3139 = vmatprep.subr.bf16.mxu0 %v3546_v53 }
 0xa01   :  { %3140 = vmatpush3.bf16.msra.mxu0 %v3183_v13 }
 0xa02   :  { %3141 = vmatprep.subr.bf16.mxu0 %v3546_v53 }
 0xa05   :  { %3142 = vmatpush3.bf16.msra.mxu0 %v3184_v55 }
 0xa06   :  { %3143 = vmatprep.subr.bf16.mxu0 %v3546_v53 }
 0xa09   :  { %3144 = vmatpush3.bf16.msra.mxu0 %v3185_v38 }
 0xa7f   :  { %v2621_v61 = vpop.f32.mrb[56].mxu0  ;;  %v2662_v7 = vpop.f32.mrb[56].mxu1 }
 0xa80   :  { %v2623_v22 = vpop.f32.mrb[57].mxu0  ;;  %v2664_v54 = vpop.f32.mrb[57].mxu1 }
 0xa81   :  { %v2625_v30 = vpop.f32.mrb[58].mxu0  ;;  %v2666_v2 = vpop.f32.mrb[58].mxu1 }
 0xa82   :  { %v2626_v15 = vpop.f32.mrb[59].mxu0  ;;  %v2667_v21 = vpop.f32.mrb[59].mxu1 }
 0xabf   :  { %v2703_v63 = vpop.f32.mrb[60].mxu0  ;;  %v2744_v1 = vpop.f32.mrb[60].mxu1 }
 0xac0   :  { %v2751_v60 = vadd.f32 %v2703_v63, %v5576_v42  ;;  %v2705_v45 = vpop.f32.mrb[61].mxu0  ;;  %v2746_v8 = vpop.f32.mrb[61].mxu1  ;;  %v2753_v52 = vadd.f32 %v2744_v1, %v4090_v36 }
 0xac1   :  { %v2752_v29 = vadd.f32 %v2705_v45, %v4083_v20  ;;  %v2707_v24 = vpop.f32.mrb[62].mxu0  ;;  %v2748_v19 = vpop.f32.mrb[62].mxu1  ;;  %v2754_v43 = vadd.f32 %v2746_v8, %v4087_v46 }
 0xac2   :  { %v3108_v16 = vmul.f32 -1.442695, %v2751_v60  ;;  %v2708_v0 = vpop.f32.mrb[63].mxu0  ;;  %v2749_v48 = vpop.f32.mrb[63].mxu1 }
 0xac3   :  { %v3109_v27 = vmul.f32 -1.442695, %v2752_v29  ;;  %v3110_v56 = vmul.f32 -1.442695, %v2754_v43 }
 0xac4   :  { %3426 = vpow2.f32 %v3108_v16 }
 0xac5   :  { %3428 = vpow2.f32 %v3109_v27 }
 0xac6   :  { %3430 = vpow2.f32 %v3110_v56 }
 0xac7   :  { %3432 = vtanh.f32 %v2753_v52 }
 0xace   :  { %v3427_v5 = vpop.eup %3426 }
 0xacf   :  { %v3429_v9 = vpop.eup %3428  ;;  %v2758_v42 = vadd.f32 1.0, %v3427_v5 }
 0xad0   :  { %v2764_v44 = vadd.f32 1.0, %v3429_v9  ;;  %v3431_v20 = vpop.eup %3430 }
 0xad1   :  { %3434 = vrcp.f32 %v2758_v42  ;;  %v3433_v49 = vpop.eup %3432  ;;  %v2771_v3 = vadd.f32 1.0, %v3431_v20 }
 0xad2   :  { %3436 = vrcp.f32 %v2764_v44 }
 0xad3   :  { %3438 = vrcp.f32 %v2771_v3 }
 0xadb   :  { %v3435_v6 = vpop.eup %3434 }
 0xadc   :  { %v3437_v35 = vpop.eup %3436  ;;  %v2775_v37 = vmul.f32 %v3435_v6, %v3433_v49 }
 0xadd   :  { %v2774_v58 = vmul.f32 %v3437_v35, %v4966_v11  ;;  %v3439_v36 = vpop.eup %3438 }
 0xadf   :  { %v2776_v46 = vadd.f32 %v2775_v37, %v2774_v58 }
 0xae1   :  { %3440 = vtanh.f32 %v2776_v46 }
 0xaeb   :  { %v3441_v26 = vpop.eup %3440 }
 0xaec   :  { %v2778_v47 = vmul.f32 %v3441_v26, %v3439_v36 }
 0xaee   :  { %v2779_v32 = vpack.c.bf16 %v2778_v47, %v2778_v47 }
 0xaf0   :  { %2780 = vst [vmem:[#allocation2 + $0x4] sm:$0xf] %v2779_v32 }
 0xaf7   :  { %v2790_v17 = vld [vmem:[#allocation2 + $0x4] sm:$0xf] }
 0xaf8   :  { %3146 = vmatmul.mubr.bf16.vlgmr.msra.gmra.mrb[64].mxu0 %v2790_v17 }
 0xbcb   :  { %v2896_v34 = vpop.f32.mrb[64].mxu0 }
 0xbcc   :  { %v2897_v23 = vadd.f32 %v3111_v25, %v2896_v34  ;;  %v3147_v51 = vpop.f32.mrb[65].mxu0 }
 0xbcd   :  { %v2899_v11 = vpop.f32.mrb[66].mxu0 }
 0xbce   :  { %2902 = vst [vmem:[#allocation12] sm:$0xff] %v2897_v23  ;;  %v3148_v10 = vpop.f32.mrb[67].mxu0 }
 0xbcf   :  { %3519 = shalt.err (!%p3516_p0)
}
 0xbd0   :  { %s3520_s4 = scalar_lea.hbm %s5062_s5, 128 }
 0xbd1   :  { %p3521_p1 = scmp.ne.s32.totalorder %s5062_s5, %s3520_s4  ;;  %p3524_p2 = scmp.lt.u32.totalorder %s3520_s4, %s5062_s5 }
 0xbd3   :  { %p3526_p3 = pnand %p3524_p2, %p3521_p1 }
 0xbd5   :  { %3529 = shalt.err (!%p3526_p3)
}
 0xbd6   :  { %2912 = dma.vmem_to_hbm [thread:$0]  %s2910_s11, 128, %s5062_s5, [#allocation8]  }
 0xbd7   :  { %3534 = dma.done.wait [#allocation8], 128  }
 0xbd8   :  { %3535 = vsyncadd [#allocation8], 4294967168 }
 0xbd9   :  { %2916 = vsyncpa [#allocation7], 1 }
 0xbda   :  { %2917 = vsyncpa [#allocation10], 1 }
 0xbdb   :  { %2918 = vsyncpa [#allocation8], 1 }

</bundles_post_ra>
